<compile_context>
chip_gen: v6e
topology: v6e:2x2x1
jax: 0.10.0
libtpu: 0.0.40
codegen_flags: <defaults>
</compile_context>

<pallas_src>
import functools

import jax
import jax.numpy as jnp
from jax.experimental import pallas as pl
from jax.experimental.pallas import tpu as pltpu

IN_DIM = 3 * 32 * 32        # 3072
H1, H2, H3, OUT = 512, 128, 32, 10
H3_PAD, OUT_PAD = 128, 128  # lane-dense padding for the tiny last layers


def _round_up(a, b):
    return ((a + b - 1) // b) * b


@functools.lru_cache(maxsize=None)
def _has_two_tensorcores():
    """v7x has 2 TensorCores per chip sharing the 'parallel' grid axis."""
    try:
        kind = jax.devices()[0].device_kind.lower()
    except Exception:
        return False
    return "v7" in kind


def _pick_tile_b(n, tile_b):
    """Pick the batch tile.

    * 16-row aligned: native for the f32 input (8) and the bf16 output (16).
    * capped at the (rounded-up) batch; ragged last block handled by Pallas.
    * v5e/v6e (single TC): one big tile per step — extra grid steps are pure
      serial overhead there.
    * v7x (two TCs): prefer >=2 grid steps with 256-aligned tiles so both
      TensorCores get full-MXU-row work.
    """
    n_up = _round_up(max(int(n), 1), 16)
    tb = max(16, min(_round_up(int(tile_b), 16), n_up))
    if _has_two_tensorcores() and n_up >= 512:
        tb = min(tb, max(256, _round_up(pl.cdiv(n_up, 2), 256)))
    return tb


def _mlp_kernel(x_ref,
                w1_ref, b1_ref,
                w2_ref, b2_ref,
                w3_ref, b3_ref,
                w4_ref, b4_ref,
                o_ref):
    """Full MLP forward for one batch tile. bf16 MXU matmuls, f32 accumulate/VPU."""
    bf16 = jnp.bfloat16

    # f32 -> bf16 cast happens here (VPU slot, hidden under the MXU) so the
    # HBM input path is a single 4 B/elem read with no wrapper-side cast pass.
    x = x_ref[...].astype(bf16)                                        # (TB, 3072)

    h = jnp.dot(x, w1_ref[...], preferred_element_type=jnp.float32)
    h = jnp.maximum(h + b1_ref[...], 0.0)                              # (TB, 512) f32

    h = jnp.dot(h.astype(bf16), w2_ref[...], preferred_element_type=jnp.float32)
    h = jnp.maximum(h + b2_ref[...], 0.0)                              # (TB, 128) f32

    h = jnp.dot(h.astype(bf16), w3_ref[...], preferred_element_type=jnp.float32)
    h = jnp.maximum(h + b3_ref[...], 0.0)                              # (TB, 128) f32 (cols >=32 are 0)

    h = jnp.dot(h.astype(bf16), w4_ref[...], preferred_element_type=jnp.float32)
    o_ref[...] = (h + b4_ref[...]).astype(o_ref.dtype)                 # (TB, 128) bf16, lane-dense


@functools.partial(jax.jit, static_argnames=("tile_b",))
def ann_forward(img, params, *, tile_b=512):
    """img: (N, 3, 32, 32) float32 -> logits (N, 10) float32."""
    w1, b1, w2, b2, w3, b3, w4, b4 = params
    n = img.shape[0]

    # Flatten exactly like img.view(-1, 3*32*32); metadata-only reshape, stays f32.
    x = img.reshape(n, IN_DIM)

    tb = _pick_tile_b(n, tile_b)
    grid = (pl.cdiv(n, tb),)   # ragged last block: OOB reads are garbage rows,
                               # OOB writes are dropped (row-independent math).

    # bf16 weights for the MXU; pad the tiny last two layers to 128 lanes with
    # zeros (exact: padded activations are 0, padded weight rows contribute 0)
    # so the final matmuls and the output store stay lane-dense.
    w1b = w1.astype(jnp.bfloat16)
    w2b = w2.astype(jnp.bfloat16)
    w3b = jnp.pad(w3, ((0, 0), (0, H3_PAD - H3))).astype(jnp.bfloat16)              # (128, 128)
    b3p = jnp.pad(b3, ((0, 0), (0, H3_PAD - H3)))                                   # (1, 128) f32
    w4b = jnp.pad(w4, ((0, H3_PAD - H3), (0, OUT_PAD - OUT))).astype(jnp.bfloat16)  # (128, 128)
    b4p = jnp.pad(b4, ((0, 0), (0, OUT_PAD - OUT)))                                 # (1, 128) f32

    resident = lambda i: (0, 0)   # weights/biases stay resident across batch tiles
    # TODO(synk): mark resident specs pipeline_mode=pl.Buffered(1) once single-buffer
    # pipeline_mode is verified on the target jax version (saves ~3.4 MiB VMEM).

    weight_bytes = sum(int(a.size) * a.dtype.itemsize
                       for a in (w1b, w2b, w3b, w4b, b1, b2, b3p, b4p))
    cost = pl.CostEstimate(
        flops=2 * n * (IN_DIM * H1 + H1 * H2 + H2 * H3_PAD + H3_PAD * OUT_PAD),
        transcendentals=0,
        bytes_accessed=n * IN_DIM * 4 + weight_bytes + n * OUT_PAD * 2,
    )

    out = pl.pallas_call(
        _mlp_kernel,
        out_shape=jax.ShapeDtypeStruct((n, OUT_PAD), jnp.bfloat16),
        grid_spec=pltpu.PrefetchScalarGridSpec(
            num_scalar_prefetch=0,
            grid=grid,
            in_specs=[
                pl.BlockSpec((tb, IN_DIM), lambda i: (i, 0)),
                pl.BlockSpec((IN_DIM, H1), resident),
                pl.BlockSpec((1, H1), resident),
                pl.BlockSpec((H1, H2), resident),
                pl.BlockSpec((1, H2), resident),
                pl.BlockSpec((H2, H3_PAD), resident),
                pl.BlockSpec((1, H3_PAD), resident),
                pl.BlockSpec((H3_PAD, OUT_PAD), resident),
                pl.BlockSpec((1, OUT_PAD), resident),
            ],
            out_specs=pl.BlockSpec((tb, OUT_PAD), lambda i: (i, 0)),
        ),
        compiler_params=pltpu.CompilerParams(
            dimension_semantics=("parallel",),
            vmem_limit_bytes=40 << 20,   # ~20 MiB needed at tb=512; < v7x's 64 MiB cap
        ),
        cost_estimate=cost,
    )(x, w1b, b1, w2b, b2, w3b, b3p, w4b, b4p)

    # Slice the real logits and return f32 (matches nn.Linear's output dtype).
    return out[:, :OUT].astype(jnp.float32)


def init_params(key):
    """Deterministic init mirroring nn.Linear's U(-1/sqrt(fan_in), 1/sqrt(fan_in)).

    Weights are stored transposed: (in_features, out_features)."""
    dims = [(IN_DIM, H1), (H1, H2), (H2, H3), (H3, OUT)]
    params = []
    for i, (fan_in, fan_out) in enumerate(dims):
        kw, kb = jax.random.split(jax.random.fold_in(key, i))
        bound = 1.0 / jnp.sqrt(float(fan_in))
        w = jax.random.uniform(kw, (fan_in, fan_out), jnp.float32, -bound, bound)
        b = jax.random.uniform(kb, (1, fan_out), jnp.float32, -bound, bound)
        params += [w, b]
    return tuple(params)


def _reference(img, params):
    """Pure-JAX reference mirroring the kernel numerics (bf16 matmuls, f32 acc,
    bf16 logits rounded back to f32)."""
    w1, b1, w2, b2, w3, b3, w4, b4 = params
    bf = jnp.bfloat16
    x = img.reshape(img.shape[0], IN_DIM).astype(bf)
    h = jnp.maximum(jnp.dot(x, w1.astype(bf), preferred_element_type=jnp.float32) + b1, 0.0)
    h = jnp.maximum(jnp.dot(h.astype(bf), w2.astype(bf), preferred_element_type=jnp.float32) + b2, 0.0)
    h = jnp.maximum(jnp.dot(h.astype(bf), w3.astype(bf), preferred_element_type=jnp.float32) + b3, 0.0)
    out = jnp.dot(h.astype(bf), w4.astype(bf), preferred_element_type=jnp.float32) + b4
    return out.astype(bf).astype(jnp.float32)


if __name__ == "__main__":
    key = jax.random.PRNGKey(0)
    k_img, k_par = jax.random.split(key)

    params = init_params(k_par)

    # Small CIFAR-10-shaped batch: NCHW (2, 3, 32, 32).
    img = jax.random.normal(k_img, (2, 3, 32, 32), jnp.float32)
    logits = ann_forward(img, params)
    jax.block_until_ready(logits)

    ref = _reference(img, params)
    assert logits.shape == (2, 10)
    assert jnp.allclose(logits, ref, atol=1e-2, rtol=1e-2), (
        float(jnp.max(jnp.abs(logits - ref))))

    # Exercise the ragged multi-tile path (no jnp.pad): batch 20 with a 16-row
    # tile -> 2 grid steps, last block overhangs and relies on partial-block
    # read/write semantics; resident weights reused across steps.
    img2 = jax.random.normal(jax.random.fold_in(k_img, 1), (20, 3, 32, 32), jnp.float32)
    logits2 = ann_forward(img2, params, tile_b=16)
    jax.block_until_ready(logits2)
    ref2 = _reference(img2, params)
    assert logits2.shape == (20, 10)
    assert jnp.allclose(logits2, ref2, atol=1e-2, rtol=1e-2), (
        float(jnp.max(jnp.abs(logits2 - ref2))))

    print("KERNEL_OK")
</pallas_src>

<mosaic_0001>
module attributes {stable_mosaic.version = 11 : i64} {
  func.func @_mlp_kernel(%arg0: i32, %arg1: memref<16x3072xf32, #tpu.memory_space<vmem>>, %arg2: memref<3072x512xbf16, #tpu.memory_space<vmem>>, %arg3: memref<1x512xf32, #tpu.memory_space<vmem>>, %arg4: memref<512x128xbf16, #tpu.memory_space<vmem>>, %arg5: memref<1x128xf32, #tpu.memory_space<vmem>>, %arg6: memref<128x128xbf16, #tpu.memory_space<vmem>>, %arg7: memref<1x128xf32, #tpu.memory_space<vmem>>, %arg8: memref<128x128xbf16, #tpu.memory_space<vmem>>, %arg9: memref<1x128xf32, #tpu.memory_space<vmem>>, %arg10: memref<16x128xbf16, #tpu.memory_space<vmem>>) attributes {dimension_semantics = [#tpu.dimension_semantics<parallel>], iteration_bounds = array<i64: 1>, scalar_prefetch = 0 : i64, scratch_operands = 0 : i64, tpu.core_type = #tpu.core_type<tc>, window_params = [{transform_indices = @transform_0, window_bounds = array<i64: 16, 3072>}, {pipeline_mode = #tpu.pipeline_mode<synchronous>, transform_indices = @transform_1, window_bounds = array<i64: 3072, 512>}, {pipeline_mode = #tpu.pipeline_mode<synchronous>, transform_indices = @transform_2, window_bounds = array<i64: 1, 512>}, {pipeline_mode = #tpu.pipeline_mode<synchronous>, transform_indices = @transform_3, window_bounds = array<i64: 512, 128>}, {pipeline_mode = #tpu.pipeline_mode<synchronous>, transform_indices = @transform_4, window_bounds = array<i64: 1, 128>}, {pipeline_mode = #tpu.pipeline_mode<synchronous>, transform_indices = @transform_5, window_bounds = array<i64: 128, 128>}, {pipeline_mode = #tpu.pipeline_mode<synchronous>, transform_indices = @transform_6, window_bounds = array<i64: 1, 128>}, {pipeline_mode = #tpu.pipeline_mode<synchronous>, transform_indices = @transform_7, window_bounds = array<i64: 128, 128>}, {pipeline_mode = #tpu.pipeline_mode<synchronous>, transform_indices = @transform_8, window_bounds = array<i64: 1, 128>}, {transform_indices = @transform_9, window_bounds = array<i64: 16, 128>}]} {
    %c0 = arith.constant 0 : index
    %c0_0 = arith.constant 0 : index
    %0 = vector.load %arg1[%c0, %c0_0] : memref<16x3072xf32, #tpu.memory_space<vmem>>, vector<16x3072xf32>
    %1 = arith.truncf %0 : vector<16x3072xf32> to vector<16x3072xbf16>
    %c0_1 = arith.constant 0 : index
    %c0_2 = arith.constant 0 : index
    %2 = vector.load %arg2[%c0_1, %c0_2] : memref<3072x512xbf16, #tpu.memory_space<vmem>>, vector<3072x512xbf16>
    %cst = arith.constant dense<0.000000e+00> : vector<16x512xf32>
    %3 = tpu.matmul %1, %2, %cst {dimension_numbers = #tpu.dot_dimension_numbers<[1], [0], [0], [1], [0, 0, 1, 1], [], []>} : vector<16x3072xbf16>, vector<3072x512xbf16>, vector<16x512xf32> -> vector<16x512xf32>
    %c0_3 = arith.constant 0 : index
    %c0_4 = arith.constant 0 : index
    %4 = vector.load %arg3[%c0_3, %c0_4] : memref<1x512xf32, #tpu.memory_space<vmem>>, vector<1x512xf32>
    %5 = vector.broadcast %4 : vector<1x512xf32> to vector<16x512xf32>
    %6 = arith.addf %3, %5 : vector<16x512xf32>
    %cst_5 = arith.constant 0.000000e+00 : f32
    %7 = vector.broadcast %cst_5 : f32 to vector<16x512xf32>
    %8 = arith.maximumf %6, %7 : vector<16x512xf32>
    %9 = arith.truncf %8 : vector<16x512xf32> to vector<16x512xbf16>
    %c0_6 = arith.constant 0 : index
    %c0_7 = arith.constant 0 : index
    %10 = vector.load %arg4[%c0_6, %c0_7] : memref<512x128xbf16, #tpu.memory_space<vmem>>, vector<512x128xbf16>
    %cst_8 = arith.constant dense<0.000000e+00> : vector<16x128xf32>
    %11 = tpu.matmul %9, %10, %cst_8 {dimension_numbers = #tpu.dot_dimension_numbers<[1], [0], [0], [1], [0, 0, 1, 1], [], []>} : vector<16x512xbf16>, vector<512x128xbf16>, vector<16x128xf32> -> vector<16x128xf32>
    %c0_9 = arith.constant 0 : index
    %c0_10 = arith.constant 0 : index
    %12 = vector.load %arg5[%c0_9, %c0_10] : memref<1x128xf32, #tpu.memory_space<vmem>>, vector<1x128xf32>
    %13 = vector.broadcast %12 : vector<1x128xf32> to vector<16x128xf32>
    %14 = arith.addf %11, %13 : vector<16x128xf32>
    %cst_11 = arith.constant 0.000000e+00 : f32
    %15 = vector.broadcast %cst_11 : f32 to vector<16x128xf32>
    %16 = arith.maximumf %14, %15 : vector<16x128xf32>
    %17 = arith.truncf %16 : vector<16x128xf32> to vector<16x128xbf16>
    %c0_12 = arith.constant 0 : index
    %c0_13 = arith.constant 0 : index
    %18 = vector.load %arg6[%c0_12, %c0_13] : memref<128x128xbf16, #tpu.memory_space<vmem>>, vector<128x128xbf16>
    %cst_14 = arith.constant dense<0.000000e+00> : vector<16x128xf32>
    %19 = tpu.matmul %17, %18, %cst_14 {dimension_numbers = #tpu.dot_dimension_numbers<[1], [0], [0], [1], [0, 0, 1, 1], [], []>} : vector<16x128xbf16>, vector<128x128xbf16>, vector<16x128xf32> -> vector<16x128xf32>
    %c0_15 = arith.constant 0 : index
    %c0_16 = arith.constant 0 : index
    %20 = vector.load %arg7[%c0_15, %c0_16] : memref<1x128xf32, #tpu.memory_space<vmem>>, vector<1x128xf32>
    %21 = vector.broadcast %20 : vector<1x128xf32> to vector<16x128xf32>
    %22 = arith.addf %19, %21 : vector<16x128xf32>
    %cst_17 = arith.constant 0.000000e+00 : f32
    %23 = vector.broadcast %cst_17 : f32 to vector<16x128xf32>
    %24 = arith.maximumf %22, %23 : vector<16x128xf32>
    %25 = arith.truncf %24 : vector<16x128xf32> to vector<16x128xbf16>
    %c0_18 = arith.constant 0 : index
    %c0_19 = arith.constant 0 : index
    %26 = vector.load %arg8[%c0_18, %c0_19] : memref<128x128xbf16, #tpu.memory_space<vmem>>, vector<128x128xbf16>
    %cst_20 = arith.constant dense<0.000000e+00> : vector<16x128xf32>
    %27 = tpu.matmul %25, %26, %cst_20 {dimension_numbers = #tpu.dot_dimension_numbers<[1], [0], [0], [1], [0, 0, 1, 1], [], []>} : vector<16x128xbf16>, vector<128x128xbf16>, vector<16x128xf32> -> vector<16x128xf32>
    %c0_21 = arith.constant 0 : index
    %c0_22 = arith.constant 0 : index
    %28 = vector.load %arg9[%c0_21, %c0_22] : memref<1x128xf32, #tpu.memory_space<vmem>>, vector<1x128xf32>
    %29 = vector.broadcast %28 : vector<1x128xf32> to vector<16x128xf32>
    %30 = arith.addf %27, %29 : vector<16x128xf32>
    %31 = arith.truncf %30 : vector<16x128xf32> to vector<16x128xbf16>
    %c0_23 = arith.constant 0 : index
    %c0_24 = arith.constant 0 : index
    %32 = vector.load %arg10[%c0_23, %c0_24] : memref<16x128xbf16, #tpu.memory_space<vmem>>, vector<16x128xbf16>
    tpu.vector_store %arg10[%c0_23, %c0_24], %31 {strides = array<i32>} : memref<16x128xbf16, #tpu.memory_space<vmem>>, vector<16x128xbf16>,
    return
  }
  func.func @transform_0(%arg0: i32) -> (i32, i32) {
    %c0_i32 = arith.constant 0 : i32
    %c0_i32_0 = arith.constant 0 : i32
    return %arg0, %c0_i32 : i32, i32
  }
  func.func @transform_1(%arg0: i32) -> (i32, i32) {
    %c0_i32 = arith.constant 0 : i32
    %c0_i32_0 = arith.constant 0 : i32
    %c0_i32_1 = arith.constant 0 : i32
    return %c0_i32, %c0_i32_0 : i32, i32
  }
  func.func @transform_2(%arg0: i32) -> (i32, i32) {
    %c0_i32 = arith.constant 0 : i32
    %c0_i32_0 = arith.constant 0 : i32
    %c0_i32_1 = arith.constant 0 : i32
    return %c0_i32, %c0_i32_0 : i32, i32
  }
  func.func @transform_3(%arg0: i32) -> (i32, i32) {
    %c0_i32 = arith.constant 0 : i32
    %c0_i32_0 = arith.constant 0 : i32
    %c0_i32_1 = arith.constant 0 : i32
    return %c0_i32, %c0_i32_0 : i32, i32
  }
  func.func @transform_4(%arg0: i32) -> (i32, i32) {
    %c0_i32 = arith.constant 0 : i32
    %c0_i32_0 = arith.constant 0 : i32
    %c0_i32_1 = arith.constant 0 : i32
    return %c0_i32, %c0_i32_0 : i32, i32
  }
  func.func @transform_5(%arg0: i32) -> (i32, i32) {
    %c0_i32 = arith.constant 0 : i32
    %c0_i32_0 = arith.constant 0 : i32
    %c0_i32_1 = arith.constant 0 : i32
    return %c0_i32, %c0_i32_0 : i32, i32
  }
  func.func @transform_6(%arg0: i32) -> (i32, i32) {
    %c0_i32 = arith.constant 0 : i32
    %c0_i32_0 = arith.constant 0 : i32
    %c0_i32_1 = arith.constant 0 : i32
    return %c0_i32, %c0_i32_0 : i32, i32
  }
  func.func @transform_7(%arg0: i32) -> (i32, i32) {
    %c0_i32 = arith.constant 0 : i32
    %c0_i32_0 = arith.constant 0 : i32
    %c0_i32_1 = arith.constant 0 : i32
    return %c0_i32, %c0_i32_0 : i32, i32
  }
  func.func @transform_8(%arg0: i32) -> (i32, i32) {
    %c0_i32 = arith.constant 0 : i32
    %c0_i32_0 = arith.constant 0 : i32
    %c0_i32_1 = arith.constant 0 : i32
    return %c0_i32, %c0_i32_0 : i32, i32
  }
  func.func @transform_9(%arg0: i32) -> (i32, i32) {
    %c0_i32 = arith.constant 0 : i32
    %c0_i32_0 = arith.constant 0 : i32
    return %arg0, %c0_i32 : i32, i32
  }
}

</mosaic_0001>

<bundles_post_ra>
// kernel: ann_forward.1
= control target key start
LH: loop header
LB: loop body
LE: loop exit
PB: predicated region body
PF: predicated region fallthrough
CT: control target
= control target key end

     0   :  { %v9192_v39 = vmov 1983009808   ;;  %v136_v41 = vlaneseq  ;;  %vm9194_vm0 = vmmov 0   ;;  %s12314_s0 = inlined_call_operand.vmem [shape: f32[2,3072], index: 0, kind: input, shape index: {}]   ;;  %s12315_s1 = inlined_call_operand.vmem [shape: bf16[3072,512], index: 1, kind: input, shape index: {}]   ;;  %s12316_s2 = inlined_call_operand.vmem [shape: f32[1,512], index: 2, kind: input, shape index: {}]   ;;  %s12317_s3 = inlined_call_operand.vmem [shape: bf16[512,128], index: 3, kind: input, shape index: {}]   ;;  %s12318_s4 = inlined_call_operand.vmem [shape: f32[1,128], index: 4, kind: input, shape index: {}]   ;;  %s12319_s5 = inlined_call_operand.vmem [shape: bf16[128,128], index: 5, kind: input, shape index: {}]   ;;  %s12320_s6 = inlined_call_operand.vmem [shape: f32[1,128], index: 6, kind: input, shape index: {}]   ;;  %s12321_s7 = inlined_call_operand.vmem [shape: bf16[128,128], index: 7, kind: input, shape index: {}]   ;;  %s12322_s8 = inlined_call_operand.vmem [shape: f32[1,128], index: 8, kind: input, shape index: {}]   ;;  %s12323_s9 = inlined_call_operand.vmem [shape: bf16[2,128], index: 9, kind: output, shape index: {}]  }
   0x1   :  { %v7920_v0 = vld [vmem:[%s12315_s1 + $0xe4] ss:$16 sps:$4 sm:$0xff]   ;;  %v7924_v2 = vld [vmem:[%s12315_s1 + $0xe0] ss:$16 sps:$4 sm:$0xff]   ;;  %v134_v40 = vunpack.c.l.s4 %v9192_v39 }
   0x2   :  { %v7922_v1 = vld [vmem:[%s12315_s1 + $0x2e4] ss:$16 sps:$4 sm:$0xff]   ;;  %5263 = vmatprep.subr.bf16.mxu0 %v7920_v0  ;;  %v7925_v3 = vld [vmem:[%s12315_s1 + $0x2e0] ss:$16 sps:$4 sm:$0xff]   ;;  %v9378_v48 = vshrl.u32 %v136_v41, 7 }
   0x3   :  { %5306 = vmatprep.subr.bf16.mxu1 %v7922_v1  ;;  %v7926_v4 = vld [vmem:[%s12315_s1 + $0xc4] ss:$16 sps:$4 sm:$0xff]   ;;  %5264 = vmatpush1.bf16.msra.mxu0 %v7924_v2  ;;  %v7930_v6 = vld [vmem:[%s12315_s1 + $0xc0] ss:$16 sps:$4 sm:$0xff]   ;;  %v135_v47 = vunpack.c.0.s8 %v134_v40 }
   0x4   :  { %5307 = vmatpush1.bf16.msra.mxu1 %v7925_v3  ;;  %v7928_v5 = vld [vmem:[%s12315_s1 + $0x2c4] ss:$16 sps:$4 sm:$0xff]   ;;  %5265 = vmatprep.subr.bf16.mxu0 %v7926_v4  ;;  %v7931_v7 = vld [vmem:[%s12315_s1 + $0x2c0] ss:$16 sps:$4 sm:$0xff]  }
   0x5   :  { %5308 = vmatprep.subr.bf16.mxu1 %v7928_v5  ;;  %v7932_v8 = vld [vmem:[%s12315_s1 + $0xa4] ss:$16 sps:$4 sm:$0xff]   ;;  %v7936_v10 = vld [vmem:[%s12315_s1 + $0xa0] ss:$16 sps:$4 sm:$0xff]   ;;  %v9399_v55 = vsub.s32 %v135_v47, %v9378_v48 }
   0x6   :  { %v7934_v9 = vld [vmem:[%s12315_s1 + $0x2a4] ss:$16 sps:$4 sm:$0xff]   ;;  %v7937_v11 = vld [vmem:[%s12315_s1 + $0x2a0] ss:$16 sps:$4 sm:$0xff]  }
   0x7   :  { %5266 = vmatpush1.bf16.msra.mxu0 %v7930_v6  ;;  %v7938_v12 = vld [vmem:[%s12315_s1 + $0x84] ss:$16 sps:$4 sm:$0xff]   ;;  %v7942_v14 = vld [vmem:[%s12315_s1 + $0x80] ss:$16 sps:$4 sm:$0xff]  }
   0x8   :  { %5309 = vmatpush1.bf16.msra.mxu1 %v7931_v7  ;;  %5267 = vmatprep.subr.bf16.mxu0 %v7932_v8  ;;  %v7940_v13 = vld [vmem:[%s12315_s1 + $0x284] ss:$16 sps:$4 sm:$0xff]   ;;  %v7943_v15 = vld [vmem:[%s12315_s1 + $0x280] ss:$16 sps:$4 sm:$0xff]  }
   0x9   :  { %5310 = vmatprep.subr.bf16.mxu1 %v7934_v9  ;;  %v7944_v16 = vld [vmem:[%s12315_s1 + $0x64] ss:$16 sps:$4 sm:$0xff]   ;;  %v7948_v18 = vld [vmem:[%s12315_s1 + $0x60] ss:$16 sps:$4 sm:$0xff]  }
   0xa   :  { %v7946_v17 = vld [vmem:[%s12315_s1 + $0x264] ss:$16 sps:$4 sm:$0xff]   ;;  %v7949_v19 = vld [vmem:[%s12315_s1 + $0x260] ss:$16 sps:$4 sm:$0xff]  }
   0xb   :  { %5268 = vmatpush1.bf16.msra.mxu0 %v7936_v10  ;;  %v7950_v20 = vld [vmem:[%s12315_s1 + $0x44] ss:$16 sps:$4 sm:$0xff]   ;;  %v7954_v22 = vld [vmem:[%s12315_s1 + $0x40] ss:$16 sps:$4 sm:$0xff]  }
   0xc   :  { %5311 = vmatpush1.bf16.msra.mxu1 %v7937_v11  ;;  %5269 = vmatprep.subr.bf16.mxu0 %v7938_v12  ;;  %v7952_v21 = vld [vmem:[%s12315_s1 + $0x244] ss:$16 sps:$4 sm:$0xff]   ;;  %v7955_v23 = vld [vmem:[%s12315_s1 + $0x240] ss:$16 sps:$4 sm:$0xff]  }
   0xd   :  { %5312 = vmatprep.subr.bf16.mxu1 %v7940_v13  ;;  %v7956_v24 = vld [vmem:[%s12315_s1 + $0x24] ss:$16 sps:$4 sm:$0xff]   ;;  %v7960_v26 = vld [vmem:[%s12315_s1 + $0x20] ss:$16 sps:$4 sm:$0xff]  }
   0xe   :  { %v7958_v25 = vld [vmem:[%s12315_s1 + $0x224] ss:$16 sps:$4 sm:$0xff]   ;;  %v7961_v27 = vld [vmem:[%s12315_s1 + $0x220] ss:$16 sps:$4 sm:$0xff]  }
   0xf   :  { %5270 = vmatpush1.bf16.msra.mxu0 %v7942_v14  ;;  %v7962_v28 = vld [vmem:[%s12315_s1 + $0x4] ss:$16 sps:$4 sm:$0xff]   ;;  %v7966_v30 = vld [vmem:[%s12315_s1] ss:$16 sps:$4 sm:$0xff]  }
  0x10   :  { %5313 = vmatpush1.bf16.msra.mxu1 %v7943_v15  ;;  %5271 = vmatprep.subr.bf16.mxu0 %v7944_v16  ;;  %v7964_v29 = vld [vmem:[%s12315_s1 + $0x204] ss:$16 sps:$4 sm:$0xff]   ;;  %v7967_v31 = vld [vmem:[%s12315_s1 + $0x200] ss:$16 sps:$4 sm:$0xff]  }
  0x11   :  { %5314 = vmatprep.subr.bf16.mxu1 %v7946_v17  ;;  %v7968_v32 = vld [vmem:[%s12315_s1 + $0x1e4] ss:$16 sps:$4 sm:$0xff]   ;;  %v7972_v34 = vld [vmem:[%s12315_s1 + $0x1e0] ss:$16 sps:$4 sm:$0xff]  }
  0x12   :  { %v7970_v33 = vld [vmem:[%s12315_s1 + $0x3e4] ss:$16 sps:$4 sm:$0xff]   ;;  %v7973_v35 = vld [vmem:[%s12315_s1 + $0x3e0] ss:$16 sps:$4 sm:$0xff]  }
  0x13   :  { %5272 = vmatpush1.bf16.msra.mxu0 %v7948_v18  ;;  %v7974_v36 = vld [vmem:[%s12315_s1 + $0x1c4] ss:$16 sps:$4 sm:$0xff]   ;;  %v7978_v38 = vld [vmem:[%s12315_s1 + $0x1c0] ss:$16 sps:$4 sm:$0xff]  }
  0x14   :  { %5315 = vmatpush1.bf16.msra.mxu1 %v7949_v19  ;;  %5273 = vmatprep.subr.bf16.mxu0 %v7950_v20  ;;  %v7976_v37 = vld [vmem:[%s12315_s1 + $0x3c4] ss:$16 sps:$4 sm:$0xff]   ;;  %v7979_v42 = vld [vmem:[%s12315_s1 + $0x3c0] ss:$16 sps:$4 sm:$0xff]  }
  0x15   :  { %5316 = vmatprep.subr.bf16.mxu1 %v7952_v21  ;;  %v7980_v43 = vld [vmem:[%s12315_s1 + $0x1a4] ss:$16 sps:$4 sm:$0xff]   ;;  %v7984_v45 = vld [vmem:[%s12315_s1 + $0x1a0] ss:$16 sps:$4 sm:$0xff]  }
  0x16   :  { %v7982_v44 = vld [vmem:[%s12315_s1 + $0x3a4] ss:$16 sps:$4 sm:$0xff]   ;;  %v7985_v46 = vld [vmem:[%s12315_s1 + $0x3a0] ss:$16 sps:$4 sm:$0xff]  }
  0x17   :  { %5274 = vmatpush1.bf16.msra.mxu0 %v7954_v22  ;;  %v7986_v49 = vld [vmem:[%s12315_s1 + $0x184] ss:$16 sps:$4 sm:$0xff]   ;;  %v7990_v51 = vld [vmem:[%s12315_s1 + $0x180] ss:$16 sps:$4 sm:$0xff]  }
  0x18   :  { %5317 = vmatpush1.bf16.msra.mxu1 %v7955_v23  ;;  %5275 = vmatprep.subr.bf16.mxu0 %v7956_v24  ;;  %v7988_v50 = vld [vmem:[%s12315_s1 + $0x384] ss:$16 sps:$4 sm:$0xff]   ;;  %v7991_v52 = vld [vmem:[%s12315_s1 + $0x380] ss:$16 sps:$4 sm:$0xff]  }
  0x19   :  { %5318 = vmatprep.subr.bf16.mxu1 %v7958_v25  ;;  %v7992_v53 = vld [vmem:[%s12315_s1 + $0x164] ss:$16 sps:$4 sm:$0xff]   ;;  %v8016_v56 = vld [vmem:[%s12314_s0] ss:$48 sps:$4 sm:$0xff]  }
  0x1a   :  { %v7994_v54 = vld [vmem:[%s12315_s1 + $0x364] ss:$16 sps:$4 sm:$0xff]   ;;  %v8018_v57 = vld [vmem:[%s12314_s0 + $0x60] ss:$48 sps:$4 sm:$0xff]   ;;  %v139_v63 = vrot.slane %v8016_v56, %v9399_v55 }
  0x1b   :  { %5276 = vmatpush1.bf16.msra.mxu0 %v7960_v26  ;;  %v7996_v58 = vld [vmem:[%s12315_s1 + $0x160] ss:$16 sps:$4 sm:$0xff]   ;;  %v8024_v62 = vld [vmem:[%s12314_s0 + $0x4] ss:$48 sps:$4 sm:$0xff]   ;;  %v153_v0 = vrot.slane %v8018_v57, %v9399_v55 }
  0x1c   :  { %5319 = vmatpush1.bf16.msra.mxu1 %v7961_v27  ;;  %5277 = vmatprep.subr.bf16.mxu0 %v7962_v28  ;;  %v7997_v59 = vld [vmem:[%s12315_s1 + $0x360] ss:$16 sps:$4 sm:$0xff]   ;;  %v8025_v1 = vld [vmem:[%s12314_s0 + $0x64] ss:$48 sps:$4 sm:$0xff]   ;;  %v146_v7 = vrot.slane %v8024_v62, %v9399_v55 }
  0x1d   :  { %5320 = vmatprep.subr.bf16.mxu1 %v7964_v29  ;;  %v8020_v60 = vld [vmem:[%s12314_s0 + $0xc0] ss:$48 sps:$4 sm:$0xff]   ;;  %v8026_v2 = vld [vmem:[%s12314_s0 + $0xc4] ss:$48 sps:$4 sm:$0xff]   ;;  %v162_v9 = vcombine.high %v139_v63, %v153_v0  ;;  %v160_v10 = vrot.slane %v8025_v1, %v9399_v55  ;;  %v161_v28 = vcombine.low %v139_v63, %v153_v0 }
  0x1e   :  { %v8022_v61 = vld [vmem:[%s12314_s0 + $0x120] ss:$48 sps:$4 sm:$0xff]   ;;  %v8027_v3 = vld [vmem:[%s12314_s0 + $0x124] ss:$48 sps:$4 sm:$0xff]   ;;  %v355_v5 = vrot.slane %v8020_v60, %v9399_v55  ;;  %v362_v11 = vrot.slane %v8026_v2, %v9399_v55 }
  0x1f   :  { %5278 = vmatpush1.bf16.msra.mxu0 %v7966_v30  ;;  %v7998_v4 = vld [vmem:[%s12315_s1 + $0x144] ss:$16 sps:$4 sm:$0xff]   ;;  %v369_v6 = vrot.slane %v8022_v61, %v9399_v55  ;;  %v376_v13 = vrot.slane %v8027_v3, %v9399_v55  ;;  %v8002_v14 = vld [vmem:[%s12315_s1 + $0x140] ss:$16 sps:$4 sm:$0xff]   ;;  %v164_v16 = vcombine.high %v146_v7, %v160_v10  ;;  %v163_v30 = vcombine.low %v146_v7, %v160_v10  ;;  %v8126_v7 = vld [vmem:[%s12314_s0 + $0x68] ss:$48 sps:$4 sm:$0xff]  }
  0x20   :  { %5321 = vmatpush1.bf16.msra.mxu1 %v7967_v31  ;;  %5279 = vmatprep.subr.bf16.mxu0 %v7968_v32  ;;  %v8000_v8 = vld [vmem:[%s12315_s1 + $0x344] ss:$16 sps:$4 sm:$0xff]   ;;  %v8003_v15 = vld [vmem:[%s12315_s1 + $0x340] ss:$16 sps:$4 sm:$0xff]   ;;  %v8128_v10 = vld [vmem:[%s12314_s0 + $0xc8] ss:$48 sps:$4 sm:$0xff]  }
  0x21   :  { %5322 = vmatprep.subr.bf16.mxu1 %v7970_v33  ;;  %v378_v12 = vcombine.high %v355_v5, %v369_v6  ;;  %v8004_v17 = vld [vmem:[%s12315_s1 + $0x124] ss:$16 sps:$4 sm:$0xff]   ;;  %v380_v19 = vcombine.high %v362_v11, %v376_v13  ;;  %v8008_v22 = vld [vmem:[%s12315_s1 + $0x120] ss:$16 sps:$4 sm:$0xff]   ;;  %v377_v29 = vcombine.low %v355_v5, %v369_v6  ;;  %v379_v31 = vcombine.low %v362_v11, %v376_v13  ;;  %v8124_v6 = vld [vmem:[%s12314_s0 + $0x8] ss:$48 sps:$4 sm:$0xff]  }
  0x22   :  { %v8006_v20 = vld [vmem:[%s12315_s1 + $0x324] ss:$16 sps:$4 sm:$0xff]   ;;  %v8009_v23 = vld [vmem:[%s12315_s1 + $0x320] ss:$16 sps:$4 sm:$0xff]   ;;  %v8130_v11 = vld [vmem:[%s12314_s0 + $0x128] ss:$48 sps:$4 sm:$0xff]   ;;  %v9611_v13 = vrot.slane %v8124_v6, %v9399_v55 }
  0x23   :  { %5280 = vmatpush2.bf16.msra.mxu0 %v7972_v34  ;;  %v9454_v18 = vpack.c.bf16 %v378_v12, %v162_v9  ;;  %v9460_v21 = vpack.c.bf16 %v380_v19, %v164_v16  ;;  %v8010_v24 = vld [vmem:[%s12315_s1 + $0x104] ss:$16 sps:$4 sm:$0xff]   ;;  %v8014_v26 = vld [vmem:[%s12315_s1 + $0x100] ss:$16 sps:$4 sm:$0xff]   ;;  %v9487_v34 = vpack.c.bf16 %v377_v29, %v161_v28  ;;  %v8132_v12 = vld [vmem:[%s12314_s0 + $0xc] ss:$48 sps:$4 sm:$0xff]  }
  0x24   :  { %5323 = vmatpush2.bf16.msra.mxu1 %v7973_v35  ;;  %5281 = vmatprep.subr.bf16.mxu0 %v7974_v36  ;;  %v8012_v25 = vld [vmem:[%s12315_s1 + $0x304] ss:$16 sps:$4 sm:$0xff]   ;;  %v8015_v27 = vld [vmem:[%s12315_s1 + $0x300] ss:$16 sps:$4 sm:$0xff]   ;;  %v9489_v35 = vpack.c.bf16 %v379_v31, %v163_v30  ;;  %v8134_v16 = vld [vmem:[%s12314_s0 + $0xcc] ss:$48 sps:$4 sm:$0xff]  }
  0x25   :  { %5324 = vmatprep.subr.bf16.mxu1 %v7976_v37  ;;  %5295 = vmatprep.mubr.bf16.mxu0 %v9454_v18  ;;  %v8030_v32 = vld [vmem:[%s12315_s1 + $0x4e4] ss:$16 sps:$4 sm:$0xff]   ;;  %v8028_v36 = vld [vmem:[%s12315_s1 + $0x4e0] ss:$16 sps:$4 sm:$0xff]  }
  0x26   :  { %5338 = vmatprep.mubr.bf16.mxu1 %v9460_v21  ;;  %v8033_v33 = vld [vmem:[%s12315_s1 + $0x6e4] ss:$16 sps:$4 sm:$0xff]   ;;  %v8031_v37 = vld [vmem:[%s12315_s1 + $0x6e0] ss:$16 sps:$4 sm:$0xff]  }
  0x27   :  { %5282 = vmatpush2.bf16.msra.mxu0 %v7978_v38  ;;  %v8036_v38 = vld [vmem:[%s12315_s1 + $0x4c4] ss:$16 sps:$4 sm:$0xff]   ;;  %v8034_v40 = vld [vmem:[%s12315_s1 + $0x4c0] ss:$16 sps:$4 sm:$0xff]  }
  0x28   :  { %5325 = vmatpush2.bf16.msra.mxu1 %v7979_v42  ;;  %5283 = vmatprep.subr.bf16.mxu0 %v7980_v43  ;;  %v8039_v39 = vld [vmem:[%s12315_s1 + $0x6c4] ss:$16 sps:$4 sm:$0xff]   ;;  %v8037_v41 = vld [vmem:[%s12315_s1 + $0x6c0] ss:$16 sps:$4 sm:$0xff]  }
  0x29   :  { %5326 = vmatprep.subr.bf16.mxu1 %v7982_v44  ;;  %v8042_v42 = vld [vmem:[%s12315_s1 + $0x4a4] ss:$16 sps:$4 sm:$0xff]   ;;  %v8040_v44 = vld [vmem:[%s12315_s1 + $0x4a0] ss:$16 sps:$4 sm:$0xff]  }
  0x2a   :  { %v8045_v43 = vld [vmem:[%s12315_s1 + $0x6a4] ss:$16 sps:$4 sm:$0xff]   ;;  %v8064_v62 = vld [vmem:[%s12315_s1 + $0x420] ss:$16 sps:$4 sm:$0xff]  }
  0x2b   :  { %5284 = vmatpush2.bf16.msra.mxu0 %v7984_v45  ;;  %v8043_v45 = vld [vmem:[%s12315_s1 + $0x6a0] ss:$16 sps:$4 sm:$0xff]   ;;  %v8051_v47 = vld [vmem:[%s12315_s1 + $0x684] ss:$16 sps:$4 sm:$0xff]  }
  0x2c   :  { %5327 = vmatpush2.bf16.msra.mxu1 %v7985_v46  ;;  %5285 = vmatprep.subr.bf16.mxu0 %v7986_v49  ;;  %v8048_v46 = vld [vmem:[%s12315_s1 + $0x484] ss:$16 sps:$4 sm:$0xff]   ;;  %v8046_v49 = vld [vmem:[%s12315_s1 + $0x480] ss:$16 sps:$4 sm:$0xff]  }
  0x2d   :  { %5328 = vmatprep.subr.bf16.mxu1 %v7988_v50  ;;  %v8049_v50 = vld [vmem:[%s12315_s1 + $0x680] ss:$16 sps:$4 sm:$0xff]   ;;  %v8060_v56 = vld [vmem:[%s12315_s1 + $0x444] ss:$16 sps:$4 sm:$0xff]  }
  0x2e   :  { %v8063_v57 = vld [vmem:[%s12315_s1 + $0x644] ss:$16 sps:$4 sm:$0xff]   ;;  %v8067_v63 = vld [vmem:[%s12315_s1 + $0x620] ss:$16 sps:$4 sm:$0xff]  }
  0x2f   :  { %5286 = vmatpush2.bf16.msra.mxu0 %v7990_v51  ;;  %v8054_v51 = vld [vmem:[%s12315_s1 + $0x464] ss:$16 sps:$4 sm:$0xff]   ;;  %v8070_v2 = vld [vmem:[%s12315_s1 + $0x400] ss:$16 sps:$4 sm:$0xff]  }
  0x30   :  { %5329 = vmatpush2.bf16.msra.mxu1 %v7991_v52  ;;  %5287 = vmatprep.subr.bf16.mxu0 %v7992_v53  ;;  %v8057_v52 = vld [vmem:[%s12315_s1 + $0x664] ss:$16 sps:$4 sm:$0xff]   ;;  %v8052_v53 = vld [vmem:[%s12315_s1 + $0x460] ss:$16 sps:$4 sm:$0xff]  }
  0x31   :  { %5330 = vmatprep.subr.bf16.mxu1 %v7994_v54  ;;  %v8055_v54 = vld [vmem:[%s12315_s1 + $0x660] ss:$16 sps:$4 sm:$0xff]   ;;  %v8066_v60 = vld [vmem:[%s12315_s1 + $0x424] ss:$16 sps:$4 sm:$0xff]  }
  0x32   :  { %v8069_v61 = vld [vmem:[%s12315_s1 + $0x624] ss:$16 sps:$4 sm:$0xff]   ;;  %v8073_v3 = vld [vmem:[%s12315_s1 + $0x600] ss:$16 sps:$4 sm:$0xff]  }
  0x33   :  { %5288 = vmatpush2.bf16.msra.mxu0 %v7996_v58  ;;  %v8058_v58 = vld [vmem:[%s12315_s1 + $0x440] ss:$16 sps:$4 sm:$0xff]   ;;  %v8072_v0 = vld [vmem:[%s12315_s1 + $0x404] ss:$16 sps:$4 sm:$0xff]  }
  0x34   :  { %5331 = vmatpush2.bf16.msra.mxu1 %v7997_v59  ;;  %5289 = vmatprep.subr.bf16.mxu0 %v7998_v4  ;;  %v8061_v59 = vld [vmem:[%s12315_s1 + $0x640] ss:$16 sps:$4 sm:$0xff]   ;;  %v8075_v1 = vld [vmem:[%s12315_s1 + $0x604] ss:$16 sps:$4 sm:$0xff]  }
  0x35   :  { %5332 = vmatprep.subr.bf16.mxu1 %v8000_v8  ;;  %v8078_v4 = vld [vmem:[%s12315_s1 + $0x5e4] ss:$16 sps:$4 sm:$0xff]   ;;  %v8076_v8 = vld [vmem:[%s12315_s1 + $0x5e0] ss:$16 sps:$4 sm:$0xff]  }
  0x36   :  { %v8081_v5 = vld [vmem:[%s12315_s1 + $0x7e4] ss:$16 sps:$4 sm:$0xff]   ;;  %v8079_v9 = vld [vmem:[%s12315_s1 + $0x7e0] ss:$16 sps:$4 sm:$0xff]  }
  0x37   :  { %5290 = vmatpush2.bf16.msra.mxu0 %v8002_v14  ;;  %v9614_v14 = vrot.slane %v8126_v7, %v9399_v55  ;;  %v8084_v19 = vld [vmem:[%s12315_s1 + $0x5c4] ss:$16 sps:$4 sm:$0xff]   ;;  %v8082_v30 = vld [vmem:[%s12315_s1 + $0x5c0] ss:$16 sps:$4 sm:$0xff]  }
  0x38   :  { %5333 = vmatpush2.bf16.msra.mxu1 %v8003_v15  ;;  %5291 = vmatprep.subr.bf16.mxu0 %v8004_v17  ;;  %v8133_v15 = vld [vmem:[%s12314_s0 + $0x6c] ss:$48 sps:$4 sm:$0xff]   ;;  %v8085_v31 = vld [vmem:[%s12315_s1 + $0x7c0] ss:$16 sps:$4 sm:$0xff]  }
  0x39   :  { %5334 = vmatprep.subr.bf16.mxu1 %v8006_v20  ;;  %v8135_v17 = vld [vmem:[%s12314_s0 + $0x12c] ss:$48 sps:$4 sm:$0xff]   ;;  %v9629_v20 = vrot.slane %v8128_v10, %v9399_v55  ;;  %v8144_v10 = vld [vmem:[%s12315_s1 + $0x8c4] ss:$16 sps:$4 sm:$0xff]  }
  0x3a   :  { %v9651_v29 = vrot.slane %v8135_v17, %v9399_v55  ;;  %v8151_v17 = vld [vmem:[%s12315_s1 + $0xaa0] ss:$16 sps:$4 sm:$0xff]  }
  0x3b   :  { %5292 = vmatpush2.bf16.msra.mxu0 %v8008_v22  ;;  %v9632_v22 = vrot.slane %v8130_v11, %v9399_v55  ;;  %v8147_v11 = vld [vmem:[%s12315_s1 + $0xac4] ss:$16 sps:$4 sm:$0xff]  }
  0x3c   :  { %5335 = vmatpush2.bf16.msra.mxu1 %v8009_v23  ;;  %5293 = vmatprep.subr.bf16.mxu0 %v8010_v24  ;;  %v9635_v23 = vrot.slane %v8132_v12, %v9399_v55  ;;  %v8087_v24 = vld [vmem:[%s12315_s1 + $0x7c4] ss:$16 sps:$4 sm:$0xff]   ;;  %v8142_v12 = vld [vmem:[%s12315_s1 + $0x8c0] ss:$16 sps:$4 sm:$0xff]  }
  0x3d   :  { %5336 = vmatprep.subr.bf16.mxu1 %v8012_v25  ;;  %v198_v25 = vcombine.high %v9611_v13, %v9614_v14  ;;  %v414_v28 = vcombine.high %v9629_v20, %v9632_v22 }
  0x3f   :  { %5294 = vmatpush2.bf16.msra.mxu0 %v8014_v26  ;;  %v9643_v26 = vrot.slane %v8133_v15, %v9399_v55  ;;  %v8153_v15 = vld [vmem:[%s12315_s1 + $0xaa4] ss:$16 sps:$4 sm:$0xff]  }
  0x40   :  { %5337 = vmatpush2.bf16.msra.mxu1 %v8015_v27  ;;  %5349 = vmatprep.subr.bf16.mxu0 %v8030_v32  ;;  %v9646_v27 = vrot.slane %v8134_v16, %v9399_v55  ;;  %v8148_v16 = vld [vmem:[%s12315_s1 + $0x8a0] ss:$16 sps:$4 sm:$0xff]  }
  0x41   :  { %5392 = vmatprep.subr.bf16.mxu1 %v8033_v33  ;;  %v200_v32 = vcombine.high %v9635_v23, %v9643_v26  ;;  %v8090_v33 = vld [vmem:[%s12315_s1 + $0x5a4] ss:$16 sps:$4 sm:$0xff]  }
  0x42   :  { %5296 = vmatmul.mubr.bf16.vlgmr.msra.gmra.mxu0 %v9487_v34 }
  0x43   :  { %5339 = vmatmul.mubr.bf16.vlgmr.msra.gmra.mxu1 %v9489_v35  ;;  %5350 = vmatpush1.bf16.msra.mxu0 %v8028_v36  ;;  %v9664_v36 = vpack.c.bf16 %v414_v28, %v198_v25  ;;  %v8165_v25 = vld [vmem:[%s12315_s1 + $0xa64] ss:$16 sps:$4 sm:$0xff]   ;;  %v8160_v28 = vld [vmem:[%s12315_s1 + $0x860] ss:$16 sps:$4 sm:$0xff]  }
  0x44   :  { %5393 = vmatpush1.bf16.msra.mxu1 %v8031_v37  ;;  %5351 = vmatprep.subr.bf16.mxu0 %v8036_v38  ;;  %v416_v37 = vcombine.high %v9646_v27, %v9651_v29  ;;  %v8093_v38 = vld [vmem:[%s12315_s1 + $0x7a4] ss:$16 sps:$4 sm:$0xff]  }
  0x45   :  { %5394 = vmatprep.subr.bf16.mxu1 %v8039_v39  ;;  %5381 = vmatprep.mubr.bf16.mxu0 %v9664_v36 }
  0x46   :  { %v9672_v39 = vpack.c.bf16 %v416_v37, %v200_v32  ;;  %v8240_v32 = vld [vmem:[%s12314_s0 + $0x14] ss:$48 sps:$4 sm:$0xff]  }
  0x47   :  { %5352 = vmatpush1.bf16.msra.mxu0 %v8034_v40  ;;  %v8088_v40 = vld [vmem:[%s12315_s1 + $0x5a0] ss:$16 sps:$4 sm:$0xff]  }
  0x48   :  { %5395 = vmatpush1.bf16.msra.mxu1 %v8037_v41  ;;  %5353 = vmatprep.subr.bf16.mxu0 %v8042_v42  ;;  %v8091_v41 = vld [vmem:[%s12315_s1 + $0x7a0] ss:$16 sps:$4 sm:$0xff]   ;;  %v8096_v42 = vld [vmem:[%s12315_s1 + $0x584] ss:$16 sps:$4 sm:$0xff]  }
  0x49   :  { %5396 = vmatprep.subr.bf16.mxu1 %v8045_v43  ;;  %v8099_v43 = vld [vmem:[%s12315_s1 + $0x784] ss:$16 sps:$4 sm:$0xff]   ;;  %5424 = vmatprep.mubr.bf16.mxu1 %v9672_v39 }
  0x4b   :  { %5354 = vmatpush1.bf16.msra.mxu0 %v8040_v44  ;;  %v8094_v44 = vld [vmem:[%s12315_s1 + $0x580] ss:$16 sps:$4 sm:$0xff]  }
  0x4c   :  { %5397 = vmatpush1.bf16.msra.mxu1 %v8043_v45  ;;  %5355 = vmatprep.subr.bf16.mxu0 %v8048_v46  ;;  %v8097_v45 = vld [vmem:[%s12315_s1 + $0x780] ss:$16 sps:$4 sm:$0xff]   ;;  %v8102_v46 = vld [vmem:[%s12315_s1 + $0x564] ss:$16 sps:$4 sm:$0xff]  }
  0x4d   :  { %5398 = vmatprep.subr.bf16.mxu1 %v8051_v47  ;;  %v8105_v47 = vld [vmem:[%s12315_s1 + $0x764] ss:$16 sps:$4 sm:$0xff]  }
  0x4f   :  { %5356 = vmatpush1.bf16.msra.mxu0 %v8046_v49  ;;  %v8100_v49 = vld [vmem:[%s12315_s1 + $0x560] ss:$16 sps:$4 sm:$0xff]  }
  0x50   :  { %5399 = vmatpush1.bf16.msra.mxu1 %v8049_v50  ;;  %5357 = vmatprep.subr.bf16.mxu0 %v8054_v51  ;;  %v8103_v50 = vld [vmem:[%s12315_s1 + $0x760] ss:$16 sps:$4 sm:$0xff]   ;;  %v8108_v51 = vld [vmem:[%s12315_s1 + $0x544] ss:$16 sps:$4 sm:$0xff]  }
  0x51   :  { %5400 = vmatprep.subr.bf16.mxu1 %v8057_v52  ;;  %v8111_v52 = vld [vmem:[%s12315_s1 + $0x744] ss:$16 sps:$4 sm:$0xff]  }
  0x53   :  { %5358 = vmatpush1.bf16.msra.mxu0 %v8052_v53  ;;  %v8106_v53 = vld [vmem:[%s12315_s1 + $0x540] ss:$16 sps:$4 sm:$0xff]  }
  0x54   :  { %5401 = vmatpush1.bf16.msra.mxu1 %v8055_v54  ;;  %5359 = vmatprep.subr.bf16.mxu0 %v8060_v56  ;;  %v8109_v54 = vld [vmem:[%s12315_s1 + $0x740] ss:$16 sps:$4 sm:$0xff]   ;;  %v8114_v56 = vld [vmem:[%s12315_s1 + $0x524] ss:$16 sps:$4 sm:$0xff]  }
  0x55   :  { %5402 = vmatprep.subr.bf16.mxu1 %v8063_v57  ;;  %v8117_v57 = vld [vmem:[%s12315_s1 + $0x724] ss:$16 sps:$4 sm:$0xff]  }
  0x57   :  { %5360 = vmatpush1.bf16.msra.mxu0 %v8058_v58  ;;  %v8112_v58 = vld [vmem:[%s12315_s1 + $0x520] ss:$16 sps:$4 sm:$0xff]  }
  0x58   :  { %5403 = vmatpush1.bf16.msra.mxu1 %v8061_v59  ;;  %5361 = vmatprep.subr.bf16.mxu0 %v8066_v60  ;;  %v8115_v59 = vld [vmem:[%s12315_s1 + $0x720] ss:$16 sps:$4 sm:$0xff]   ;;  %v8120_v60 = vld [vmem:[%s12315_s1 + $0x504] ss:$16 sps:$4 sm:$0xff]  }
  0x59   :  { %5404 = vmatprep.subr.bf16.mxu1 %v8069_v61  ;;  %v8123_v61 = vld [vmem:[%s12315_s1 + $0x704] ss:$16 sps:$4 sm:$0xff]  }
  0x5b   :  { %5362 = vmatpush1.bf16.msra.mxu0 %v8064_v62  ;;  %v8118_v62 = vld [vmem:[%s12315_s1 + $0x500] ss:$16 sps:$4 sm:$0xff]  }
  0x5c   :  { %5405 = vmatpush1.bf16.msra.mxu1 %v8067_v63  ;;  %5363 = vmatprep.subr.bf16.mxu0 %v8072_v0  ;;  %v8121_v63 = vld [vmem:[%s12315_s1 + $0x700] ss:$16 sps:$4 sm:$0xff]   ;;  %v197_v0 = vcombine.low %v9611_v13, %v9614_v14  ;;  %v8150_v14 = vld [vmem:[%s12315_s1 + $0x8a4] ss:$16 sps:$4 sm:$0xff]  }
  0x5d   :  { %5406 = vmatprep.subr.bf16.mxu1 %v8075_v1  ;;  %v413_v1 = vcombine.low %v9629_v20, %v9632_v22  ;;  %v8145_v13 = vld [vmem:[%s12315_s1 + $0xac0] ss:$16 sps:$4 sm:$0xff]   ;;  %v8159_v20 = vld [vmem:[%s12315_s1 + $0xa84] ss:$16 sps:$4 sm:$0xff]  }
  0x5e   :  { %v8154_v22 = vld [vmem:[%s12315_s1 + $0x880] ss:$16 sps:$4 sm:$0xff]  }
  0x5f   :  { %5364 = vmatpush1.bf16.msra.mxu0 %v8070_v2  ;;  %v199_v2 = vcombine.low %v9635_v23, %v9643_v26  ;;  %v9755_v6 = vpack.c.bf16 %v413_v1, %v197_v0  ;;  %v8157_v23 = vld [vmem:[%s12315_s1 + $0xa80] ss:$16 sps:$4 sm:$0xff]   ;;  %v8180_v0 = vld [vmem:[%s12315_s1 + $0x804] ss:$16 sps:$4 sm:$0xff]  }
  0x60   :  { %5407 = vmatpush1.bf16.msra.mxu1 %v8073_v3  ;;  %5365 = vmatprep.subr.bf16.mxu0 %v8078_v4  ;;  %v415_v3 = vcombine.low %v9646_v27, %v9651_v29  ;;  %v8138_v4 = vld [vmem:[%s12315_s1 + $0x8e4] ss:$16 sps:$4 sm:$0xff]   ;;  %v8232_v26 = vld [vmem:[%s12314_s0 + $0x10] ss:$48 sps:$4 sm:$0xff]  }
  0x61   :  { %5408 = vmatprep.subr.bf16.mxu1 %v8081_v5  ;;  %v8141_v5 = vld [vmem:[%s12315_s1 + $0xae4] ss:$16 sps:$4 sm:$0xff]   ;;  %v8234_v27 = vld [vmem:[%s12314_s0 + $0x70] ss:$48 sps:$4 sm:$0xff]  }
  0x62   :  { %v9757_v7 = vpack.c.bf16 %v415_v3, %v199_v2  ;;  %v8163_v29 = vld [vmem:[%s12315_s1 + $0xa60] ss:$16 sps:$4 sm:$0xff]   ;;  %v9834_v37 = vrot.slane %v8234_v27, %v9399_v55  ;;  %v8183_v1 = vld [vmem:[%s12315_s1 + $0xa04] ss:$16 sps:$4 sm:$0xff]  }
  0x63   :  { %5366 = vmatpush2.bf16.msra.mxu0 %v8076_v8  ;;  %v8136_v8 = vld [vmem:[%s12315_s1 + $0x8e0] ss:$16 sps:$4 sm:$0xff]  }
  0x64   :  { %5409 = vmatpush2.bf16.msra.mxu1 %v8079_v9  ;;  %5367 = vmatprep.subr.bf16.mxu0 %v8084_v19  ;;  %v8139_v9 = vld [vmem:[%s12315_s1 + $0xae0] ss:$16 sps:$4 sm:$0xff]   ;;  %v8156_v19 = vld [vmem:[%s12315_s1 + $0x884] ss:$16 sps:$4 sm:$0xff]  }
  0x65   :  { %5410 = vmatprep.subr.bf16.mxu1 %v8087_v24  ;;  %v8162_v24 = vld [vmem:[%s12315_s1 + $0x864] ss:$16 sps:$4 sm:$0xff]   ;;  %v8178_v2 = vld [vmem:[%s12315_s1 + $0x800] ss:$16 sps:$4 sm:$0xff]  }
  0x66   :  { %v8181_v3 = vld [vmem:[%s12315_s1 + $0xa00] ss:$16 sps:$4 sm:$0xff]  }
  0x67   :  { %5368 = vmatpush2.bf16.msra.mxu0 %v8082_v30  ;;  %v8236_v30 = vld [vmem:[%s12314_s0 + $0xd0] ss:$48 sps:$4 sm:$0xff]  }
  0x68   :  { %5411 = vmatpush2.bf16.msra.mxu1 %v8085_v31  ;;  %5369 = vmatprep.subr.bf16.mxu0 %v8090_v33  ;;  %v8238_v31 = vld [vmem:[%s12314_s0 + $0x130] ss:$48 sps:$4 sm:$0xff]   ;;  %v9831_v33 = vrot.slane %v8232_v26, %v9399_v55 }
  0x69   :  { %5412 = vmatprep.subr.bf16.mxu1 %v8093_v38  ;;  %v8241_v38 = vld [vmem:[%s12314_s0 + $0x74] ss:$48 sps:$4 sm:$0xff]   ;;  %v8208_v26 = vld [vmem:[%s12315_s1 + $0x960] ss:$16 sps:$4 sm:$0xff]  }
  0x6a   :  { %v8211_v27 = vld [vmem:[%s12315_s1 + $0xb60] ss:$16 sps:$4 sm:$0xff]  }
  0x6b   :  { %5370 = vmatpush2.bf16.msra.mxu0 %v8088_v40  ;;  %v8242_v40 = vld [vmem:[%s12314_s0 + $0xd4] ss:$48 sps:$4 sm:$0xff]  }
  0x6c   :  { %5413 = vmatpush2.bf16.msra.mxu1 %v8091_v41  ;;  %5371 = vmatprep.subr.bf16.mxu0 %v8096_v42  ;;  %v8243_v41 = vld [vmem:[%s12314_s0 + $0x134] ss:$48 sps:$4 sm:$0xff]  }
  0x6d   :  { %5414 = vmatprep.subr.bf16.mxu1 %v8099_v43  ;;  %v8168_v42 = vld [vmem:[%s12315_s1 + $0x844] ss:$16 sps:$4 sm:$0xff]   ;;  %v9849_v43 = vrot.slane %v8236_v30, %v9399_v55  ;;  %v8214_v30 = vld [vmem:[%s12315_s1 + $0x940] ss:$16 sps:$4 sm:$0xff]  }
  0x6f   :  { %5372 = vmatpush2.bf16.msra.mxu0 %v8094_v44  ;;  %v9852_v44 = vrot.slane %v8238_v31, %v9399_v55  ;;  %v8217_v31 = vld [vmem:[%s12315_s1 + $0xb40] ss:$16 sps:$4 sm:$0xff]  }
  0x70   :  { %5415 = vmatpush2.bf16.msra.mxu1 %v8097_v45  ;;  %5373 = vmatprep.subr.bf16.mxu0 %v8102_v46  ;;  %v9855_v45 = vrot.slane %v8240_v32, %v9399_v55  ;;  %v8171_v46 = vld [vmem:[%s12315_s1 + $0xa44] ss:$16 sps:$4 sm:$0xff]  }
  0x71   :  { %5416 = vmatprep.subr.bf16.mxu1 %v8105_v47  ;;  %v234_v47 = vcombine.high %v9831_v33, %v9834_v37  ;;  %v8222_v32 = vld [vmem:[%s12315_s1 + $0x924] ss:$16 sps:$4 sm:$0xff]  }
  0x73   :  { %5374 = vmatpush2.bf16.msra.mxu0 %v8100_v49  ;;  %v9863_v49 = vrot.slane %v8241_v38, %v9399_v55  ;;  %v8225_v38 = vld [vmem:[%s12315_s1 + $0xb24] ss:$16 sps:$4 sm:$0xff]  }
  0x74   :  { %5417 = vmatpush2.bf16.msra.mxu1 %v8103_v50  ;;  %5375 = vmatprep.subr.bf16.mxu0 %v8108_v51  ;;  %v9866_v50 = vrot.slane %v8242_v40, %v9399_v55  ;;  %v450_v51 = vcombine.high %v9849_v43, %v9852_v44  ;;  %v8220_v40 = vld [vmem:[%s12315_s1 + $0x920] ss:$16 sps:$4 sm:$0xff]  }
  0x75   :  { %5418 = vmatprep.subr.bf16.mxu1 %v8111_v52  ;;  %v9871_v52 = vrot.slane %v8243_v41, %v9399_v55  ;;  %v8223_v41 = vld [vmem:[%s12315_s1 + $0xb20] ss:$16 sps:$4 sm:$0xff]  }
  0x77   :  { %5376 = vmatpush2.bf16.msra.mxu0 %v8106_v53  ;;  %v8166_v53 = vld [vmem:[%s12315_s1 + $0x840] ss:$16 sps:$4 sm:$0xff]  }
  0x78   :  { %5419 = vmatpush2.bf16.msra.mxu1 %v8109_v54  ;;  %5377 = vmatprep.subr.bf16.mxu0 %v8114_v56  ;;  %v8169_v54 = vld [vmem:[%s12315_s1 + $0xa40] ss:$16 sps:$4 sm:$0xff]   ;;  %v236_v56 = vcombine.high %v9855_v45, %v9863_v49 }
  0x79   :  { %5420 = vmatprep.subr.bf16.mxu1 %v8117_v57  ;;  %v8174_v57 = vld [vmem:[%s12315_s1 + $0x824] ss:$16 sps:$4 sm:$0xff]  }
  0x7b   :  { %5378 = vmatpush2.bf16.msra.mxu0 %v8112_v58  ;;  %v9884_v58 = vpack.c.bf16 %v450_v51, %v234_v47  ;;  %v8226_v47 = vld [vmem:[%s12315_s1 + $0x900] ss:$16 sps:$4 sm:$0xff]  }
  0x7c   :  { %5421 = vmatpush2.bf16.msra.mxu1 %v8115_v59  ;;  %5379 = vmatprep.subr.bf16.mxu0 %v8120_v60  ;;  %v452_v59 = vcombine.high %v9866_v50, %v9871_v52  ;;  %v8177_v60 = vld [vmem:[%s12315_s1 + $0xa24] ss:$16 sps:$4 sm:$0xff]   ;;  %v8229_v51 = vld [vmem:[%s12315_s1 + $0xb00] ss:$16 sps:$4 sm:$0xff]  }
  0x7d   :  { %5422 = vmatprep.subr.bf16.mxu1 %v8123_v61 }
  0x7e   :  { %v9892_v61 = vpack.c.bf16 %v452_v59, %v236_v56  ;;  %v235_v56 = vcombine.low %v9855_v45, %v9863_v49  ;;  %v8246_v59 = vld [vmem:[%s12315_s1 + $0xce4] ss:$16 sps:$4 sm:$0xff]   ;;  %v8346_v45 = vld [vmem:[%s12314_s0 + $0x138] ss:$48 sps:$4 sm:$0xff]   ;;  %v8348_v49 = vld [vmem:[%s12314_s0 + $0x1c] ss:$48 sps:$4 sm:$0xff]  }
  0x7f   :  { %5380 = vmatpush2.bf16.msra.mxu0 %v8118_v62  ;;  %v8172_v62 = vld [vmem:[%s12315_s1 + $0x820] ss:$16 sps:$4 sm:$0xff]  }
  0x80   :  { %5423 = vmatpush2.bf16.msra.mxu1 %v8121_v63  ;;  %5435 = vmatprep.subr.bf16.mxu0 %v8138_v4  ;;  %v8175_v63 = vld [vmem:[%s12315_s1 + $0xa20] ss:$16 sps:$4 sm:$0xff]   ;;  %v8186_v4 = vld [vmem:[%s12315_s1 + $0x9e4] ss:$16 sps:$4 sm:$0xff]  }
  0x81   :  { %5478 = vmatprep.subr.bf16.mxu1 %v8141_v5  ;;  %v8189_v5 = vld [vmem:[%s12315_s1 + $0xbe4] ss:$16 sps:$4 sm:$0xff]  }
  0x82   :  { %5382 = vmatmul.mubr.bf16.vlgmr.msra.gmra.mxu0 %v9755_v6 }
  0x83   :  { %5425 = vmatmul.mubr.bf16.vlgmr.msra.gmra.mxu1 %v9757_v7  ;;  %5436 = vmatpush1.bf16.msra.mxu0 %v8136_v8  ;;  %v8184_v8 = vld [vmem:[%s12315_s1 + $0x9e0] ss:$16 sps:$4 sm:$0xff]  }
  0x84   :  { %5479 = vmatpush1.bf16.msra.mxu1 %v8139_v9  ;;  %5437 = vmatprep.subr.bf16.mxu0 %v8144_v10  ;;  %v8187_v9 = vld [vmem:[%s12315_s1 + $0xbe0] ss:$16 sps:$4 sm:$0xff]   ;;  %v8192_v10 = vld [vmem:[%s12315_s1 + $0x9c4] ss:$16 sps:$4 sm:$0xff]  }
  0x85   :  { %5480 = vmatprep.subr.bf16.mxu1 %v8147_v11  ;;  %5467 = vmatprep.mubr.bf16.mxu0 %v9884_v58  ;;  %v8195_v11 = vld [vmem:[%s12315_s1 + $0xbc4] ss:$16 sps:$4 sm:$0xff]  }
  0x86   :  { %5510 = vmatprep.mubr.bf16.mxu1 %v9892_v61 }
  0x87   :  { %5438 = vmatpush1.bf16.msra.mxu0 %v8142_v12  ;;  %v8190_v12 = vld [vmem:[%s12315_s1 + $0x9c0] ss:$16 sps:$4 sm:$0xff]  }
  0x88   :  { %5481 = vmatpush1.bf16.msra.mxu1 %v8145_v13  ;;  %5439 = vmatprep.subr.bf16.mxu0 %v8150_v14  ;;  %v8193_v13 = vld [vmem:[%s12315_s1 + $0xbc0] ss:$16 sps:$4 sm:$0xff]   ;;  %v8198_v14 = vld [vmem:[%s12315_s1 + $0x9a4] ss:$16 sps:$4 sm:$0xff]  }
  0x89   :  { %5482 = vmatprep.subr.bf16.mxu1 %v8153_v15  ;;  %v8201_v15 = vld [vmem:[%s12315_s1 + $0xba4] ss:$16 sps:$4 sm:$0xff]  }
  0x8b   :  { %5440 = vmatpush1.bf16.msra.mxu0 %v8148_v16  ;;  %v8196_v16 = vld [vmem:[%s12315_s1 + $0x9a0] ss:$16 sps:$4 sm:$0xff]  }
  0x8c   :  { %5483 = vmatpush1.bf16.msra.mxu1 %v8151_v17  ;;  %5441 = vmatprep.subr.bf16.mxu0 %v8156_v19  ;;  %v8199_v17 = vld [vmem:[%s12315_s1 + $0xba0] ss:$16 sps:$4 sm:$0xff]   ;;  %v8204_v19 = vld [vmem:[%s12315_s1 + $0x984] ss:$16 sps:$4 sm:$0xff]  }
  0x8d   :  { %5484 = vmatprep.subr.bf16.mxu1 %v8159_v20  ;;  %v8207_v20 = vld [vmem:[%s12315_s1 + $0xb84] ss:$16 sps:$4 sm:$0xff]  }
  0x8f   :  { %5442 = vmatpush1.bf16.msra.mxu0 %v8154_v22  ;;  %v8202_v22 = vld [vmem:[%s12315_s1 + $0x980] ss:$16 sps:$4 sm:$0xff]  }
  0x90   :  { %5485 = vmatpush1.bf16.msra.mxu1 %v8157_v23  ;;  %5443 = vmatprep.subr.bf16.mxu0 %v8162_v24  ;;  %v8205_v23 = vld [vmem:[%s12315_s1 + $0xb80] ss:$16 sps:$4 sm:$0xff]   ;;  %v8210_v24 = vld [vmem:[%s12315_s1 + $0x964] ss:$16 sps:$4 sm:$0xff]  }
  0x91   :  { %5486 = vmatprep.subr.bf16.mxu1 %v8165_v25  ;;  %v8213_v25 = vld [vmem:[%s12315_s1 + $0xb64] ss:$16 sps:$4 sm:$0xff]  }
  0x93   :  { %5444 = vmatpush1.bf16.msra.mxu0 %v8160_v28  ;;  %v8216_v28 = vld [vmem:[%s12315_s1 + $0x944] ss:$16 sps:$4 sm:$0xff]  }
  0x94   :  { %5487 = vmatpush1.bf16.msra.mxu1 %v8163_v29  ;;  %5445 = vmatprep.subr.bf16.mxu0 %v8168_v42  ;;  %v8219_v29 = vld [vmem:[%s12315_s1 + $0xb44] ss:$16 sps:$4 sm:$0xff]  }
  0x95   :  { %5488 = vmatprep.subr.bf16.mxu1 %v8171_v46  ;;  %v8228_v42 = vld [vmem:[%s12315_s1 + $0x904] ss:$16 sps:$4 sm:$0xff]  }
  0x96   :  { %v8231_v46 = vld [vmem:[%s12315_s1 + $0xb04] ss:$16 sps:$4 sm:$0xff]  }
  0x97   :  { %5446 = vmatpush1.bf16.msra.mxu0 %v8166_v53  ;;  %v233_v53 = vcombine.low %v9831_v33, %v9834_v37  ;;  %v8340_v33 = vld [vmem:[%s12314_s0 + $0x18] ss:$48 sps:$4 sm:$0xff]  }
  0x98   :  { %5489 = vmatpush1.bf16.msra.mxu1 %v8169_v54  ;;  %5447 = vmatprep.subr.bf16.mxu0 %v8174_v57  ;;  %v449_v54 = vcombine.low %v9849_v43, %v9852_v44  ;;  %v451_v57 = vcombine.low %v9866_v50, %v9871_v52  ;;  %v8342_v37 = vld [vmem:[%s12314_s0 + $0x78] ss:$48 sps:$4 sm:$0xff]   ;;  %v8244_v43 = vld [vmem:[%s12315_s1 + $0xce0] ss:$16 sps:$4 sm:$0xff]  }
  0x99   :  { %5490 = vmatprep.subr.bf16.mxu1 %v8177_v60  ;;  %v8249_v60 = vld [vmem:[%s12315_s1 + $0xee4] ss:$16 sps:$4 sm:$0xff]   ;;  %v8344_v44 = vld [vmem:[%s12314_s0 + $0xd8] ss:$48 sps:$4 sm:$0xff]  }
  0x9a   :  { %v10041_v50 = vpack.c.bf16 %v449_v54, %v233_v53  ;;  %v10043_v52 = vpack.c.bf16 %v451_v57, %v235_v56  ;;  %v8282_v53 = vld [vmem:[%s12315_s1 + $0xc24] ss:$16 sps:$4 sm:$0xff]   ;;  %v8280_v56 = vld [vmem:[%s12315_s1 + $0xc20] ss:$16 sps:$4 sm:$0xff]  }
  0x9b   :  { %5448 = vmatpush1.bf16.msra.mxu0 %v8172_v62  ;;  %v10046_v62 = vrot.slane %v8340_v33, %v9399_v55  ;;  %v8285_v54 = vld [vmem:[%s12315_s1 + $0xe24] ss:$16 sps:$4 sm:$0xff]   ;;  %v8283_v57 = vld [vmem:[%s12315_s1 + $0xe20] ss:$16 sps:$4 sm:$0xff]  }
  0x9c   :  { %5491 = vmatpush1.bf16.msra.mxu1 %v8175_v63  ;;  %5449 = vmatprep.subr.bf16.mxu0 %v8180_v0  ;;  %v10049_v63 = vrot.slane %v8342_v37, %v9399_v55  ;;  %v8349_v0 = vld [vmem:[%s12314_s0 + $0x7c] ss:$48 sps:$4 sm:$0xff]   ;;  %v8286_v33 = vld [vmem:[%s12315_s1 + $0xc00] ss:$16 sps:$4 sm:$0xff]  }
  0x9d   :  { %5492 = vmatprep.subr.bf16.mxu1 %v8183_v1  ;;  %v8350_v1 = vld [vmem:[%s12314_s0 + $0xdc] ss:$48 sps:$4 sm:$0xff]   ;;  %v8289_v37 = vld [vmem:[%s12315_s1 + $0xe00] ss:$16 sps:$4 sm:$0xff]  }
  0x9f   :  { %5450 = vmatpush1.bf16.msra.mxu0 %v8178_v2  ;;  %v8351_v2 = vld [vmem:[%s12314_s0 + $0x13c] ss:$48 sps:$4 sm:$0xff]  }
  0xa0   :  { %5493 = vmatpush1.bf16.msra.mxu1 %v8181_v3  ;;  %5451 = vmatprep.subr.bf16.mxu0 %v8186_v4  ;;  %v8247_v3 = vld [vmem:[%s12315_s1 + $0xee0] ss:$16 sps:$4 sm:$0xff]   ;;  %v10064_v4 = vrot.slane %v8344_v44, %v9399_v55  ;;  %v8297_v44 = vld [vmem:[%s12315_s1 + $0xfe4] ss:$16 sps:$4 sm:$0xff]  }
  0xa1   :  { %5494 = vmatprep.subr.bf16.mxu1 %v8189_v5  ;;  %v10067_v5 = vrot.slane %v8346_v45, %v9399_v55  ;;  %v8292_v45 = vld [vmem:[%s12315_s1 + $0xde0] ss:$16 sps:$4 sm:$0xff]  }
  0xa3   :  { %5452 = vmatpush2.bf16.msra.mxu0 %v8184_v8  ;;  %v10070_v8 = vrot.slane %v8348_v49, %v9399_v55  ;;  %v8295_v49 = vld [vmem:[%s12315_s1 + $0xfe0] ss:$16 sps:$4 sm:$0xff]  }
  0xa4   :  { %5495 = vmatpush2.bf16.msra.mxu1 %v8187_v9  ;;  %5453 = vmatprep.subr.bf16.mxu0 %v8192_v10  ;;  %v8252_v9 = vld [vmem:[%s12315_s1 + $0xcc4] ss:$16 sps:$4 sm:$0xff]  }
  0xa5   :  { %5496 = vmatprep.subr.bf16.mxu1 %v8195_v11  ;;  %v8255_v10 = vld [vmem:[%s12315_s1 + $0xec4] ss:$16 sps:$4 sm:$0xff]   ;;  %v270_v11 = vcombine.high %v10046_v62, %v10049_v63 }
  0xa7   :  { %5454 = vmatpush2.bf16.msra.mxu0 %v8190_v12  ;;  %v10081_v12 = vrot.slane %v8349_v0, %v9399_v55  ;;  %v8300_v0 = vld [vmem:[%s12315_s1 + $0xdc4] ss:$16 sps:$4 sm:$0xff]  }
  0xa8   :  { %5497 = vmatpush2.bf16.msra.mxu1 %v8193_v13  ;;  %5455 = vmatprep.subr.bf16.mxu0 %v8198_v14  ;;  %v10084_v13 = vrot.slane %v8350_v1, %v9399_v55  ;;  %v486_v14 = vcombine.high %v10064_v4, %v10067_v5  ;;  %v8303_v1 = vld [vmem:[%s12315_s1 + $0xfc4] ss:$16 sps:$4 sm:$0xff]  }
  0xa9   :  { %5498 = vmatprep.subr.bf16.mxu1 %v8201_v15  ;;  %v10089_v15 = vrot.slane %v8351_v2, %v9399_v55  ;;  %v8298_v2 = vld [vmem:[%s12315_s1 + $0xdc0] ss:$16 sps:$4 sm:$0xff]  }
  0xab   :  { %5456 = vmatpush2.bf16.msra.mxu0 %v8196_v16  ;;  %v8250_v16 = vld [vmem:[%s12315_s1 + $0xcc0] ss:$16 sps:$4 sm:$0xff]  }
  0xac   :  { %5499 = vmatpush2.bf16.msra.mxu1 %v8199_v17  ;;  %5457 = vmatprep.subr.bf16.mxu0 %v8204_v19  ;;  %v272_v17 = vcombine.high %v10070_v8, %v10081_v12  ;;  %v8253_v19 = vld [vmem:[%s12315_s1 + $0xec0] ss:$16 sps:$4 sm:$0xff]  }
  0xad   :  { %5500 = vmatprep.subr.bf16.mxu1 %v8207_v20  ;;  %v10101_v20 = vpack.c.bf16 %v486_v14, %v270_v11  ;;  %v8304_v11 = vld [vmem:[%s12315_s1 + $0xda0] ss:$16 sps:$4 sm:$0xff]  }
  0xae   :  { %v8307_v14 = vld [vmem:[%s12315_s1 + $0xfa0] ss:$16 sps:$4 sm:$0xff]  }
  0xaf   :  { %5458 = vmatpush2.bf16.msra.mxu0 %v8202_v22  ;;  %v488_v22 = vcombine.high %v10084_v13, %v10089_v15 }
  0xb0   :  { %5501 = vmatpush2.bf16.msra.mxu1 %v8205_v23  ;;  %5459 = vmatprep.subr.bf16.mxu0 %v8210_v24  ;;  %v8258_v23 = vld [vmem:[%s12315_s1 + $0xca4] ss:$16 sps:$4 sm:$0xff]  }
  0xb1   :  { %5502 = vmatprep.subr.bf16.mxu1 %v8213_v25  ;;  %v8261_v24 = vld [vmem:[%s12315_s1 + $0xea4] ss:$16 sps:$4 sm:$0xff]   ;;  %v10112_v25 = vpack.c.bf16 %v488_v22, %v272_v17  ;;  %v8313_v22 = vld [vmem:[%s12315_s1 + $0xf80] ss:$16 sps:$4 sm:$0xff]  }
  0xb2   :  { %v8315_v17 = vld [vmem:[%s12315_s1 + $0xf84] ss:$16 sps:$4 sm:$0xff]  }
  0xb3   :  { %5460 = vmatpush2.bf16.msra.mxu0 %v8208_v26  ;;  %v8256_v26 = vld [vmem:[%s12315_s1 + $0xca0] ss:$16 sps:$4 sm:$0xff]  }
  0xb4   :  { %5503 = vmatpush2.bf16.msra.mxu1 %v8211_v27  ;;  %5461 = vmatprep.subr.bf16.mxu0 %v8216_v28  ;;  %v8259_v27 = vld [vmem:[%s12315_s1 + $0xea0] ss:$16 sps:$4 sm:$0xff]   ;;  %v8264_v28 = vld [vmem:[%s12315_s1 + $0xc84] ss:$16 sps:$4 sm:$0xff]  }
  0xb5   :  { %5504 = vmatprep.subr.bf16.mxu1 %v8219_v29  ;;  %v8267_v29 = vld [vmem:[%s12315_s1 + $0xe84] ss:$16 sps:$4 sm:$0xff]  }
  0xb7   :  { %5462 = vmatpush2.bf16.msra.mxu0 %v8214_v30  ;;  %v8262_v30 = vld [vmem:[%s12315_s1 + $0xc80] ss:$16 sps:$4 sm:$0xff]  }
  0xb8   :  { %5505 = vmatpush2.bf16.msra.mxu1 %v8217_v31  ;;  %5463 = vmatprep.subr.bf16.mxu0 %v8222_v32  ;;  %v8265_v31 = vld [vmem:[%s12315_s1 + $0xe80] ss:$16 sps:$4 sm:$0xff]   ;;  %v8270_v32 = vld [vmem:[%s12315_s1 + $0xc64] ss:$16 sps:$4 sm:$0xff]  }
  0xb9   :  { %5506 = vmatprep.subr.bf16.mxu1 %v8225_v38  ;;  %v8273_v38 = vld [vmem:[%s12315_s1 + $0xe64] ss:$16 sps:$4 sm:$0xff]  }
  0xbb   :  { %5464 = vmatpush2.bf16.msra.mxu0 %v8220_v40  ;;  %v8268_v40 = vld [vmem:[%s12315_s1 + $0xc60] ss:$16 sps:$4 sm:$0xff]  }
  0xbc   :  { %5507 = vmatpush2.bf16.msra.mxu1 %v8223_v41  ;;  %5465 = vmatprep.subr.bf16.mxu0 %v8228_v42  ;;  %v8271_v41 = vld [vmem:[%s12315_s1 + $0xe60] ss:$16 sps:$4 sm:$0xff]   ;;  %v8276_v42 = vld [vmem:[%s12315_s1 + $0xc44] ss:$16 sps:$4 sm:$0xff]  }
  0xbd   :  { %5508 = vmatprep.subr.bf16.mxu1 %v8231_v46  ;;  %v8279_v46 = vld [vmem:[%s12315_s1 + $0xe44] ss:$16 sps:$4 sm:$0xff]  }
  0xbf   :  { %5466 = vmatpush2.bf16.msra.mxu0 %v8226_v47  ;;  %v8274_v47 = vld [vmem:[%s12315_s1 + $0xc40] ss:$16 sps:$4 sm:$0xff]  }
  0xc0   :  { %5509 = vmatpush2.bf16.msra.mxu1 %v8229_v51  ;;  %5521 = vmatprep.subr.bf16.mxu0 %v8246_v59  ;;  %v8277_v51 = vld [vmem:[%s12315_s1 + $0xe40] ss:$16 sps:$4 sm:$0xff]   ;;  %v8288_v59 = vld [vmem:[%s12315_s1 + $0xc04] ss:$16 sps:$4 sm:$0xff]  }
  0xc1   :  { %5564 = vmatprep.subr.bf16.mxu1 %v8249_v60  ;;  %v8291_v60 = vld [vmem:[%s12315_s1 + $0xe04] ss:$16 sps:$4 sm:$0xff]  }
  0xc2   :  { %5468 = vmatmul.mubr.bf16.vlgmr.msra.gmra.mxu0 %v10041_v50 }
  0xc3   :  { %5511 = vmatmul.mubr.bf16.vlgmr.msra.gmra.mxu1 %v10043_v52  ;;  %5522 = vmatpush1.bf16.msra.mxu0 %v8244_v43  ;;  %v8294_v43 = vld [vmem:[%s12315_s1 + $0xde4] ss:$16 sps:$4 sm:$0xff]  }
  0xc4   :  { %5565 = vmatpush1.bf16.msra.mxu1 %v8247_v3  ;;  %5523 = vmatprep.subr.bf16.mxu0 %v8252_v9  ;;  %v8301_v3 = vld [vmem:[%s12315_s1 + $0xfc0] ss:$16 sps:$4 sm:$0xff]   ;;  %v8306_v9 = vld [vmem:[%s12315_s1 + $0xda4] ss:$16 sps:$4 sm:$0xff]  }
  0xc5   :  { %5566 = vmatprep.subr.bf16.mxu1 %v8255_v10  ;;  %5553 = vmatprep.mubr.bf16.mxu0 %v10101_v20  ;;  %v8309_v10 = vld [vmem:[%s12315_s1 + $0xfa4] ss:$16 sps:$4 sm:$0xff]  }
  0xc6   :  { %5596 = vmatprep.mubr.bf16.mxu1 %v10112_v25 }
  0xc7   :  { %5524 = vmatpush1.bf16.msra.mxu0 %v8250_v16  ;;  %v8312_v16 = vld [vmem:[%s12315_s1 + $0xd84] ss:$16 sps:$4 sm:$0xff]  }
  0xc8   :  { %5567 = vmatpush1.bf16.msra.mxu1 %v8253_v19  ;;  %5525 = vmatprep.subr.bf16.mxu0 %v8258_v23  ;;  %v8310_v19 = vld [vmem:[%s12315_s1 + $0xd80] ss:$16 sps:$4 sm:$0xff]   ;;  %v8318_v23 = vld [vmem:[%s12315_s1 + $0xd64] ss:$16 sps:$4 sm:$0xff]  }
  0xc9   :  { %5568 = vmatprep.subr.bf16.mxu1 %v8261_v24  ;;  %v8321_v24 = vld [vmem:[%s12315_s1 + $0xf64] ss:$16 sps:$4 sm:$0xff]  }
  0xcb   :  { %5526 = vmatpush1.bf16.msra.mxu0 %v8256_v26  ;;  %v8316_v26 = vld [vmem:[%s12315_s1 + $0xd60] ss:$16 sps:$4 sm:$0xff]  }
  0xcc   :  { %5569 = vmatpush1.bf16.msra.mxu1 %v8259_v27  ;;  %5527 = vmatprep.subr.bf16.mxu0 %v8264_v28  ;;  %v8319_v27 = vld [vmem:[%s12315_s1 + $0xf60] ss:$16 sps:$4 sm:$0xff]   ;;  %v8324_v28 = vld [vmem:[%s12315_s1 + $0xd44] ss:$16 sps:$4 sm:$0xff]  }
  0xcd   :  { %5570 = vmatprep.subr.bf16.mxu1 %v8267_v29  ;;  %v8327_v29 = vld [vmem:[%s12315_s1 + $0xf44] ss:$16 sps:$4 sm:$0xff]  }
  0xcf   :  { %5528 = vmatpush1.bf16.msra.mxu0 %v8262_v30  ;;  %v8322_v30 = vld [vmem:[%s12315_s1 + $0xd40] ss:$16 sps:$4 sm:$0xff]  }
  0xd0   :  { %5571 = vmatpush1.bf16.msra.mxu1 %v8265_v31  ;;  %5529 = vmatprep.subr.bf16.mxu0 %v8270_v32  ;;  %v8325_v31 = vld [vmem:[%s12315_s1 + $0xf40] ss:$16 sps:$4 sm:$0xff]  }
  0xd1   :  { %5572 = vmatprep.subr.bf16.mxu1 %v8273_v38  ;;  %v8448_v32 = vld [vmem:[%s12314_s0 + $0x20] ss:$48 sps:$4 sm:$0xff]   ;;  %v8330_v38 = vld [vmem:[%s12315_s1 + $0xd24] ss:$16 sps:$4 sm:$0xff]  }
  0xd3   :  { %5530 = vmatpush1.bf16.msra.mxu0 %v8268_v40  ;;  %v8333_v40 = vld [vmem:[%s12315_s1 + $0xf24] ss:$16 sps:$4 sm:$0xff]  }
  0xd4   :  { %5573 = vmatpush1.bf16.msra.mxu1 %v8271_v41  ;;  %5531 = vmatprep.subr.bf16.mxu0 %v8276_v42  ;;  %v8450_v41 = vld [vmem:[%s12314_s0 + $0x80] ss:$48 sps:$4 sm:$0xff]  }
  0xd5   :  { %5574 = vmatprep.subr.bf16.mxu1 %v8279_v46  ;;  %v8452_v42 = vld [vmem:[%s12314_s0 + $0xe0] ss:$48 sps:$4 sm:$0xff]  }
  0xd6   :  { %v8454_v46 = vld [vmem:[%s12314_s0 + $0x140] ss:$48 sps:$4 sm:$0xff]  }
  0xd7   :  { %5532 = vmatpush1.bf16.msra.mxu0 %v8274_v47  ;;  %v8456_v47 = vld [vmem:[%s12314_s0 + $0x24] ss:$48 sps:$4 sm:$0xff]  }
  0xd8   :  { %5575 = vmatpush1.bf16.msra.mxu1 %v8277_v51  ;;  %5533 = vmatprep.subr.bf16.mxu0 %v8282_v53  ;;  %v8457_v51 = vld [vmem:[%s12314_s0 + $0x84] ss:$48 sps:$4 sm:$0xff]  }
  0xd9   :  { %5576 = vmatprep.subr.bf16.mxu1 %v8285_v54  ;;  %v8458_v53 = vld [vmem:[%s12314_s0 + $0xe4] ss:$48 sps:$4 sm:$0xff]  }
  0xda   :  { %v8459_v54 = vld [vmem:[%s12314_s0 + $0x144] ss:$48 sps:$4 sm:$0xff]  }
  0xdb   :  { %5534 = vmatpush1.bf16.msra.mxu0 %v8280_v56  ;;  %v8328_v56 = vld [vmem:[%s12315_s1 + $0xd20] ss:$16 sps:$4 sm:$0xff]  }
  0xdc   :  { %5577 = vmatpush1.bf16.msra.mxu1 %v8283_v57  ;;  %5535 = vmatprep.subr.bf16.mxu0 %v8288_v59  ;;  %v8331_v57 = vld [vmem:[%s12315_s1 + $0xf20] ss:$16 sps:$4 sm:$0xff]   ;;  %v10290_v59 = vrot.slane %v8448_v32, %v9399_v55  ;;  %v8372_v32 = vld [vmem:[%s12315_s1 + $0x1084] ss:$16 sps:$4 sm:$0xff]  }
  0xdd   :  { %5578 = vmatprep.subr.bf16.mxu1 %v8291_v60  ;;  %v8336_v60 = vld [vmem:[%s12315_s1 + $0xd04] ss:$16 sps:$4 sm:$0xff]  }
  0xdf   :  { %5536 = vmatpush1.bf16.msra.mxu0 %v8286_v33  ;;  %v8339_v33 = vld [vmem:[%s12315_s1 + $0xf04] ss:$16 sps:$4 sm:$0xff]  }
  0xe0   :  { %5579 = vmatpush1.bf16.msra.mxu1 %v8289_v37  ;;  %5537 = vmatprep.subr.bf16.mxu0 %v8294_v43  ;;  %v10299_v37 = vrot.slane %v8450_v41, %v9399_v55  ;;  %v10302_v43 = vrot.slane %v8452_v42, %v9399_v55  ;;  %v8373_v41 = vld [vmem:[%s12315_s1 + $0x1280] ss:$16 sps:$4 sm:$0xff]   ;;  %v8378_v42 = vld [vmem:[%s12315_s1 + $0x1064] ss:$16 sps:$4 sm:$0xff]  }
  0xe1   :  { %5580 = vmatprep.subr.bf16.mxu1 %v8297_v44  ;;  %v10305_v44 = vrot.slane %v8454_v46, %v9399_v55  ;;  %v8381_v46 = vld [vmem:[%s12315_s1 + $0x1264] ss:$16 sps:$4 sm:$0xff]  }
  0xe3   :  { %5538 = vmatpush2.bf16.msra.mxu0 %v8292_v45  ;;  %v10308_v45 = vrot.slane %v8456_v47, %v9399_v55  ;;  %v8376_v47 = vld [vmem:[%s12315_s1 + $0x1060] ss:$16 sps:$4 sm:$0xff]  }
  0xe4   :  { %5581 = vmatpush2.bf16.msra.mxu1 %v8295_v49  ;;  %5539 = vmatprep.subr.bf16.mxu0 %v8300_v0  ;;  %v10311_v49 = vrot.slane %v8457_v51, %v9399_v55  ;;  %v10314_v0 = vrot.slane %v8458_v53, %v9399_v55  ;;  %v8379_v51 = vld [vmem:[%s12315_s1 + $0x1260] ss:$16 sps:$4 sm:$0xff]   ;;  %v8384_v53 = vld [vmem:[%s12315_s1 + $0x1044] ss:$16 sps:$4 sm:$0xff]  }
  0xe5   :  { %5582 = vmatprep.subr.bf16.mxu1 %v8303_v1  ;;  %v10317_v1 = vrot.slane %v8459_v54, %v9399_v55  ;;  %v8387_v54 = vld [vmem:[%s12315_s1 + $0x1244] ss:$16 sps:$4 sm:$0xff]  }
  0xe7   :  { %5540 = vmatpush2.bf16.msra.mxu0 %v8298_v2  ;;  %v8334_v2 = vld [vmem:[%s12315_s1 + $0xd00] ss:$16 sps:$4 sm:$0xff]  }
  0xe8   :  { %5583 = vmatpush2.bf16.msra.mxu1 %v8301_v3  ;;  %5541 = vmatprep.subr.bf16.mxu0 %v8306_v9  ;;  %v269_v3 = vcombine.low %v10046_v62, %v10049_v63  ;;  %v485_v9 = vcombine.low %v10064_v4, %v10067_v5  ;;  %v8354_v62 = vld [vmem:[%s12315_s1 + $0x10e4] ss:$16 sps:$4 sm:$0xff]   ;;  %v306_v4 = vcombine.high %v10290_v59, %v10299_v37 }
  0xe9   :  { %5584 = vmatprep.subr.bf16.mxu1 %v8309_v10  ;;  %v271_v10 = vcombine.low %v10070_v8, %v10081_v12  ;;  %v8357_v63 = vld [vmem:[%s12315_s1 + $0x12e4] ss:$16 sps:$4 sm:$0xff]   ;;  %v522_v5 = vcombine.high %v10302_v43, %v10305_v44  ;;  %v308_v8 = vcombine.high %v10308_v45, %v10311_v49  ;;  %v524_v12 = vcombine.high %v10314_v0, %v10317_v1 }
  0xeb   :  { %5542 = vmatpush2.bf16.msra.mxu0 %v8304_v11  ;;  %v487_v11 = vcombine.low %v10084_v13, %v10089_v15  ;;  %v10347_v13 = vpack.c.bf16 %v485_v9, %v269_v3  ;;  %v8391_v3 = vld [vmem:[%s12315_s1 + $0x1220] ss:$16 sps:$4 sm:$0xff]   ;;  %v8396_v9 = vld [vmem:[%s12315_s1 + $0x1004] ss:$16 sps:$4 sm:$0xff]  }
  0xec   :  { %5585 = vmatpush2.bf16.msra.mxu1 %v8307_v14  ;;  %5543 = vmatprep.subr.bf16.mxu0 %v8312_v16  ;;  %v8337_v14 = vld [vmem:[%s12315_s1 + $0xf00] ss:$16 sps:$4 sm:$0xff]  }
  0xed   :  { %5586 = vmatprep.subr.bf16.mxu1 %v8315_v17  ;;  %v10349_v15 = vpack.c.bf16 %v487_v11, %v271_v10  ;;  %v8352_v16 = vld [vmem:[%s12315_s1 + $0x10e0] ss:$16 sps:$4 sm:$0xff]   ;;  %v8399_v10 = vld [vmem:[%s12315_s1 + $0x1204] ss:$16 sps:$4 sm:$0xff]  }
  0xee   :  { %v8355_v17 = vld [vmem:[%s12315_s1 + $0x12e0] ss:$16 sps:$4 sm:$0xff]  }
  0xef   :  { %5544 = vmatpush2.bf16.msra.mxu0 %v8310_v19  ;;  %v8360_v19 = vld [vmem:[%s12315_s1 + $0x10c4] ss:$16 sps:$4 sm:$0xff]   ;;  %v8394_v11 = vld [vmem:[%s12315_s1 + $0x1000] ss:$16 sps:$4 sm:$0xff]  }
  0xf0   :  { %5587 = vmatpush2.bf16.msra.mxu1 %v8313_v22  ;;  %5545 = vmatprep.subr.bf16.mxu0 %v8318_v23  ;;  %v8363_v22 = vld [vmem:[%s12315_s1 + $0x12c4] ss:$16 sps:$4 sm:$0xff]   ;;  %v10363_v23 = vpack.c.bf16 %v522_v5, %v306_v4  ;;  %v8400_v4 = vld [vmem:[%s12315_s1 + $0x11e0] ss:$16 sps:$4 sm:$0xff]  }
  0xf1   :  { %5588 = vmatprep.subr.bf16.mxu1 %v8321_v24  ;;  %v10365_v24 = vpack.c.bf16 %v524_v12, %v308_v8  ;;  %v8403_v5 = vld [vmem:[%s12315_s1 + $0x13e0] ss:$16 sps:$4 sm:$0xff]   ;;  %v8408_v8 = vld [vmem:[%s12315_s1 + $0x11c4] ss:$16 sps:$4 sm:$0xff]  }
  0xf2   :  { %v8411_v12 = vld [vmem:[%s12315_s1 + $0x13c4] ss:$16 sps:$4 sm:$0xff]  }
  0xf3   :  { %5546 = vmatpush2.bf16.msra.mxu0 %v8316_v26  ;;  %v8358_v26 = vld [vmem:[%s12315_s1 + $0x10c0] ss:$16 sps:$4 sm:$0xff]  }
  0xf4   :  { %5589 = vmatpush2.bf16.msra.mxu1 %v8319_v27  ;;  %5547 = vmatprep.subr.bf16.mxu0 %v8324_v28  ;;  %v8361_v27 = vld [vmem:[%s12315_s1 + $0x12c0] ss:$16 sps:$4 sm:$0xff]   ;;  %v8366_v28 = vld [vmem:[%s12315_s1 + $0x10a4] ss:$16 sps:$4 sm:$0xff]  }
  0xf5   :  { %5590 = vmatprep.subr.bf16.mxu1 %v8327_v29  ;;  %v8369_v29 = vld [vmem:[%s12315_s1 + $0x12a4] ss:$16 sps:$4 sm:$0xff]  }
  0xf7   :  { %5548 = vmatpush2.bf16.msra.mxu0 %v8322_v30  ;;  %v8364_v30 = vld [vmem:[%s12315_s1 + $0x10a0] ss:$16 sps:$4 sm:$0xff]  }
  0xf8   :  { %5591 = vmatpush2.bf16.msra.mxu1 %v8325_v31  ;;  %5549 = vmatprep.subr.bf16.mxu0 %v8330_v38  ;;  %v8367_v31 = vld [vmem:[%s12315_s1 + $0x12a0] ss:$16 sps:$4 sm:$0xff]   ;;  %v8375_v38 = vld [vmem:[%s12315_s1 + $0x1284] ss:$16 sps:$4 sm:$0xff]  }
  0xf9   :  { %5592 = vmatprep.subr.bf16.mxu1 %v8333_v40  ;;  %v8370_v40 = vld [vmem:[%s12315_s1 + $0x1080] ss:$16 sps:$4 sm:$0xff]  }
  0xfb   :  { %5550 = vmatpush2.bf16.msra.mxu0 %v8328_v56  ;;  %v8382_v56 = vld [vmem:[%s12315_s1 + $0x1040] ss:$16 sps:$4 sm:$0xff]  }
  0xfc   :  { %5593 = vmatpush2.bf16.msra.mxu1 %v8331_v57  ;;  %5551 = vmatprep.subr.bf16.mxu0 %v8336_v60  ;;  %v8385_v57 = vld [vmem:[%s12315_s1 + $0x1240] ss:$16 sps:$4 sm:$0xff]   ;;  %v8390_v60 = vld [vmem:[%s12315_s1 + $0x1024] ss:$16 sps:$4 sm:$0xff]  }
  0xfd   :  { %5594 = vmatprep.subr.bf16.mxu1 %v8339_v33  ;;  %v8393_v33 = vld [vmem:[%s12315_s1 + $0x1224] ss:$16 sps:$4 sm:$0xff]  }
  0xff   :  { %5552 = vmatpush2.bf16.msra.mxu0 %v8334_v2  ;;  %v8388_v2 = vld [vmem:[%s12315_s1 + $0x1020] ss:$16 sps:$4 sm:$0xff]  }
 0x100   :  { %5595 = vmatpush2.bf16.msra.mxu1 %v8337_v14  ;;  %5607 = vmatprep.subr.bf16.mxu0 %v8354_v62  ;;  %v8397_v14 = vld [vmem:[%s12315_s1 + $0x1200] ss:$16 sps:$4 sm:$0xff]   ;;  %v8402_v62 = vld [vmem:[%s12315_s1 + $0x11e4] ss:$16 sps:$4 sm:$0xff]  }
 0x101   :  { %5650 = vmatprep.subr.bf16.mxu1 %v8357_v63  ;;  %v8405_v63 = vld [vmem:[%s12315_s1 + $0x13e4] ss:$16 sps:$4 sm:$0xff]  }
 0x102   :  { %5554 = vmatmul.mubr.bf16.vlgmr.msra.gmra.mxu0 %v10347_v13 }
 0x103   :  { %5597 = vmatmul.mubr.bf16.vlgmr.msra.gmra.mxu1 %v10349_v15  ;;  %5608 = vmatpush1.bf16.msra.mxu0 %v8352_v16  ;;  %v8406_v16 = vld [vmem:[%s12315_s1 + $0x11c0] ss:$16 sps:$4 sm:$0xff]  }
 0x104   :  { %5651 = vmatpush1.bf16.msra.mxu1 %v8355_v17  ;;  %5609 = vmatprep.subr.bf16.mxu0 %v8360_v19  ;;  %v8409_v17 = vld [vmem:[%s12315_s1 + $0x13c0] ss:$16 sps:$4 sm:$0xff]   ;;  %v8414_v19 = vld [vmem:[%s12315_s1 + $0x11a4] ss:$16 sps:$4 sm:$0xff]  }
 0x105   :  { %5652 = vmatprep.subr.bf16.mxu1 %v8363_v22  ;;  %5639 = vmatprep.mubr.bf16.mxu0 %v10363_v23  ;;  %v8417_v22 = vld [vmem:[%s12315_s1 + $0x13a4] ss:$16 sps:$4 sm:$0xff]  }
 0x106   :  { %5682 = vmatprep.mubr.bf16.mxu1 %v10365_v24 }
 0x107   :  { %5610 = vmatpush1.bf16.msra.mxu0 %v8358_v26  ;;  %v8412_v26 = vld [vmem:[%s12315_s1 + $0x11a0] ss:$16 sps:$4 sm:$0xff]  }
 0x108   :  { %5653 = vmatpush1.bf16.msra.mxu1 %v8361_v27  ;;  %5611 = vmatprep.subr.bf16.mxu0 %v8366_v28  ;;  %v8415_v27 = vld [vmem:[%s12315_s1 + $0x13a0] ss:$16 sps:$4 sm:$0xff]   ;;  %v8420_v28 = vld [vmem:[%s12315_s1 + $0x1184] ss:$16 sps:$4 sm:$0xff]  }
 0x109   :  { %5654 = vmatprep.subr.bf16.mxu1 %v8369_v29  ;;  %v8423_v29 = vld [vmem:[%s12315_s1 + $0x1384] ss:$16 sps:$4 sm:$0xff]  }
 0x10b   :  { %5612 = vmatpush1.bf16.msra.mxu0 %v8364_v30  ;;  %v8418_v30 = vld [vmem:[%s12315_s1 + $0x1180] ss:$16 sps:$4 sm:$0xff]  }
 0x10c   :  { %5655 = vmatpush1.bf16.msra.mxu1 %v8367_v31  ;;  %5613 = vmatprep.subr.bf16.mxu0 %v8372_v32  ;;  %v8421_v31 = vld [vmem:[%s12315_s1 + $0x1380] ss:$16 sps:$4 sm:$0xff]   ;;  %v8426_v32 = vld [vmem:[%s12315_s1 + $0x1164] ss:$16 sps:$4 sm:$0xff]  }
 0x10d   :  { %5656 = vmatprep.subr.bf16.mxu1 %v8375_v38  ;;  %v8429_v38 = vld [vmem:[%s12315_s1 + $0x1364] ss:$16 sps:$4 sm:$0xff]  }
 0x10f   :  { %5614 = vmatpush1.bf16.msra.mxu0 %v8370_v40  ;;  %v8424_v40 = vld [vmem:[%s12315_s1 + $0x1160] ss:$16 sps:$4 sm:$0xff]  }
 0x110   :  { %5657 = vmatpush1.bf16.msra.mxu1 %v8373_v41  ;;  %5615 = vmatprep.subr.bf16.mxu0 %v8378_v42  ;;  %v8427_v41 = vld [vmem:[%s12315_s1 + $0x1360] ss:$16 sps:$4 sm:$0xff]   ;;  %v8432_v42 = vld [vmem:[%s12315_s1 + $0x1144] ss:$16 sps:$4 sm:$0xff]  }
 0x111   :  { %5658 = vmatprep.subr.bf16.mxu1 %v8381_v46  ;;  %v8435_v46 = vld [vmem:[%s12315_s1 + $0x1344] ss:$16 sps:$4 sm:$0xff]  }
 0x113   :  { %5616 = vmatpush1.bf16.msra.mxu0 %v8376_v47  ;;  %v8430_v47 = vld [vmem:[%s12315_s1 + $0x1140] ss:$16 sps:$4 sm:$0xff]  }
 0x114   :  { %5659 = vmatpush1.bf16.msra.mxu1 %v8379_v51  ;;  %5617 = vmatprep.subr.bf16.mxu0 %v8384_v53  ;;  %v8433_v51 = vld [vmem:[%s12315_s1 + $0x1340] ss:$16 sps:$4 sm:$0xff]   ;;  %v8556_v53 = vld [vmem:[%s12314_s0 + $0x28] ss:$48 sps:$4 sm:$0xff]  }
 0x115   :  { %5660 = vmatprep.subr.bf16.mxu1 %v8387_v54  ;;  %v8438_v54 = vld [vmem:[%s12315_s1 + $0x1124] ss:$16 sps:$4 sm:$0xff]  }
 0x117   :  { %5618 = vmatpush1.bf16.msra.mxu0 %v8382_v56  ;;  %v8441_v56 = vld [vmem:[%s12315_s1 + $0x1324] ss:$16 sps:$4 sm:$0xff]  }
 0x118   :  { %5661 = vmatpush1.bf16.msra.mxu1 %v8385_v57  ;;  %5619 = vmatprep.subr.bf16.mxu0 %v8390_v60  ;;  %v8558_v57 = vld [vmem:[%s12314_s0 + $0x88] ss:$48 sps:$4 sm:$0xff]  }
 0x119   :  { %5662 = vmatprep.subr.bf16.mxu1 %v8393_v33  ;;  %v8560_v60 = vld [vmem:[%s12314_s0 + $0xe8] ss:$48 sps:$4 sm:$0xff]  }
 0x11a   :  { %v8562_v33 = vld [vmem:[%s12314_s0 + $0x148] ss:$48 sps:$4 sm:$0xff]  }
 0x11b   :  { %5620 = vmatpush1.bf16.msra.mxu0 %v8388_v2  ;;  %v8564_v2 = vld [vmem:[%s12314_s0 + $0x2c] ss:$48 sps:$4 sm:$0xff]  }
 0x11c   :  { %5663 = vmatpush1.bf16.msra.mxu1 %v8391_v3  ;;  %5621 = vmatprep.subr.bf16.mxu0 %v8396_v9  ;;  %v8565_v3 = vld [vmem:[%s12314_s0 + $0x8c] ss:$48 sps:$4 sm:$0xff]  }
 0x11d   :  { %5664 = vmatprep.subr.bf16.mxu1 %v8399_v10  ;;  %v8566_v9 = vld [vmem:[%s12314_s0 + $0xec] ss:$48 sps:$4 sm:$0xff]  }
 0x11e   :  { %v8567_v10 = vld [vmem:[%s12314_s0 + $0x14c] ss:$48 sps:$4 sm:$0xff]  }
 0x11f   :  { %5622 = vmatpush1.bf16.msra.mxu0 %v8394_v11  ;;  %v8436_v11 = vld [vmem:[%s12315_s1 + $0x1120] ss:$16 sps:$4 sm:$0xff]  }
 0x120   :  { %5665 = vmatpush1.bf16.msra.mxu1 %v8397_v14  ;;  %5623 = vmatprep.subr.bf16.mxu0 %v8402_v62  ;;  %v8439_v14 = vld [vmem:[%s12315_s1 + $0x1320] ss:$16 sps:$4 sm:$0xff]   ;;  %v10558_v62 = vrot.slane %v8556_v53, %v9399_v55  ;;  %v8477_v53 = vld [vmem:[%s12315_s1 + $0x16a4] ss:$16 sps:$4 sm:$0xff]  }
 0x121   :  { %5666 = vmatprep.subr.bf16.mxu1 %v8405_v63  ;;  %v8444_v63 = vld [vmem:[%s12315_s1 + $0x1104] ss:$16 sps:$4 sm:$0xff]  }
 0x123   :  { %5624 = vmatpush2.bf16.msra.mxu0 %v8400_v4  ;;  %v8447_v4 = vld [vmem:[%s12315_s1 + $0x1304] ss:$16 sps:$4 sm:$0xff]  }
 0x124   :  { %5667 = vmatpush2.bf16.msra.mxu1 %v8403_v5  ;;  %5625 = vmatprep.subr.bf16.mxu0 %v8408_v8  ;;  %v10567_v5 = vrot.slane %v8558_v57, %v9399_v55  ;;  %v10570_v8 = vrot.slane %v8560_v60, %v9399_v55  ;;  %v8480_v57 = vld [vmem:[%s12315_s1 + $0x1484] ss:$16 sps:$4 sm:$0xff]  }
 0x125   :  { %5668 = vmatprep.subr.bf16.mxu1 %v8411_v12  ;;  %v10573_v12 = vrot.slane %v8562_v33, %v9399_v55  ;;  %v8483_v60 = vld [vmem:[%s12315_s1 + $0x1684] ss:$16 sps:$4 sm:$0xff]   ;;  %v8478_v33 = vld [vmem:[%s12315_s1 + $0x1480] ss:$16 sps:$4 sm:$0xff]  }
 0x127   :  { %5626 = vmatpush2.bf16.msra.mxu0 %v8406_v16  ;;  %v10576_v16 = vrot.slane %v8564_v2, %v9399_v55  ;;  %v8481_v2 = vld [vmem:[%s12315_s1 + $0x1680] ss:$16 sps:$4 sm:$0xff]  }
 0x128   :  { %5669 = vmatpush2.bf16.msra.mxu1 %v8409_v17  ;;  %5627 = vmatprep.subr.bf16.mxu0 %v8414_v19  ;;  %v10579_v17 = vrot.slane %v8565_v3, %v9399_v55  ;;  %v10582_v19 = vrot.slane %v8566_v9, %v9399_v55  ;;  %v8486_v3 = vld [vmem:[%s12315_s1 + $0x1464] ss:$16 sps:$4 sm:$0xff]  }
 0x129   :  { %5670 = vmatprep.subr.bf16.mxu1 %v8417_v22  ;;  %v10585_v22 = vrot.slane %v8567_v10, %v9399_v55  ;;  %v8445_v55 = vld [vmem:[%s12315_s1 + $0x1300] ss:$16 sps:$4 sm:$0xff]   ;;  %v8489_v9 = vld [vmem:[%s12315_s1 + $0x1664] ss:$16 sps:$4 sm:$0xff]  }
 0x12a   :  { %v8484_v10 = vld [vmem:[%s12315_s1 + $0x1460] ss:$16 sps:$4 sm:$0xff]  }
 0x12b   :  { %5628 = vmatpush2.bf16.msra.mxu0 %v8412_v26  ;;  %v8442_v26 = vld [vmem:[%s12315_s1 + $0x1100] ss:$16 sps:$4 sm:$0xff]  }
 0x12c   :  { %5671 = vmatpush2.bf16.msra.mxu1 %v8415_v27  ;;  %5629 = vmatprep.subr.bf16.mxu0 %v8420_v28  ;;  %v305_v27 = vcombine.low %v10290_v59, %v10299_v37  ;;  %v521_v28 = vcombine.low %v10302_v43, %v10305_v44  ;;  %v8462_v59 = vld [vmem:[%s12315_s1 + $0x14e4] ss:$16 sps:$4 sm:$0xff]   ;;  %v342_v43 = vcombine.high %v10558_v62, %v10567_v5 }
 0x12d   :  { %5672 = vmatprep.subr.bf16.mxu1 %v8423_v29  ;;  %v307_v29 = vcombine.low %v10308_v45, %v10311_v49  ;;  %v8465_v37 = vld [vmem:[%s12315_s1 + $0x16e4] ss:$16 sps:$4 sm:$0xff]   ;;  %v558_v44 = vcombine.high %v10570_v8, %v10573_v12  ;;  %v344_v45 = vcombine.high %v10576_v16, %v10579_v17  ;;  %v560_v49 = vcombine.high %v10582_v19, %v10585_v22 }
 0x12f   :  { %5630 = vmatpush2.bf16.msra.mxu0 %v8418_v30  ;;  %v523_v30 = vcombine.low %v10314_v0, %v10317_v1  ;;  %v10615_v0 = vpack.c.bf16 %v521_v28, %v305_v27  ;;  %v8498_v27 = vld [vmem:[%s12315_s1 + $0x1424] ss:$16 sps:$4 sm:$0xff]  }
 0x130   :  { %5673 = vmatpush2.bf16.msra.mxu1 %v8421_v31  ;;  %5631 = vmatprep.subr.bf16.mxu0 %v8426_v32  ;;  %v8460_v31 = vld [vmem:[%s12315_s1 + $0x14e0] ss:$16 sps:$4 sm:$0xff]   ;;  %v8501_v28 = vld [vmem:[%s12315_s1 + $0x1624] ss:$16 sps:$4 sm:$0xff]  }
 0x131   :  { %5674 = vmatprep.subr.bf16.mxu1 %v8429_v38  ;;  %v10617_v1 = vpack.c.bf16 %v523_v30, %v307_v29  ;;  %v8463_v32 = vld [vmem:[%s12315_s1 + $0x16e0] ss:$16 sps:$4 sm:$0xff]   ;;  %v8468_v38 = vld [vmem:[%s12315_s1 + $0x14c4] ss:$16 sps:$4 sm:$0xff]  }
 0x132   :  { %v8496_v29 = vld [vmem:[%s12315_s1 + $0x1420] ss:$16 sps:$4 sm:$0xff]  }
 0x133   :  { %5632 = vmatpush2.bf16.msra.mxu0 %v8424_v40  ;;  %v8471_v40 = vld [vmem:[%s12315_s1 + $0x16c4] ss:$16 sps:$4 sm:$0xff]   ;;  %v8499_v30 = vld [vmem:[%s12315_s1 + $0x1620] ss:$16 sps:$4 sm:$0xff]  }
 0x134   :  { %5675 = vmatpush2.bf16.msra.mxu1 %v8427_v41  ;;  %5633 = vmatprep.subr.bf16.mxu0 %v8432_v42  ;;  %v10631_v41 = vpack.c.bf16 %v558_v44, %v342_v43  ;;  %v10633_v42 = vpack.c.bf16 %v560_v49, %v344_v45  ;;  %v8505_v43 = vld [vmem:[%s12315_s1 + $0x1600] ss:$16 sps:$4 sm:$0xff]   ;;  %v8510_v44 = vld [vmem:[%s12315_s1 + $0x15e4] ss:$16 sps:$4 sm:$0xff]  }
 0x135   :  { %5676 = vmatprep.subr.bf16.mxu1 %v8435_v46  ;;  %v8466_v46 = vld [vmem:[%s12315_s1 + $0x14c0] ss:$16 sps:$4 sm:$0xff]   ;;  %v8513_v45 = vld [vmem:[%s12315_s1 + $0x17e4] ss:$16 sps:$4 sm:$0xff]  }
 0x136   :  { %v8508_v49 = vld [vmem:[%s12315_s1 + $0x15e0] ss:$16 sps:$4 sm:$0xff]  }
 0x137   :  { %5634 = vmatpush2.bf16.msra.mxu0 %v8430_v47  ;;  %v8469_v47 = vld [vmem:[%s12315_s1 + $0x16c0] ss:$16 sps:$4 sm:$0xff]  }
 0x138   :  { %5677 = vmatpush2.bf16.msra.mxu1 %v8433_v51  ;;  %5635 = vmatprep.subr.bf16.mxu0 %v8438_v54  ;;  %v8474_v51 = vld [vmem:[%s12315_s1 + $0x14a4] ss:$16 sps:$4 sm:$0xff]   ;;  %v8472_v54 = vld [vmem:[%s12315_s1 + $0x14a0] ss:$16 sps:$4 sm:$0xff]  }
 0x139   :  { %5678 = vmatprep.subr.bf16.mxu1 %v8441_v56  ;;  %v8475_v56 = vld [vmem:[%s12315_s1 + $0x16a0] ss:$16 sps:$4 sm:$0xff]  }
 0x13b   :  { %5636 = vmatpush2.bf16.msra.mxu0 %v8436_v11  ;;  %v8487_v11 = vld [vmem:[%s12315_s1 + $0x1660] ss:$16 sps:$4 sm:$0xff]  }
 0x13c   :  { %5679 = vmatpush2.bf16.msra.mxu1 %v8439_v14  ;;  %5637 = vmatprep.subr.bf16.mxu0 %v8444_v63  ;;  %v8492_v14 = vld [vmem:[%s12315_s1 + $0x1444] ss:$16 sps:$4 sm:$0xff]  }
 0x13d   :  { %5680 = vmatprep.subr.bf16.mxu1 %v8447_v4  ;;  %v8495_v63 = vld [vmem:[%s12315_s1 + $0x1644] ss:$16 sps:$4 sm:$0xff]   ;;  %v8490_v4 = vld [vmem:[%s12315_s1 + $0x1440] ss:$16 sps:$4 sm:$0xff]  }
 0x13f   :  { %5638 = vmatpush2.bf16.msra.mxu0 %v8442_v26  ;;  %v8493_v26 = vld [vmem:[%s12315_s1 + $0x1640] ss:$16 sps:$4 sm:$0xff]  }
 0x140   :  { %5681 = vmatpush2.bf16.msra.mxu1 %v8445_v55  ;;  %5693 = vmatprep.subr.bf16.mxu0 %v8462_v59  ;;  %v8504_v55 = vld [vmem:[%s12315_s1 + $0x1404] ss:$16 sps:$4 sm:$0xff]  }
 0x141   :  { %5736 = vmatprep.subr.bf16.mxu1 %v8465_v37  ;;  %v8507_v59 = vld [vmem:[%s12315_s1 + $0x1604] ss:$16 sps:$4 sm:$0xff]   ;;  %v8502_v37 = vld [vmem:[%s12315_s1 + $0x1400] ss:$16 sps:$4 sm:$0xff]  }
 0x142   :  { %5640 = vmatmul.mubr.bf16.vlgmr.msra.gmra.mxu0 %v10615_v0 }
 0x143   :  { %5683 = vmatmul.mubr.bf16.vlgmr.msra.gmra.mxu1 %v10617_v1  ;;  %5694 = vmatpush1.bf16.msra.mxu0 %v8460_v31  ;;  %v8511_v31 = vld [vmem:[%s12315_s1 + $0x17e0] ss:$16 sps:$4 sm:$0xff]  }
 0x144   :  { %5737 = vmatpush1.bf16.msra.mxu1 %v8463_v32  ;;  %5695 = vmatprep.subr.bf16.mxu0 %v8468_v38  ;;  %v8516_v32 = vld [vmem:[%s12315_s1 + $0x15c4] ss:$16 sps:$4 sm:$0xff]  }
 0x145   :  { %5738 = vmatprep.subr.bf16.mxu1 %v8471_v40  ;;  %5725 = vmatprep.mubr.bf16.mxu0 %v10631_v41  ;;  %v8519_v38 = vld [vmem:[%s12315_s1 + $0x17c4] ss:$16 sps:$4 sm:$0xff]   ;;  %v8514_v40 = vld [vmem:[%s12315_s1 + $0x15c0] ss:$16 sps:$4 sm:$0xff]  }
 0x146   :  { %5768 = vmatprep.mubr.bf16.mxu1 %v10633_v42 }
 0x147   :  { %5696 = vmatpush1.bf16.msra.mxu0 %v8466_v46  ;;  %v8517_v46 = vld [vmem:[%s12315_s1 + $0x17c0] ss:$16 sps:$4 sm:$0xff]  }
 0x148   :  { %5739 = vmatpush1.bf16.msra.mxu1 %v8469_v47  ;;  %5697 = vmatprep.subr.bf16.mxu0 %v8474_v51  ;;  %v8522_v47 = vld [vmem:[%s12315_s1 + $0x15a4] ss:$16 sps:$4 sm:$0xff]  }
 0x149   :  { %5740 = vmatprep.subr.bf16.mxu1 %v8477_v53  ;;  %v8525_v51 = vld [vmem:[%s12315_s1 + $0x17a4] ss:$16 sps:$4 sm:$0xff]   ;;  %v8520_v53 = vld [vmem:[%s12315_s1 + $0x15a0] ss:$16 sps:$4 sm:$0xff]  }
 0x14b   :  { %5698 = vmatpush1.bf16.msra.mxu0 %v8472_v54  ;;  %v8523_v54 = vld [vmem:[%s12315_s1 + $0x17a0] ss:$16 sps:$4 sm:$0xff]  }
 0x14c   :  { %5741 = vmatpush1.bf16.msra.mxu1 %v8475_v56  ;;  %5699 = vmatprep.subr.bf16.mxu0 %v8480_v57  ;;  %v8528_v56 = vld [vmem:[%s12315_s1 + $0x1584] ss:$16 sps:$4 sm:$0xff]  }
 0x14d   :  { %5742 = vmatprep.subr.bf16.mxu1 %v8483_v60  ;;  %v8531_v57 = vld [vmem:[%s12315_s1 + $0x1784] ss:$16 sps:$4 sm:$0xff]   ;;  %v8526_v60 = vld [vmem:[%s12315_s1 + $0x1580] ss:$16 sps:$4 sm:$0xff]  }
 0x14f   :  { %5700 = vmatpush1.bf16.msra.mxu0 %v8478_v33  ;;  %v8529_v33 = vld [vmem:[%s12315_s1 + $0x1780] ss:$16 sps:$4 sm:$0xff]  }
 0x150   :  { %5743 = vmatpush1.bf16.msra.mxu1 %v8481_v2  ;;  %5701 = vmatprep.subr.bf16.mxu0 %v8486_v3  ;;  %v8534_v2 = vld [vmem:[%s12315_s1 + $0x1564] ss:$16 sps:$4 sm:$0xff]  }
 0x151   :  { %5744 = vmatprep.subr.bf16.mxu1 %v8489_v9  ;;  %v8537_v3 = vld [vmem:[%s12315_s1 + $0x1764] ss:$16 sps:$4 sm:$0xff]   ;;  %v8532_v9 = vld [vmem:[%s12315_s1 + $0x1560] ss:$16 sps:$4 sm:$0xff]  }
 0x153   :  { %5702 = vmatpush1.bf16.msra.mxu0 %v8484_v10  ;;  %v8535_v10 = vld [vmem:[%s12315_s1 + $0x1760] ss:$16 sps:$4 sm:$0xff]  }
 0x154   :  { %5745 = vmatpush1.bf16.msra.mxu1 %v8487_v11  ;;  %5703 = vmatprep.subr.bf16.mxu0 %v8492_v14  ;;  %v8540_v11 = vld [vmem:[%s12315_s1 + $0x1544] ss:$16 sps:$4 sm:$0xff]  }
 0x155   :  { %5746 = vmatprep.subr.bf16.mxu1 %v8495_v63  ;;  %v8543_v14 = vld [vmem:[%s12315_s1 + $0x1744] ss:$16 sps:$4 sm:$0xff]   ;;  %v8538_v63 = vld [vmem:[%s12315_s1 + $0x1540] ss:$16 sps:$4 sm:$0xff]  }
 0x157   :  { %5704 = vmatpush1.bf16.msra.mxu0 %v8490_v4  ;;  %v8541_v4 = vld [vmem:[%s12315_s1 + $0x1740] ss:$16 sps:$4 sm:$0xff]  }
 0x158   :  { %5747 = vmatpush1.bf16.msra.mxu1 %v8493_v26  ;;  %5705 = vmatprep.subr.bf16.mxu0 %v8498_v27  ;;  %v8546_v26 = vld [vmem:[%s12315_s1 + $0x1524] ss:$16 sps:$4 sm:$0xff]  }
 0x159   :  { %5748 = vmatprep.subr.bf16.mxu1 %v8501_v28  ;;  %v8549_v27 = vld [vmem:[%s12315_s1 + $0x1724] ss:$16 sps:$4 sm:$0xff]   ;;  %v8544_v28 = vld [vmem:[%s12315_s1 + $0x1520] ss:$16 sps:$4 sm:$0xff]  }
 0x15b   :  { %5706 = vmatpush1.bf16.msra.mxu0 %v8496_v29  ;;  %v8547_v29 = vld [vmem:[%s12315_s1 + $0x1720] ss:$16 sps:$4 sm:$0xff]  }
 0x15c   :  { %5749 = vmatpush1.bf16.msra.mxu1 %v8499_v30  ;;  %5707 = vmatprep.subr.bf16.mxu0 %v8504_v55  ;;  %v8552_v30 = vld [vmem:[%s12315_s1 + $0x1504] ss:$16 sps:$4 sm:$0xff]  }
 0x15d   :  { %5750 = vmatprep.subr.bf16.mxu1 %v8507_v59  ;;  %v8555_v55 = vld [vmem:[%s12315_s1 + $0x1704] ss:$16 sps:$4 sm:$0xff]   ;;  %v341_v59 = vcombine.low %v10558_v62, %v10567_v5  ;;  %v8570_v62 = vld [vmem:[%s12315_s1 + $0xec] ss:$16 sps:$4 sm:$0xff]  }
 0x15e   :  { %v8573_v5 = vld [vmem:[%s12315_s1 + $0x2ec] ss:$16 sps:$4 sm:$0xff]  }
 0x15f   :  { %5708 = vmatpush1.bf16.msra.mxu0 %v8502_v37  ;;  %v557_v37 = vcombine.low %v10570_v8, %v10573_v12  ;;  %v8568_v8 = vld [vmem:[%s12315_s1 + $0xe8] ss:$16 sps:$4 sm:$0xff]  }
 0x160   :  { %5751 = vmatpush1.bf16.msra.mxu1 %v8505_v43  ;;  %5709 = vmatprep.subr.bf16.mxu0 %v8510_v44  ;;  %v343_v43 = vcombine.low %v10576_v16, %v10579_v17  ;;  %v559_v44 = vcombine.low %v10582_v19, %v10585_v22  ;;  %v8571_v12 = vld [vmem:[%s12315_s1 + $0x2e8] ss:$16 sps:$4 sm:$0xff]   ;;  %v8576_v19 = vld [vmem:[%s12315_s1 + $0xcc] ss:$16 sps:$4 sm:$0xff]  }
 0x161   :  { %5752 = vmatprep.subr.bf16.mxu1 %v8513_v45  ;;  %v8550_v45 = vld [vmem:[%s12315_s1 + $0x1500] ss:$16 sps:$4 sm:$0xff]   ;;  %v10833_v16 = vpack.c.bf16 %v557_v37, %v341_v59  ;;  %v8579_v22 = vld [vmem:[%s12315_s1 + $0x2cc] ss:$16 sps:$4 sm:$0xff]   ;;  %v8619_v59 = vld [vmem:[%s12315_s1 + $0x3e8] ss:$16 sps:$4 sm:$0xff]  }
 0x162   :  { %v10835_v17 = vpack.c.bf16 %v559_v44, %v343_v43  ;;  %v8624_v37 = vld [vmem:[%s12315_s1 + $0x1cc] ss:$16 sps:$4 sm:$0xff]   ;;  %v8622_v44 = vld [vmem:[%s12315_s1 + $0x1c8] ss:$16 sps:$4 sm:$0xff]  }
 0x163   :  { %5710 = vmatpush2.bf16.msra.mxu0 %v8508_v49  ;;  %v8553_v49 = vld [vmem:[%s12315_s1 + $0x1700] ss:$16 sps:$4 sm:$0xff]   ;;  %v8627_v43 = vld [vmem:[%s12315_s1 + $0x3cc] ss:$16 sps:$4 sm:$0xff]  }
 0x164   :  { %5753 = vmatpush2.bf16.msra.mxu1 %v8511_v31  ;;  %5711 = vmatprep.subr.bf16.mxu0 %v8516_v32  ;;  %v8574_v31 = vld [vmem:[%s12315_s1 + $0xc8] ss:$16 sps:$4 sm:$0xff]  }
 0x165   :  { %5754 = vmatprep.subr.bf16.mxu1 %v8519_v38  ;;  %v8577_v32 = vld [vmem:[%s12315_s1 + $0x2c8] ss:$16 sps:$4 sm:$0xff]   ;;  %v8582_v38 = vld [vmem:[%s12315_s1 + $0xac] ss:$16 sps:$4 sm:$0xff]  }
 0x167   :  { %5712 = vmatpush2.bf16.msra.mxu0 %v8514_v40  ;;  %v8585_v40 = vld [vmem:[%s12315_s1 + $0x2ac] ss:$16 sps:$4 sm:$0xff]  }
 0x168   :  { %5755 = vmatpush2.bf16.msra.mxu1 %v8517_v46  ;;  %5713 = vmatprep.subr.bf16.mxu0 %v8522_v47  ;;  %v8580_v46 = vld [vmem:[%s12315_s1 + $0xa8] ss:$16 sps:$4 sm:$0xff]  }
 0x169   :  { %5756 = vmatprep.subr.bf16.mxu1 %v8525_v51  ;;  %v8583_v47 = vld [vmem:[%s12315_s1 + $0x2a8] ss:$16 sps:$4 sm:$0xff]   ;;  %v8588_v51 = vld [vmem:[%s12315_s1 + $0x8c] ss:$16 sps:$4 sm:$0xff]  }
 0x16b   :  { %5714 = vmatpush2.bf16.msra.mxu0 %v8520_v53  ;;  %v8591_v53 = vld [vmem:[%s12315_s1 + $0x28c] ss:$16 sps:$4 sm:$0xff]  }
 0x16c   :  { %5757 = vmatpush2.bf16.msra.mxu1 %v8523_v54  ;;  %5715 = vmatprep.subr.bf16.mxu0 %v8528_v56  ;;  %v8594_v54 = vld [vmem:[%s12315_s1 + $0x6c] ss:$16 sps:$4 sm:$0xff]  }
 0x16d   :  { %5758 = vmatprep.subr.bf16.mxu1 %v8531_v57  ;;  %v8597_v56 = vld [vmem:[%s12315_s1 + $0x26c] ss:$16 sps:$4 sm:$0xff]   ;;  %v8592_v57 = vld [vmem:[%s12315_s1 + $0x68] ss:$16 sps:$4 sm:$0xff]  }
 0x16f   :  { %5716 = vmatpush2.bf16.msra.mxu0 %v8526_v60  ;;  %v8595_v60 = vld [vmem:[%s12315_s1 + $0x268] ss:$16 sps:$4 sm:$0xff]  }
 0x170   :  { %5759 = vmatpush2.bf16.msra.mxu1 %v8529_v33  ;;  %5717 = vmatprep.subr.bf16.mxu0 %v8534_v2  ;;  %v8600_v33 = vld [vmem:[%s12315_s1 + $0x4c] ss:$16 sps:$4 sm:$0xff]  }
 0x171   :  { %5760 = vmatprep.subr.bf16.mxu1 %v8537_v3  ;;  %v8603_v2 = vld [vmem:[%s12315_s1 + $0x24c] ss:$16 sps:$4 sm:$0xff]   ;;  %v8598_v3 = vld [vmem:[%s12315_s1 + $0x48] ss:$16 sps:$4 sm:$0xff]  }
 0x173   :  { %5718 = vmatpush2.bf16.msra.mxu0 %v8532_v9  ;;  %v8601_v9 = vld [vmem:[%s12315_s1 + $0x248] ss:$16 sps:$4 sm:$0xff]  }
 0x174   :  { %5761 = vmatpush2.bf16.msra.mxu1 %v8535_v10  ;;  %5719 = vmatprep.subr.bf16.mxu0 %v8540_v11  ;;  %v8606_v10 = vld [vmem:[%s12315_s1 + $0x2c] ss:$16 sps:$4 sm:$0xff]  }
 0x175   :  { %5762 = vmatprep.subr.bf16.mxu1 %v8543_v14  ;;  %v8609_v11 = vld [vmem:[%s12315_s1 + $0x22c] ss:$16 sps:$4 sm:$0xff]   ;;  %v8604_v14 = vld [vmem:[%s12315_s1 + $0x28] ss:$16 sps:$4 sm:$0xff]  }
 0x177   :  { %5720 = vmatpush2.bf16.msra.mxu0 %v8538_v63  ;;  %v8607_v63 = vld [vmem:[%s12315_s1 + $0x228] ss:$16 sps:$4 sm:$0xff]  }
 0x178   :  { %5763 = vmatpush2.bf16.msra.mxu1 %v8541_v4  ;;  %5721 = vmatprep.subr.bf16.mxu0 %v8546_v26  ;;  %v8612_v4 = vld [vmem:[%s12315_s1 + $0xc] ss:$16 sps:$4 sm:$0xff]  }
 0x179   :  { %5764 = vmatprep.subr.bf16.mxu1 %v8549_v27  ;;  %v8615_v26 = vld [vmem:[%s12315_s1 + $0x20c] ss:$16 sps:$4 sm:$0xff]   ;;  %v8610_v27 = vld [vmem:[%s12315_s1 + $0x8] ss:$16 sps:$4 sm:$0xff]  }
 0x17b   :  { %5722 = vmatpush2.bf16.msra.mxu0 %v8544_v28  ;;  %v8613_v28 = vld [vmem:[%s12315_s1 + $0x208] ss:$16 sps:$4 sm:$0xff]  }
 0x17c   :  { %5765 = vmatpush2.bf16.msra.mxu1 %v8547_v29  ;;  %5723 = vmatprep.subr.bf16.mxu0 %v8552_v30  ;;  %v8618_v29 = vld [vmem:[%s12315_s1 + $0x1ec] ss:$16 sps:$4 sm:$0xff]  }
 0x17d   :  { %5766 = vmatprep.subr.bf16.mxu1 %v8555_v55  ;;  %v8621_v30 = vld [vmem:[%s12315_s1 + $0x3ec] ss:$16 sps:$4 sm:$0xff]   ;;  %v8616_v55 = vld [vmem:[%s12315_s1 + $0x1e8] ss:$16 sps:$4 sm:$0xff]  }
 0x17f   :  { %5724 = vmatpush2.bf16.msra.mxu0 %v8550_v45  ;;  %v8625_v45 = vld [vmem:[%s12315_s1 + $0x3c8] ss:$16 sps:$4 sm:$0xff]  }
 0x180   :  { %5767 = vmatpush2.bf16.msra.mxu1 %v8553_v49  ;;  %5779 = vmatprep.subr.bf16.mxu0 %v8570_v62  ;;  %v8630_v49 = vld [vmem:[%s12315_s1 + $0x1ac] ss:$16 sps:$4 sm:$0xff]  }
 0x181   :  { %5822 = vmatprep.subr.bf16.mxu1 %v8573_v5  ;;  %v8633_v62 = vld [vmem:[%s12315_s1 + $0x3ac] ss:$16 sps:$4 sm:$0xff]   ;;  %v8628_v5 = vld [vmem:[%s12315_s1 + $0x1a8] ss:$16 sps:$4 sm:$0xff]  }
 0x182   :  { %5726 = vmatmul.mubr.bf16.vlgmr.msra.gmra.mxu0 %v10833_v16 }
 0x183   :  { %5769 = vmatmul.mubr.bf16.vlgmr.msra.gmra.mxu1 %v10835_v17  ;;  %5780 = vmatpush1.bf16.msra.mxu0 %v8568_v8  ;;  %v8631_v8 = vld [vmem:[%s12315_s1 + $0x3a8] ss:$16 sps:$4 sm:$0xff]  }
 0x184   :  { %5823 = vmatpush1.bf16.msra.mxu1 %v8571_v12  ;;  %5781 = vmatprep.subr.bf16.mxu0 %v8576_v19  ;;  %v8636_v12 = vld [vmem:[%s12315_s1 + $0x18c] ss:$16 sps:$4 sm:$0xff]  }
 0x185   :  { %5824 = vmatprep.subr.bf16.mxu1 %v8579_v22  ;;  %5811 = vmatprep.mubr.bf16.mxu0 %v9454_v18  ;;  %v8586_v18 = vld [vmem:[%s12315_s1 + $0x88] ss:$16 sps:$4 sm:$0xff]   ;;  %v8639_v19 = vld [vmem:[%s12315_s1 + $0x38c] ss:$16 sps:$4 sm:$0xff]  }
 0x186   :  { %5854 = vmatprep.mubr.bf16.mxu1 %v9460_v21  ;;  %v8589_v21 = vld [vmem:[%s12315_s1 + $0x288] ss:$16 sps:$4 sm:$0xff]  }
 0x187   :  { %5782 = vmatpush1.bf16.msra.mxu0 %v8574_v31  ;;  %v8634_v22 = vld [vmem:[%s12315_s1 + $0x188] ss:$16 sps:$4 sm:$0xff]  }
 0x188   :  { %5825 = vmatpush1.bf16.msra.mxu1 %v8577_v32  ;;  %5783 = vmatprep.subr.bf16.mxu0 %v8582_v38  ;;  %v8637_v31 = vld [vmem:[%s12315_s1 + $0x388] ss:$16 sps:$4 sm:$0xff]   ;;  %v8642_v32 = vld [vmem:[%s12315_s1 + $0x16c] ss:$16 sps:$4 sm:$0xff]  }
 0x189   :  { %5826 = vmatprep.subr.bf16.mxu1 %v8585_v40  ;;  %v8645_v38 = vld [vmem:[%s12315_s1 + $0x36c] ss:$16 sps:$4 sm:$0xff]   ;;  %v8640_v40 = vld [vmem:[%s12315_s1 + $0x168] ss:$16 sps:$4 sm:$0xff]  }
 0x18b   :  { %5784 = vmatpush1.bf16.msra.mxu0 %v8580_v46  ;;  %v8643_v46 = vld [vmem:[%s12315_s1 + $0x368] ss:$16 sps:$4 sm:$0xff]  }
 0x18c   :  { %5827 = vmatpush1.bf16.msra.mxu1 %v8583_v47  ;;  %5785 = vmatprep.subr.bf16.mxu0 %v8588_v51  ;;  %v8648_v47 = vld [vmem:[%s12315_s1 + $0x14c] ss:$16 sps:$4 sm:$0xff]  }
 0x18d   :  { %5828 = vmatprep.subr.bf16.mxu1 %v8591_v53  ;;  %v8651_v51 = vld [vmem:[%s12315_s1 + $0x34c] ss:$16 sps:$4 sm:$0xff]   ;;  %v8646_v53 = vld [vmem:[%s12315_s1 + $0x148] ss:$16 sps:$4 sm:$0xff]  }
 0x18f   :  { %5786 = vmatpush1.bf16.msra.mxu0 %v8586_v18  ;;  %v8649_v18 = vld [vmem:[%s12315_s1 + $0x348] ss:$16 sps:$4 sm:$0xff]  }
 0x190   :  { %5829 = vmatpush1.bf16.msra.mxu1 %v8589_v21  ;;  %5787 = vmatprep.subr.bf16.mxu0 %v8594_v54  ;;  %v8654_v21 = vld [vmem:[%s12315_s1 + $0x12c] ss:$16 sps:$4 sm:$0xff]  }
 0x191   :  { %5830 = vmatprep.subr.bf16.mxu1 %v8597_v56  ;;  %v8657_v54 = vld [vmem:[%s12315_s1 + $0x32c] ss:$16 sps:$4 sm:$0xff]   ;;  %v8652_v56 = vld [vmem:[%s12315_s1 + $0x128] ss:$16 sps:$4 sm:$0xff]  }
 0x193   :  { %5788 = vmatpush1.bf16.msra.mxu0 %v8592_v57  ;;  %v8655_v57 = vld [vmem:[%s12315_s1 + $0x328] ss:$16 sps:$4 sm:$0xff]  }
 0x194   :  { %5831 = vmatpush1.bf16.msra.mxu1 %v8595_v60  ;;  %5789 = vmatprep.subr.bf16.mxu0 %v8600_v33  ;;  %v8660_v60 = vld [vmem:[%s12315_s1 + $0x10c] ss:$16 sps:$4 sm:$0xff]  }
 0x195   :  { %5832 = vmatprep.subr.bf16.mxu1 %v8603_v2  ;;  %v8663_v33 = vld [vmem:[%s12315_s1 + $0x30c] ss:$16 sps:$4 sm:$0xff]   ;;  %v8658_v2 = vld [vmem:[%s12315_s1 + $0x108] ss:$16 sps:$4 sm:$0xff]  }
 0x197   :  { %5790 = vmatpush1.bf16.msra.mxu0 %v8598_v3  ;;  %v8661_v3 = vld [vmem:[%s12315_s1 + $0x308] ss:$16 sps:$4 sm:$0xff]  }
 0x198   :  { %5833 = vmatpush1.bf16.msra.mxu1 %v8601_v9  ;;  %5791 = vmatprep.subr.bf16.mxu0 %v8606_v10  ;;  %v8666_v9 = vld [vmem:[%s12315_s1 + $0x4ec] ss:$16 sps:$4 sm:$0xff]  }
 0x199   :  { %5834 = vmatprep.subr.bf16.mxu1 %v8609_v11  ;;  %v8669_v10 = vld [vmem:[%s12315_s1 + $0x6ec] ss:$16 sps:$4 sm:$0xff]   ;;  %v8664_v11 = vld [vmem:[%s12315_s1 + $0x4e8] ss:$16 sps:$4 sm:$0xff]  }
 0x19b   :  { %5792 = vmatpush1.bf16.msra.mxu0 %v8604_v14  ;;  %v8667_v14 = vld [vmem:[%s12315_s1 + $0x6e8] ss:$16 sps:$4 sm:$0xff]  }
 0x19c   :  { %5835 = vmatpush1.bf16.msra.mxu1 %v8607_v63  ;;  %5793 = vmatprep.subr.bf16.mxu0 %v8612_v4  ;;  %v8672_v63 = vld [vmem:[%s12315_s1 + $0x4cc] ss:$16 sps:$4 sm:$0xff]  }
 0x19d   :  { %5836 = vmatprep.subr.bf16.mxu1 %v8615_v26  ;;  %v8675_v4 = vld [vmem:[%s12315_s1 + $0x6cc] ss:$16 sps:$4 sm:$0xff]   ;;  %v8670_v26 = vld [vmem:[%s12315_s1 + $0x4c8] ss:$16 sps:$4 sm:$0xff]  }
 0x19f   :  { %5794 = vmatpush1.bf16.msra.mxu0 %v8610_v27  ;;  %v8673_v27 = vld [vmem:[%s12315_s1 + $0x6c8] ss:$16 sps:$4 sm:$0xff]  }
 0x1a0   :  { %5837 = vmatpush1.bf16.msra.mxu1 %v8613_v28  ;;  %5795 = vmatprep.subr.bf16.mxu0 %v8618_v29  ;;  %v8678_v28 = vld [vmem:[%s12315_s1 + $0x4ac] ss:$16 sps:$4 sm:$0xff]  }
 0x1a1   :  { %5838 = vmatprep.subr.bf16.mxu1 %v8621_v30  ;;  %v8681_v29 = vld [vmem:[%s12315_s1 + $0x6ac] ss:$16 sps:$4 sm:$0xff]   ;;  %v8676_v30 = vld [vmem:[%s12315_s1 + $0x4a8] ss:$16 sps:$4 sm:$0xff]  }
 0x1a3   :  { %5796 = vmatpush2.bf16.msra.mxu0 %v8616_v55  ;;  %v8687_v55 = vld [vmem:[%s12315_s1 + $0x68c] ss:$16 sps:$4 sm:$0xff]  }
 0x1a4   :  { %5839 = vmatpush2.bf16.msra.mxu1 %v8619_v59  ;;  %5797 = vmatprep.subr.bf16.mxu0 %v8624_v37  ;;  %v8682_v59 = vld [vmem:[%s12315_s1 + $0x488] ss:$16 sps:$4 sm:$0xff]   ;;  %v8693_v37 = vld [vmem:[%s12315_s1 + $0x66c] ss:$16 sps:$4 sm:$0xff]  }
 0x1a5   :  { %5840 = vmatprep.subr.bf16.mxu1 %v8627_v43  ;;  %v8688_v43 = vld [vmem:[%s12315_s1 + $0x468] ss:$16 sps:$4 sm:$0xff]  }
 0x1a7   :  { %5798 = vmatpush2.bf16.msra.mxu0 %v8622_v44  ;;  %v8691_v44 = vld [vmem:[%s12315_s1 + $0x668] ss:$16 sps:$4 sm:$0xff]  }
 0x1a8   :  { %5841 = vmatpush2.bf16.msra.mxu1 %v8625_v45  ;;  %5799 = vmatprep.subr.bf16.mxu0 %v8630_v49  ;;  %v8696_v45 = vld [vmem:[%s12315_s1 + $0x44c] ss:$16 sps:$4 sm:$0xff]  }
 0x1a9   :  { %5842 = vmatprep.subr.bf16.mxu1 %v8633_v62  ;;  %v8699_v49 = vld [vmem:[%s12315_s1 + $0x64c] ss:$16 sps:$4 sm:$0xff]   ;;  %v8694_v62 = vld [vmem:[%s12315_s1 + $0x448] ss:$16 sps:$4 sm:$0xff]  }
 0x1ab   :  { %5800 = vmatpush2.bf16.msra.mxu0 %v8628_v5  ;;  %v8697_v5 = vld [vmem:[%s12315_s1 + $0x648] ss:$16 sps:$4 sm:$0xff]  }
 0x1ac   :  { %5843 = vmatpush2.bf16.msra.mxu1 %v8631_v8  ;;  %5801 = vmatprep.subr.bf16.mxu0 %v8636_v12  ;;  %v8702_v8 = vld [vmem:[%s12315_s1 + $0x42c] ss:$16 sps:$4 sm:$0xff]  }
 0x1ad   :  { %5844 = vmatprep.subr.bf16.mxu1 %v8639_v19  ;;  %v8705_v12 = vld [vmem:[%s12315_s1 + $0x62c] ss:$16 sps:$4 sm:$0xff]   ;;  %v8700_v19 = vld [vmem:[%s12315_s1 + $0x428] ss:$16 sps:$4 sm:$0xff]  }
 0x1af   :  { %5802 = vmatpush2.bf16.msra.mxu0 %v8634_v22  ;;  %v8703_v22 = vld [vmem:[%s12315_s1 + $0x628] ss:$16 sps:$4 sm:$0xff]  }
 0x1b0   :  { %5845 = vmatpush2.bf16.msra.mxu1 %v8637_v31  ;;  %5803 = vmatprep.subr.bf16.mxu0 %v8642_v32  ;;  %v8708_v31 = vld [vmem:[%s12315_s1 + $0x40c] ss:$16 sps:$4 sm:$0xff]  }
 0x1b1   :  { %5846 = vmatprep.subr.bf16.mxu1 %v8645_v38  ;;  %v8711_v32 = vld [vmem:[%s12315_s1 + $0x60c] ss:$16 sps:$4 sm:$0xff]   ;;  %v8706_v38 = vld [vmem:[%s12315_s1 + $0x408] ss:$16 sps:$4 sm:$0xff]  }
 0x1b3   :  { %5804 = vmatpush2.bf16.msra.mxu0 %v8640_v40  ;;  %v8709_v40 = vld [vmem:[%s12315_s1 + $0x608] ss:$16 sps:$4 sm:$0xff]  }
 0x1b4   :  { %5847 = vmatpush2.bf16.msra.mxu1 %v8643_v46  ;;  %5805 = vmatprep.subr.bf16.mxu0 %v8648_v47  ;;  %v8714_v46 = vld [vmem:[%s12315_s1 + $0x5ec] ss:$16 sps:$4 sm:$0xff]  }
 0x1b5   :  { %5848 = vmatprep.subr.bf16.mxu1 %v8651_v51  ;;  %v8717_v47 = vld [vmem:[%s12315_s1 + $0x7ec] ss:$16 sps:$4 sm:$0xff]   ;;  %v8712_v51 = vld [vmem:[%s12315_s1 + $0x5e8] ss:$16 sps:$4 sm:$0xff]  }
 0x1b7   :  { %5806 = vmatpush2.bf16.msra.mxu0 %v8646_v53  ;;  %v8715_v53 = vld [vmem:[%s12315_s1 + $0x7e8] ss:$16 sps:$4 sm:$0xff]  }
 0x1b8   :  { %5849 = vmatpush2.bf16.msra.mxu1 %v8649_v18  ;;  %5807 = vmatprep.subr.bf16.mxu0 %v8654_v21  ;;  %v8720_v18 = vld [vmem:[%s12315_s1 + $0x5cc] ss:$16 sps:$4 sm:$0xff]  }
 0x1b9   :  { %5850 = vmatprep.subr.bf16.mxu1 %v8657_v54  ;;  %v8723_v21 = vld [vmem:[%s12315_s1 + $0x7cc] ss:$16 sps:$4 sm:$0xff]   ;;  %v8718_v54 = vld [vmem:[%s12315_s1 + $0x5c8] ss:$16 sps:$4 sm:$0xff]  }
 0x1bb   :  { %5808 = vmatpush2.bf16.msra.mxu0 %v8652_v56  ;;  %v8721_v56 = vld [vmem:[%s12315_s1 + $0x7c8] ss:$16 sps:$4 sm:$0xff]  }
 0x1bc   :  { %5851 = vmatpush2.bf16.msra.mxu1 %v8655_v57  ;;  %5809 = vmatprep.subr.bf16.mxu0 %v8660_v60  ;;  %v8726_v57 = vld [vmem:[%s12315_s1 + $0x5ac] ss:$16 sps:$4 sm:$0xff]  }
 0x1bd   :  { %5852 = vmatprep.subr.bf16.mxu1 %v8663_v33  ;;  %v8729_v60 = vld [vmem:[%s12315_s1 + $0x7ac] ss:$16 sps:$4 sm:$0xff]   ;;  %v8724_v33 = vld [vmem:[%s12315_s1 + $0x5a8] ss:$16 sps:$4 sm:$0xff]  }
 0x1bf   :  { %5810 = vmatpush2.bf16.msra.mxu0 %v8658_v2  ;;  %v8727_v2 = vld [vmem:[%s12315_s1 + $0x7a8] ss:$16 sps:$4 sm:$0xff]  }
 0x1c0   :  { %5853 = vmatpush2.bf16.msra.mxu1 %v8661_v3  ;;  %5865 = vmatprep.subr.bf16.mxu0 %v8666_v9  ;;  %v8732_v3 = vld [vmem:[%s12315_s1 + $0x58c] ss:$16 sps:$4 sm:$0xff]  }
 0x1c1   :  { %5908 = vmatprep.subr.bf16.mxu1 %v8669_v10  ;;  %v8735_v9 = vld [vmem:[%s12315_s1 + $0x78c] ss:$16 sps:$4 sm:$0xff]   ;;  %v8730_v10 = vld [vmem:[%s12315_s1 + $0x588] ss:$16 sps:$4 sm:$0xff]  }
 0x1c2   :  { %5812 = vmatmul.mubr.bf16.vlgmr.msra.gmra.mxu0 %v9487_v34  ;;  %v8679_v34 = vld [vmem:[%s12315_s1 + $0x6a8] ss:$16 sps:$4 sm:$0xff]  }
 0x1c3   :  { %5855 = vmatmul.mubr.bf16.vlgmr.msra.gmra.mxu1 %v9489_v35  ;;  %5866 = vmatpush1.bf16.msra.mxu0 %v8664_v11  ;;  %v8684_v35 = vld [vmem:[%s12315_s1 + $0x48c] ss:$16 sps:$4 sm:$0xff]   ;;  %v8733_v11 = vld [vmem:[%s12315_s1 + $0x788] ss:$16 sps:$4 sm:$0xff]  }
 0x1c4   :  { %5909 = vmatpush1.bf16.msra.mxu1 %v8667_v14  ;;  %5867 = vmatprep.subr.bf16.mxu0 %v8672_v63  ;;  %v8738_v14 = vld [vmem:[%s12315_s1 + $0x56c] ss:$16 sps:$4 sm:$0xff]  }
 0x1c5   :  { %5910 = vmatprep.subr.bf16.mxu1 %v8675_v4  ;;  %5897 = vmatprep.mubr.bf16.mxu0 %v9664_v36  ;;  %v8685_v36 = vld [vmem:[%s12315_s1 + $0x688] ss:$16 sps:$4 sm:$0xff]   ;;  %v8741_v63 = vld [vmem:[%s12315_s1 + $0x76c] ss:$16 sps:$4 sm:$0xff]  }
 0x1c6   :  { %5940 = vmatprep.mubr.bf16.mxu1 %v9672_v39  ;;  %v8690_v39 = vld [vmem:[%s12315_s1 + $0x46c] ss:$16 sps:$4 sm:$0xff]   ;;  %v8736_v4 = vld [vmem:[%s12315_s1 + $0x568] ss:$16 sps:$4 sm:$0xff]  }
 0x1c7   :  { %5868 = vmatpush1.bf16.msra.mxu0 %v8670_v26  ;;  %v8739_v26 = vld [vmem:[%s12315_s1 + $0x768] ss:$16 sps:$4 sm:$0xff]  }
 0x1c8   :  { %5911 = vmatpush1.bf16.msra.mxu1 %v8673_v27  ;;  %5869 = vmatprep.subr.bf16.mxu0 %v8678_v28  ;;  %v8744_v27 = vld [vmem:[%s12315_s1 + $0x54c] ss:$16 sps:$4 sm:$0xff]  }
 0x1c9   :  { %5912 = vmatprep.subr.bf16.mxu1 %v8681_v29  ;;  %v8747_v28 = vld [vmem:[%s12315_s1 + $0x74c] ss:$16 sps:$4 sm:$0xff]   ;;  %v8742_v29 = vld [vmem:[%s12315_s1 + $0x548] ss:$16 sps:$4 sm:$0xff]  }
 0x1cb   :  { %5870 = vmatpush1.bf16.msra.mxu0 %v8676_v30  ;;  %v8745_v30 = vld [vmem:[%s12315_s1 + $0x748] ss:$16 sps:$4 sm:$0xff]  }
 0x1cc   :  { %5913 = vmatpush1.bf16.msra.mxu1 %v8679_v34  ;;  %5871 = vmatprep.subr.bf16.mxu0 %v8684_v35  ;;  %v8750_v34 = vld [vmem:[%s12315_s1 + $0x52c] ss:$16 sps:$4 sm:$0xff]  }
 0x1cd   :  { %5914 = vmatprep.subr.bf16.mxu1 %v8687_v55  ;;  %v8753_v35 = vld [vmem:[%s12315_s1 + $0x72c] ss:$16 sps:$4 sm:$0xff]   ;;  %v8748_v55 = vld [vmem:[%s12315_s1 + $0x528] ss:$16 sps:$4 sm:$0xff]  }
 0x1cf   :  { %5872 = vmatpush1.bf16.msra.mxu0 %v8682_v59  ;;  %v8751_v59 = vld [vmem:[%s12315_s1 + $0x728] ss:$16 sps:$4 sm:$0xff]  }
 0x1d0   :  { %5915 = vmatpush1.bf16.msra.mxu1 %v8685_v36  ;;  %5873 = vmatprep.subr.bf16.mxu0 %v8690_v39  ;;  %v8756_v36 = vld [vmem:[%s12315_s1 + $0x50c] ss:$16 sps:$4 sm:$0xff]  }
 0x1d1   :  { %5916 = vmatprep.subr.bf16.mxu1 %v8693_v37  ;;  %v8759_v39 = vld [vmem:[%s12315_s1 + $0x70c] ss:$16 sps:$4 sm:$0xff]   ;;  %v8754_v37 = vld [vmem:[%s12315_s1 + $0x508] ss:$16 sps:$4 sm:$0xff]  }
 0x1d3   :  { %5874 = vmatpush1.bf16.msra.mxu0 %v8688_v43  ;;  %v8757_v43 = vld [vmem:[%s12315_s1 + $0x708] ss:$16 sps:$4 sm:$0xff]  }
 0x1d4   :  { %5917 = vmatpush1.bf16.msra.mxu1 %v8691_v44  ;;  %5875 = vmatprep.subr.bf16.mxu0 %v8696_v45  ;;  %v8762_v44 = vld [vmem:[%s12315_s1 + $0x8ec] ss:$16 sps:$4 sm:$0xff]  }
 0x1d5   :  { %5918 = vmatprep.subr.bf16.mxu1 %v8699_v49  ;;  %v8765_v45 = vld [vmem:[%s12315_s1 + $0xaec] ss:$16 sps:$4 sm:$0xff]   ;;  %v8760_v49 = vld [vmem:[%s12315_s1 + $0x8e8] ss:$16 sps:$4 sm:$0xff]  }
 0x1d7   :  { %5876 = vmatpush1.bf16.msra.mxu0 %v8694_v62  ;;  %v8763_v62 = vld [vmem:[%s12315_s1 + $0xae8] ss:$16 sps:$4 sm:$0xff]  }
 0x1d8   :  { %5919 = vmatpush1.bf16.msra.mxu1 %v8697_v5  ;;  %5877 = vmatprep.subr.bf16.mxu0 %v8702_v8  ;;  %v8768_v5 = vld [vmem:[%s12315_s1 + $0x8cc] ss:$16 sps:$4 sm:$0xff]  }
 0x1d9   :  { %5920 = vmatprep.subr.bf16.mxu1 %v8705_v12  ;;  %v8771_v8 = vld [vmem:[%s12315_s1 + $0xacc] ss:$16 sps:$4 sm:$0xff]   ;;  %v8766_v12 = vld [vmem:[%s12315_s1 + $0x8c8] ss:$16 sps:$4 sm:$0xff]  }
 0x1db   :  { %5878 = vmatpush1.bf16.msra.mxu0 %v8700_v19  ;;  %v8769_v19 = vld [vmem:[%s12315_s1 + $0xac8] ss:$16 sps:$4 sm:$0xff]  }
 0x1dc   :  { %5921 = vmatpush1.bf16.msra.mxu1 %v8703_v22  ;;  %5879 = vmatprep.subr.bf16.mxu0 %v8708_v31  ;;  %v8774_v22 = vld [vmem:[%s12315_s1 + $0x8ac] ss:$16 sps:$4 sm:$0xff]  }
 0x1dd   :  { %5922 = vmatprep.subr.bf16.mxu1 %v8711_v32  ;;  %v8777_v31 = vld [vmem:[%s12315_s1 + $0xaac] ss:$16 sps:$4 sm:$0xff]   ;;  %v8772_v32 = vld [vmem:[%s12315_s1 + $0x8a8] ss:$16 sps:$4 sm:$0xff]  }
 0x1df   :  { %5880 = vmatpush1.bf16.msra.mxu0 %v8706_v38  ;;  %v8783_v38 = vld [vmem:[%s12315_s1 + $0xa8c] ss:$16 sps:$4 sm:$0xff]  }
 0x1e0   :  { %5923 = vmatpush1.bf16.msra.mxu1 %v8709_v40  ;;  %5881 = vmatprep.subr.bf16.mxu0 %v8714_v46  ;;  %v8786_v40 = vld [vmem:[%s12315_s1 + $0x86c] ss:$16 sps:$4 sm:$0xff]  }
 0x1e1   :  { %5924 = vmatprep.subr.bf16.mxu1 %v8717_v47  ;;  %v8789_v46 = vld [vmem:[%s12315_s1 + $0xa6c] ss:$16 sps:$4 sm:$0xff]   ;;  %v8784_v47 = vld [vmem:[%s12315_s1 + $0x868] ss:$16 sps:$4 sm:$0xff]  }
 0x1e3   :  { %5882 = vmatpush2.bf16.msra.mxu0 %v8712_v51  ;;  %v8787_v51 = vld [vmem:[%s12315_s1 + $0xa68] ss:$16 sps:$4 sm:$0xff]  }
 0x1e4   :  { %5925 = vmatpush2.bf16.msra.mxu1 %v8715_v53  ;;  %5883 = vmatprep.subr.bf16.mxu0 %v8720_v18  ;;  %v8792_v53 = vld [vmem:[%s12315_s1 + $0x84c] ss:$16 sps:$4 sm:$0xff]  }
 0x1e5   :  { %5926 = vmatprep.subr.bf16.mxu1 %v8723_v21  ;;  %v8795_v18 = vld [vmem:[%s12315_s1 + $0xa4c] ss:$16 sps:$4 sm:$0xff]   ;;  %v8790_v21 = vld [vmem:[%s12315_s1 + $0x848] ss:$16 sps:$4 sm:$0xff]  }
 0x1e7   :  { %5884 = vmatpush2.bf16.msra.mxu0 %v8718_v54  ;;  %v8793_v54 = vld [vmem:[%s12315_s1 + $0xa48] ss:$16 sps:$4 sm:$0xff]  }
 0x1e8   :  { %5927 = vmatpush2.bf16.msra.mxu1 %v8721_v56  ;;  %5885 = vmatprep.subr.bf16.mxu0 %v8726_v57  ;;  %v8798_v56 = vld [vmem:[%s12315_s1 + $0x82c] ss:$16 sps:$4 sm:$0xff]  }
 0x1e9   :  { %5928 = vmatprep.subr.bf16.mxu1 %v8729_v60  ;;  %v8801_v57 = vld [vmem:[%s12315_s1 + $0xa2c] ss:$16 sps:$4 sm:$0xff]   ;;  %v8796_v60 = vld [vmem:[%s12315_s1 + $0x828] ss:$16 sps:$4 sm:$0xff]  }
 0x1eb   :  { %5886 = vmatpush2.bf16.msra.mxu0 %v8724_v33  ;;  %v8799_v33 = vld [vmem:[%s12315_s1 + $0xa28] ss:$16 sps:$4 sm:$0xff]  }
 0x1ec   :  { %5929 = vmatpush2.bf16.msra.mxu1 %v8727_v2  ;;  %5887 = vmatprep.subr.bf16.mxu0 %v8732_v3  ;;  %v8804_v2 = vld [vmem:[%s12315_s1 + $0x80c] ss:$16 sps:$4 sm:$0xff]  }
 0x1ed   :  { %5930 = vmatprep.subr.bf16.mxu1 %v8735_v9  ;;  %v8807_v3 = vld [vmem:[%s12315_s1 + $0xa0c] ss:$16 sps:$4 sm:$0xff]   ;;  %v8802_v9 = vld [vmem:[%s12315_s1 + $0x808] ss:$16 sps:$4 sm:$0xff]  }
 0x1ef   :  { %5888 = vmatpush2.bf16.msra.mxu0 %v8730_v10  ;;  %v8805_v10 = vld [vmem:[%s12315_s1 + $0xa08] ss:$16 sps:$4 sm:$0xff]  }
 0x1f0   :  { %5931 = vmatpush2.bf16.msra.mxu1 %v8733_v11  ;;  %5889 = vmatprep.subr.bf16.mxu0 %v8738_v14  ;;  %v8810_v11 = vld [vmem:[%s12315_s1 + $0x9ec] ss:$16 sps:$4 sm:$0xff]  }
 0x1f1   :  { %5932 = vmatprep.subr.bf16.mxu1 %v8741_v63  ;;  %v8813_v14 = vld [vmem:[%s12315_s1 + $0xbec] ss:$16 sps:$4 sm:$0xff]   ;;  %v8808_v63 = vld [vmem:[%s12315_s1 + $0x9e8] ss:$16 sps:$4 sm:$0xff]  }
 0x1f3   :  { %5890 = vmatpush2.bf16.msra.mxu0 %v8736_v4  ;;  %v8811_v4 = vld [vmem:[%s12315_s1 + $0xbe8] ss:$16 sps:$4 sm:$0xff]  }
 0x1f4   :  { %5933 = vmatpush2.bf16.msra.mxu1 %v8739_v26  ;;  %5891 = vmatprep.subr.bf16.mxu0 %v8744_v27  ;;  %v8816_v26 = vld [vmem:[%s12315_s1 + $0x9cc] ss:$16 sps:$4 sm:$0xff]  }
 0x1f5   :  { %5934 = vmatprep.subr.bf16.mxu1 %v8747_v28  ;;  %v8819_v27 = vld [vmem:[%s12315_s1 + $0xbcc] ss:$16 sps:$4 sm:$0xff]   ;;  %v8814_v28 = vld [vmem:[%s12315_s1 + $0x9c8] ss:$16 sps:$4 sm:$0xff]  }
 0x1f7   :  { %5892 = vmatpush2.bf16.msra.mxu0 %v8742_v29  ;;  %v8817_v29 = vld [vmem:[%s12315_s1 + $0xbc8] ss:$16 sps:$4 sm:$0xff]  }
 0x1f8   :  { %5935 = vmatpush2.bf16.msra.mxu1 %v8745_v30  ;;  %5893 = vmatprep.subr.bf16.mxu0 %v8750_v34  ;;  %v8822_v30 = vld [vmem:[%s12315_s1 + $0x9ac] ss:$16 sps:$4 sm:$0xff]  }
 0x1f9   :  { %5936 = vmatprep.subr.bf16.mxu1 %v8753_v35  ;;  %v8825_v34 = vld [vmem:[%s12315_s1 + $0xbac] ss:$16 sps:$4 sm:$0xff]   ;;  %v8820_v35 = vld [vmem:[%s12315_s1 + $0x9a8] ss:$16 sps:$4 sm:$0xff]  }
 0x1fb   :  { %5894 = vmatpush2.bf16.msra.mxu0 %v8748_v55  ;;  %v8823_v55 = vld [vmem:[%s12315_s1 + $0xba8] ss:$16 sps:$4 sm:$0xff]  }
 0x1fc   :  { %5937 = vmatpush2.bf16.msra.mxu1 %v8751_v59  ;;  %5895 = vmatprep.subr.bf16.mxu0 %v8756_v36  ;;  %v8828_v59 = vld [vmem:[%s12315_s1 + $0x98c] ss:$16 sps:$4 sm:$0xff]  }
 0x1fd   :  { %5938 = vmatprep.subr.bf16.mxu1 %v8759_v39  ;;  %v8831_v36 = vld [vmem:[%s12315_s1 + $0xb8c] ss:$16 sps:$4 sm:$0xff]   ;;  %v8826_v39 = vld [vmem:[%s12315_s1 + $0x988] ss:$16 sps:$4 sm:$0xff]  }
 0x1ff   :  { %5896 = vmatpush2.bf16.msra.mxu0 %v8754_v37  ;;  %v8829_v37 = vld [vmem:[%s12315_s1 + $0xb88] ss:$16 sps:$4 sm:$0xff]  }
 0x200   :  { %5939 = vmatpush2.bf16.msra.mxu1 %v8757_v43  ;;  %5951 = vmatprep.subr.bf16.mxu0 %v8762_v44  ;;  %v8834_v43 = vld [vmem:[%s12315_s1 + $0x96c] ss:$16 sps:$4 sm:$0xff]  }
 0x201   :  { %5994 = vmatprep.subr.bf16.mxu1 %v8765_v45  ;;  %v8837_v44 = vld [vmem:[%s12315_s1 + $0xb6c] ss:$16 sps:$4 sm:$0xff]   ;;  %v8832_v45 = vld [vmem:[%s12315_s1 + $0x968] ss:$16 sps:$4 sm:$0xff]  }
 0x202   :  { %5898 = vmatmul.mubr.bf16.vlgmr.msra.gmra.mxu0 %v9755_v6  ;;  %v8775_v6 = vld [vmem:[%s12315_s1 + $0xaa8] ss:$16 sps:$4 sm:$0xff]  }
 0x203   :  { %5941 = vmatmul.mubr.bf16.vlgmr.msra.gmra.mxu1 %v9757_v7  ;;  %5952 = vmatpush1.bf16.msra.mxu0 %v8760_v49  ;;  %v8780_v7 = vld [vmem:[%s12315_s1 + $0x88c] ss:$16 sps:$4 sm:$0xff]   ;;  %v8835_v49 = vld [vmem:[%s12315_s1 + $0xb68] ss:$16 sps:$4 sm:$0xff]  }
 0x204   :  { %5995 = vmatpush1.bf16.msra.mxu1 %v8763_v62  ;;  %5953 = vmatprep.subr.bf16.mxu0 %v8768_v5  ;;  %v8840_v62 = vld [vmem:[%s12315_s1 + $0x94c] ss:$16 sps:$4 sm:$0xff]  }
 0x205   :  { %5996 = vmatprep.subr.bf16.mxu1 %v8771_v8  ;;  %5983 = vmatprep.mubr.bf16.mxu0 %v9884_v58  ;;  %v8778_v58 = vld [vmem:[%s12315_s1 + $0x888] ss:$16 sps:$4 sm:$0xff]   ;;  %v8843_v5 = vld [vmem:[%s12315_s1 + $0xb4c] ss:$16 sps:$4 sm:$0xff]  }
 0x206   :  { %6026 = vmatprep.mubr.bf16.mxu1 %v9892_v61  ;;  %v8781_v61 = vld [vmem:[%s12315_s1 + $0xa88] ss:$16 sps:$4 sm:$0xff]  }
 0x207   :  { %5954 = vmatpush1.bf16.msra.mxu0 %v8766_v12  ;;  %v8838_v8 = vld [vmem:[%s12315_s1 + $0x948] ss:$16 sps:$4 sm:$0xff]  }
 0x208   :  { %5997 = vmatpush1.bf16.msra.mxu1 %v8769_v19  ;;  %5955 = vmatprep.subr.bf16.mxu0 %v8774_v22  ;;  %v8841_v12 = vld [vmem:[%s12315_s1 + $0xb48] ss:$16 sps:$4 sm:$0xff]   ;;  %v8846_v19 = vld [vmem:[%s12315_s1 + $0x92c] ss:$16 sps:$4 sm:$0xff]  }
 0x209   :  { %5998 = vmatprep.subr.bf16.mxu1 %v8777_v31  ;;  %v8849_v22 = vld [vmem:[%s12315_s1 + $0xb2c] ss:$16 sps:$4 sm:$0xff]   ;;  %v8844_v31 = vld [vmem:[%s12315_s1 + $0x928] ss:$16 sps:$4 sm:$0xff]  }
 0x20b   :  { %5956 = vmatpush1.bf16.msra.mxu0 %v8772_v32  ;;  %v8847_v32 = vld [vmem:[%s12315_s1 + $0xb28] ss:$16 sps:$4 sm:$0xff]  }
 0x20c   :  { %5999 = vmatpush1.bf16.msra.mxu1 %v8775_v6  ;;  %5957 = vmatprep.subr.bf16.mxu0 %v8780_v7  ;;  %v8852_v6 = vld [vmem:[%s12315_s1 + $0x90c] ss:$16 sps:$4 sm:$0xff]  }
 0x20d   :  { %6000 = vmatprep.subr.bf16.mxu1 %v8783_v38  ;;  %v8855_v7 = vld [vmem:[%s12315_s1 + $0xb0c] ss:$16 sps:$4 sm:$0xff]   ;;  %v8850_v38 = vld [vmem:[%s12315_s1 + $0x908] ss:$16 sps:$4 sm:$0xff]  }
 0x20f   :  { %5958 = vmatpush1.bf16.msra.mxu0 %v8778_v58  ;;  %v8853_v58 = vld [vmem:[%s12315_s1 + $0xb08] ss:$16 sps:$4 sm:$0xff]  }
 0x210   :  { %6001 = vmatpush1.bf16.msra.mxu1 %v8781_v61  ;;  %5959 = vmatprep.subr.bf16.mxu0 %v8786_v40  ;;  %v8858_v61 = vld [vmem:[%s12315_s1 + $0xcec] ss:$16 sps:$4 sm:$0xff]  }
 0x211   :  { %6002 = vmatprep.subr.bf16.mxu1 %v8789_v46  ;;  %v8861_v40 = vld [vmem:[%s12315_s1 + $0xeec] ss:$16 sps:$4 sm:$0xff]   ;;  %v8856_v46 = vld [vmem:[%s12315_s1 + $0xce8] ss:$16 sps:$4 sm:$0xff]  }
 0x213   :  { %5960 = vmatpush1.bf16.msra.mxu0 %v8784_v47  ;;  %v8859_v47 = vld [vmem:[%s12315_s1 + $0xee8] ss:$16 sps:$4 sm:$0xff]  }
 0x214   :  { %6003 = vmatpush1.bf16.msra.mxu1 %v8787_v51  ;;  %5961 = vmatprep.subr.bf16.mxu0 %v8792_v53  ;;  %v8864_v51 = vld [vmem:[%s12315_s1 + $0xccc] ss:$16 sps:$4 sm:$0xff]  }
 0x215   :  { %6004 = vmatprep.subr.bf16.mxu1 %v8795_v18  ;;  %v8867_v53 = vld [vmem:[%s12315_s1 + $0xecc] ss:$16 sps:$4 sm:$0xff]   ;;  %v8862_v18 = vld [vmem:[%s12315_s1 + $0xcc8] ss:$16 sps:$4 sm:$0xff]  }
 0x217   :  { %5962 = vmatpush1.bf16.msra.mxu0 %v8790_v21  ;;  %v8865_v21 = vld [vmem:[%s12315_s1 + $0xec8] ss:$16 sps:$4 sm:$0xff]  }
 0x218   :  { %6005 = vmatpush1.bf16.msra.mxu1 %v8793_v54  ;;  %5963 = vmatprep.subr.bf16.mxu0 %v8798_v56  ;;  %v8870_v54 = vld [vmem:[%s12315_s1 + $0xcac] ss:$16 sps:$4 sm:$0xff]   ;;  %v8871_v56 = vld [vmem:[%s12315_s1 + $0xea8] ss:$16 sps:$4 sm:$0xff]  }
 0x219   :  { %6006 = vmatprep.subr.bf16.mxu1 %v8801_v57  ;;  %v8876_v57 = vld [vmem:[%s12315_s1 + $0xc8c] ss:$16 sps:$4 sm:$0xff]  }
 0x21b   :  { %5964 = vmatpush1.bf16.msra.mxu0 %v8796_v60  ;;  %v8877_v60 = vld [vmem:[%s12315_s1 + $0xe88] ss:$16 sps:$4 sm:$0xff]  }
 0x21c   :  { %6007 = vmatpush1.bf16.msra.mxu1 %v8799_v33  ;;  %5965 = vmatprep.subr.bf16.mxu0 %v8804_v2  ;;  %v8882_v33 = vld [vmem:[%s12315_s1 + $0xc6c] ss:$16 sps:$4 sm:$0xff]  }
 0x21d   :  { %6008 = vmatprep.subr.bf16.mxu1 %v8807_v3  ;;  %v8885_v2 = vld [vmem:[%s12315_s1 + $0xe6c] ss:$16 sps:$4 sm:$0xff]   ;;  %v8880_v3 = vld [vmem:[%s12315_s1 + $0xc68] ss:$16 sps:$4 sm:$0xff]  }
 0x21f   :  { %5966 = vmatpush1.bf16.msra.mxu0 %v8802_v9  ;;  %v8883_v9 = vld [vmem:[%s12315_s1 + $0xe68] ss:$16 sps:$4 sm:$0xff]  }
 0x220   :  { %6009 = vmatpush1.bf16.msra.mxu1 %v8805_v10  ;;  %5967 = vmatprep.subr.bf16.mxu0 %v8810_v11  ;;  %v8888_v10 = vld [vmem:[%s12315_s1 + $0xc4c] ss:$16 sps:$4 sm:$0xff]  }
 0x221   :  { %6010 = vmatprep.subr.bf16.mxu1 %v8813_v14  ;;  %v8891_v11 = vld [vmem:[%s12315_s1 + $0xe4c] ss:$16 sps:$4 sm:$0xff]   ;;  %v8886_v14 = vld [vmem:[%s12315_s1 + $0xc48] ss:$16 sps:$4 sm:$0xff]  }
 0x223   :  { %5968 = vmatpush2.bf16.msra.mxu0 %v8808_v63  ;;  %v8889_v63 = vld [vmem:[%s12315_s1 + $0xe48] ss:$16 sps:$4 sm:$0xff]  }
 0x224   :  { %6011 = vmatpush2.bf16.msra.mxu1 %v8811_v4  ;;  %5969 = vmatprep.subr.bf16.mxu0 %v8816_v26  ;;  %v8894_v4 = vld [vmem:[%s12315_s1 + $0xc2c] ss:$16 sps:$4 sm:$0xff]  }
 0x225   :  { %6012 = vmatprep.subr.bf16.mxu1 %v8819_v27  ;;  %v8897_v26 = vld [vmem:[%s12315_s1 + $0xe2c] ss:$16 sps:$4 sm:$0xff]   ;;  %v8892_v27 = vld [vmem:[%s12315_s1 + $0xc28] ss:$16 sps:$4 sm:$0xff]  }
 0x227   :  { %5970 = vmatpush2.bf16.msra.mxu0 %v8814_v28  ;;  %v8895_v28 = vld [vmem:[%s12315_s1 + $0xe28] ss:$16 sps:$4 sm:$0xff]  }
 0x228   :  { %6013 = vmatpush2.bf16.msra.mxu1 %v8817_v29  ;;  %5971 = vmatprep.subr.bf16.mxu0 %v8822_v30  ;;  %v8900_v29 = vld [vmem:[%s12315_s1 + $0xc0c] ss:$16 sps:$4 sm:$0xff]  }
 0x229   :  { %6014 = vmatprep.subr.bf16.mxu1 %v8825_v34  ;;  %v8903_v30 = vld [vmem:[%s12315_s1 + $0xe0c] ss:$16 sps:$4 sm:$0xff]   ;;  %v8898_v34 = vld [vmem:[%s12315_s1 + $0xc08] ss:$16 sps:$4 sm:$0xff]  }
 0x22b   :  { %5972 = vmatpush2.bf16.msra.mxu0 %v8820_v35  ;;  %v8901_v35 = vld [vmem:[%s12315_s1 + $0xe08] ss:$16 sps:$4 sm:$0xff]  }
 0x22c   :  { %6015 = vmatpush2.bf16.msra.mxu1 %v8823_v55  ;;  %5973 = vmatprep.subr.bf16.mxu0 %v8828_v59  ;;  %v8906_v55 = vld [vmem:[%s12315_s1 + $0xdec] ss:$16 sps:$4 sm:$0xff]  }
 0x22d   :  { %6016 = vmatprep.subr.bf16.mxu1 %v8831_v36  ;;  %v8909_v59 = vld [vmem:[%s12315_s1 + $0xfec] ss:$16 sps:$4 sm:$0xff]   ;;  %v8904_v36 = vld [vmem:[%s12315_s1 + $0xde8] ss:$16 sps:$4 sm:$0xff]  }
 0x22f   :  { %5974 = vmatpush2.bf16.msra.mxu0 %v8826_v39  ;;  %v8907_v39 = vld [vmem:[%s12315_s1 + $0xfe8] ss:$16 sps:$4 sm:$0xff]  }
 0x230   :  { %6017 = vmatpush2.bf16.msra.mxu1 %v8829_v37  ;;  %5975 = vmatprep.subr.bf16.mxu0 %v8834_v43  ;;  %v8912_v37 = vld [vmem:[%s12315_s1 + $0xdcc] ss:$16 sps:$4 sm:$0xff]  }
 0x231   :  { %6018 = vmatprep.subr.bf16.mxu1 %v8837_v44  ;;  %v8915_v43 = vld [vmem:[%s12315_s1 + $0xfcc] ss:$16 sps:$4 sm:$0xff]   ;;  %v8910_v44 = vld [vmem:[%s12315_s1 + $0xdc8] ss:$16 sps:$4 sm:$0xff]  }
 0x233   :  { %5976 = vmatpush2.bf16.msra.mxu0 %v8832_v45  ;;  %v8913_v45 = vld [vmem:[%s12315_s1 + $0xfc8] ss:$16 sps:$4 sm:$0xff]  }
 0x234   :  { %6019 = vmatpush2.bf16.msra.mxu1 %v8835_v49  ;;  %5977 = vmatprep.subr.bf16.mxu0 %v8840_v62  ;;  %v8918_v49 = vld [vmem:[%s12315_s1 + $0xdac] ss:$16 sps:$4 sm:$0xff]  }
 0x235   :  { %6020 = vmatprep.subr.bf16.mxu1 %v8843_v5  ;;  %v8921_v62 = vld [vmem:[%s12315_s1 + $0xfac] ss:$16 sps:$4 sm:$0xff]   ;;  %v8916_v5 = vld [vmem:[%s12315_s1 + $0xda8] ss:$16 sps:$4 sm:$0xff]  }
 0x237   :  { %5978 = vmatpush2.bf16.msra.mxu0 %v8838_v8  ;;  %v8919_v8 = vld [vmem:[%s12315_s1 + $0xfa8] ss:$16 sps:$4 sm:$0xff]  }
 0x238   :  { %6021 = vmatpush2.bf16.msra.mxu1 %v8841_v12  ;;  %5979 = vmatprep.subr.bf16.mxu0 %v8846_v19  ;;  %v8924_v12 = vld [vmem:[%s12315_s1 + $0xd8c] ss:$16 sps:$4 sm:$0xff]  }
 0x239   :  { %6022 = vmatprep.subr.bf16.mxu1 %v8849_v22  ;;  %v8927_v19 = vld [vmem:[%s12315_s1 + $0xf8c] ss:$16 sps:$4 sm:$0xff]   ;;  %v8922_v22 = vld [vmem:[%s12315_s1 + $0xd88] ss:$16 sps:$4 sm:$0xff]  }
 0x23b   :  { %5980 = vmatpush2.bf16.msra.mxu0 %v8844_v31  ;;  %v8925_v31 = vld [vmem:[%s12315_s1 + $0xf88] ss:$16 sps:$4 sm:$0xff]  }
 0x23c   :  { %6023 = vmatpush2.bf16.msra.mxu1 %v8847_v32  ;;  %5981 = vmatprep.subr.bf16.mxu0 %v8852_v6  ;;  %v8930_v32 = vld [vmem:[%s12315_s1 + $0xd6c] ss:$16 sps:$4 sm:$0xff]  }
 0x23d   :  { %6024 = vmatprep.subr.bf16.mxu1 %v8855_v7  ;;  %v8933_v6 = vld [vmem:[%s12315_s1 + $0xf6c] ss:$16 sps:$4 sm:$0xff]   ;;  %v8928_v7 = vld [vmem:[%s12315_s1 + $0xd68] ss:$16 sps:$4 sm:$0xff]  }
 0x23f   :  { %5982 = vmatpush2.bf16.msra.mxu0 %v8850_v38  ;;  %v8931_v38 = vld [vmem:[%s12315_s1 + $0xf68] ss:$16 sps:$4 sm:$0xff]  }
 0x240   :  { %6025 = vmatpush2.bf16.msra.mxu1 %v8853_v58  ;;  %6037 = vmatprep.subr.bf16.mxu0 %v8858_v61  ;;  %v8936_v58 = vld [vmem:[%s12315_s1 + $0xd4c] ss:$16 sps:$4 sm:$0xff]  }
 0x241   :  { %6080 = vmatprep.subr.bf16.mxu1 %v8861_v40  ;;  %v8939_v61 = vld [vmem:[%s12315_s1 + $0xf4c] ss:$16 sps:$4 sm:$0xff]   ;;  %v8934_v40 = vld [vmem:[%s12315_s1 + $0xd48] ss:$16 sps:$4 sm:$0xff]  }
 0x242   :  { %5984 = vmatmul.mubr.bf16.vlgmr.msra.gmra.mxu0 %v10041_v50  ;;  %v8873_v50 = vld [vmem:[%s12315_s1 + $0xeac] ss:$16 sps:$4 sm:$0xff]  }
 0x243   :  { %6027 = vmatmul.mubr.bf16.vlgmr.msra.gmra.mxu1 %v10043_v52  ;;  %6038 = vmatpush1.bf16.msra.mxu0 %v8856_v46  ;;  %v8868_v52 = vld [vmem:[%s12315_s1 + $0xca8] ss:$16 sps:$4 sm:$0xff]  }
 0x244   :  { %6081 = vmatpush1.bf16.msra.mxu1 %v8859_v47  ;;  %6039 = vmatprep.subr.bf16.mxu0 %v8864_v51  ;;  %v8937_v46 = vld [vmem:[%s12315_s1 + $0xf48] ss:$16 sps:$4 sm:$0xff]   ;;  %v8942_v47 = vld [vmem:[%s12315_s1 + $0xd2c] ss:$16 sps:$4 sm:$0xff]  }
 0x245   :  { %6082 = vmatprep.subr.bf16.mxu1 %v8867_v53  ;;  %6069 = vmatprep.mubr.bf16.mxu0 %v10101_v20  ;;  %v8879_v20 = vld [vmem:[%s12315_s1 + $0xe8c] ss:$16 sps:$4 sm:$0xff]   ;;  %v8940_v53 = vld [vmem:[%s12315_s1 + $0xd28] ss:$16 sps:$4 sm:$0xff]  }
 0x246   :  { %6112 = vmatprep.mubr.bf16.mxu1 %v10112_v25  ;;  %v8874_v25 = vld [vmem:[%s12315_s1 + $0xc88] ss:$16 sps:$4 sm:$0xff]   ;;  %v8945_v51 = vld [vmem:[%s12315_s1 + $0xf2c] ss:$16 sps:$4 sm:$0xff]  }
 0x247   :  { %6040 = vmatpush1.bf16.msra.mxu0 %v8862_v18  ;;  %v8943_v18 = vld [vmem:[%s12315_s1 + $0xf28] ss:$16 sps:$4 sm:$0xff]  }
 0x248   :  { %6083 = vmatpush1.bf16.msra.mxu1 %v8865_v21  ;;  %6041 = vmatprep.subr.bf16.mxu0 %v8870_v54  ;;  %v8948_v21 = vld [vmem:[%s12315_s1 + $0xd0c] ss:$16 sps:$4 sm:$0xff]  }
 0x249   :  { %6084 = vmatprep.subr.bf16.mxu1 %v8873_v50  ;;  %v8951_v54 = vld [vmem:[%s12315_s1 + $0xf0c] ss:$16 sps:$4 sm:$0xff]   ;;  %v8946_v50 = vld [vmem:[%s12315_s1 + $0xd08] ss:$16 sps:$4 sm:$0xff]  }
 0x24b   :  { %6042 = vmatpush1.bf16.msra.mxu0 %v8868_v52  ;;  %v8949_v52 = vld [vmem:[%s12315_s1 + $0xf08] ss:$16 sps:$4 sm:$0xff]  }
 0x24c   :  { %6085 = vmatpush1.bf16.msra.mxu1 %v8871_v56  ;;  %6043 = vmatprep.subr.bf16.mxu0 %v8876_v57  ;;  %v8954_v56 = vld [vmem:[%s12315_s1 + $0x10ec] ss:$16 sps:$4 sm:$0xff]  }
 0x24d   :  { %6086 = vmatprep.subr.bf16.mxu1 %v8879_v20  ;;  %v8957_v57 = vld [vmem:[%s12315_s1 + $0x12ec] ss:$16 sps:$4 sm:$0xff]   ;;  %v8952_v20 = vld [vmem:[%s12315_s1 + $0x10e8] ss:$16 sps:$4 sm:$0xff]  }
 0x24f   :  { %6044 = vmatpush1.bf16.msra.mxu0 %v8874_v25  ;;  %v8955_v25 = vld [vmem:[%s12315_s1 + $0x12e8] ss:$16 sps:$4 sm:$0xff]  }
 0x250   :  { %6087 = vmatpush1.bf16.msra.mxu1 %v8877_v60  ;;  %6045 = vmatprep.subr.bf16.mxu0 %v8882_v33  ;;  %v8960_v60 = vld [vmem:[%s12315_s1 + $0x10cc] ss:$16 sps:$4 sm:$0xff]  }
 0x251   :  { %6088 = vmatprep.subr.bf16.mxu1 %v8885_v2  ;;  %v8963_v33 = vld [vmem:[%s12315_s1 + $0x12cc] ss:$16 sps:$4 sm:$0xff]   ;;  %v8958_v2 = vld [vmem:[%s12315_s1 + $0x10c8] ss:$16 sps:$4 sm:$0xff]  }
 0x253   :  { %6046 = vmatpush1.bf16.msra.mxu0 %v8880_v3  ;;  %v8961_v3 = vld [vmem:[%s12315_s1 + $0x12c8] ss:$16 sps:$4 sm:$0xff]  }
 0x254   :  { %6089 = vmatpush1.bf16.msra.mxu1 %v8883_v9  ;;  %6047 = vmatprep.subr.bf16.mxu0 %v8888_v10  ;;  %v8966_v9 = vld [vmem:[%s12315_s1 + $0x10ac] ss:$16 sps:$4 sm:$0xff]   ;;  %v8967_v10 = vld [vmem:[%s12315_s1 + $0x12a8] ss:$16 sps:$4 sm:$0xff]  }
 0x255   :  { %6090 = vmatprep.subr.bf16.mxu1 %v8891_v11  ;;  %v8972_v11 = vld [vmem:[%s12315_s1 + $0x108c] ss:$16 sps:$4 sm:$0xff]  }
 0x257   :  { %6048 = vmatpush1.bf16.msra.mxu0 %v8886_v14  ;;  %v8973_v14 = vld [vmem:[%s12315_s1 + $0x1288] ss:$16 sps:$4 sm:$0xff]  }
 0x258   :  { %6091 = vmatpush1.bf16.msra.mxu1 %v8889_v63  ;;  %6049 = vmatprep.subr.bf16.mxu0 %v8894_v4  ;;  %v8978_v63 = vld [vmem:[%s12315_s1 + $0x106c] ss:$16 sps:$4 sm:$0xff]  }
 0x259   :  { %6092 = vmatprep.subr.bf16.mxu1 %v8897_v26  ;;  %v8981_v4 = vld [vmem:[%s12315_s1 + $0x126c] ss:$16 sps:$4 sm:$0xff]   ;;  %v8976_v26 = vld [vmem:[%s12315_s1 + $0x1068] ss:$16 sps:$4 sm:$0xff]  }
 0x25b   :  { %6050 = vmatpush1.bf16.msra.mxu0 %v8892_v27  ;;  %v8979_v27 = vld [vmem:[%s12315_s1 + $0x1268] ss:$16 sps:$4 sm:$0xff]  }
 0x25c   :  { %6093 = vmatpush1.bf16.msra.mxu1 %v8895_v28  ;;  %6051 = vmatprep.subr.bf16.mxu0 %v8900_v29  ;;  %v8984_v28 = vld [vmem:[%s12315_s1 + $0x104c] ss:$16 sps:$4 sm:$0xff]  }
 0x25d   :  { %6094 = vmatprep.subr.bf16.mxu1 %v8903_v30  ;;  %v8987_v29 = vld [vmem:[%s12315_s1 + $0x124c] ss:$16 sps:$4 sm:$0xff]   ;;  %v8982_v30 = vld [vmem:[%s12315_s1 + $0x1048] ss:$16 sps:$4 sm:$0xff]  }
 0x25f   :  { %6052 = vmatpush1.bf16.msra.mxu0 %v8898_v34  ;;  %v8985_v34 = vld [vmem:[%s12315_s1 + $0x1248] ss:$16 sps:$4 sm:$0xff]  }
 0x260   :  { %6095 = vmatpush1.bf16.msra.mxu1 %v8901_v35  ;;  %6053 = vmatprep.subr.bf16.mxu0 %v8906_v55  ;;  %v8990_v35 = vld [vmem:[%s12315_s1 + $0x102c] ss:$16 sps:$4 sm:$0xff]  }
 0x261   :  { %6096 = vmatprep.subr.bf16.mxu1 %v8909_v59  ;;  %v8993_v55 = vld [vmem:[%s12315_s1 + $0x122c] ss:$16 sps:$4 sm:$0xff]   ;;  %v8988_v59 = vld [vmem:[%s12315_s1 + $0x1028] ss:$16 sps:$4 sm:$0xff]  }
 0x263   :  { %6054 = vmatpush2.bf16.msra.mxu0 %v8904_v36  ;;  %v8991_v36 = vld [vmem:[%s12315_s1 + $0x1228] ss:$16 sps:$4 sm:$0xff]  }
 0x264   :  { %6097 = vmatpush2.bf16.msra.mxu1 %v8907_v39  ;;  %6055 = vmatprep.subr.bf16.mxu0 %v8912_v37  ;;  %v8996_v39 = vld [vmem:[%s12315_s1 + $0x100c] ss:$16 sps:$4 sm:$0xff]  }
 0x265   :  { %6098 = vmatprep.subr.bf16.mxu1 %v8915_v43  ;;  %v8999_v37 = vld [vmem:[%s12315_s1 + $0x120c] ss:$16 sps:$4 sm:$0xff]   ;;  %v8994_v43 = vld [vmem:[%s12315_s1 + $0x1008] ss:$16 sps:$4 sm:$0xff]  }
 0x267   :  { %6056 = vmatpush2.bf16.msra.mxu0 %v8910_v44  ;;  %v8997_v44 = vld [vmem:[%s12315_s1 + $0x1208] ss:$16 sps:$4 sm:$0xff]  }
 0x268   :  { %6099 = vmatpush2.bf16.msra.mxu1 %v8913_v45  ;;  %6057 = vmatprep.subr.bf16.mxu0 %v8918_v49  ;;  %v9002_v45 = vld [vmem:[%s12315_s1 + $0x11ec] ss:$16 sps:$4 sm:$0xff]  }
 0x269   :  { %6100 = vmatprep.subr.bf16.mxu1 %v8921_v62  ;;  %v9005_v49 = vld [vmem:[%s12315_s1 + $0x13ec] ss:$16 sps:$4 sm:$0xff]   ;;  %v9000_v62 = vld [vmem:[%s12315_s1 + $0x11e8] ss:$16 sps:$4 sm:$0xff]  }
 0x26b   :  { %6058 = vmatpush2.bf16.msra.mxu0 %v8916_v5  ;;  %v9003_v5 = vld [vmem:[%s12315_s1 + $0x13e8] ss:$16 sps:$4 sm:$0xff]  }
 0x26c   :  { %6101 = vmatpush2.bf16.msra.mxu1 %v8919_v8  ;;  %6059 = vmatprep.subr.bf16.mxu0 %v8924_v12  ;;  %v11721_v8 = vpop.f32.mrf.mxu0  ;;  %v9008_v12 = vld [vmem:[%s12315_s1 + $0x11cc] ss:$16 sps:$4 sm:$0xff]  }
 0x26d   :  { %6102 = vmatprep.subr.bf16.mxu1 %v8927_v19  ;;  %v9011_v19 = vld [vmem:[%s12315_s1 + $0x13cc] ss:$16 sps:$4 sm:$0xff]  }
 0x26f   :  { %6060 = vmatpush2.bf16.msra.mxu0 %v8922_v22  ;;  %v9006_v22 = vld [vmem:[%s12315_s1 + $0x11c8] ss:$16 sps:$4 sm:$0xff]  }
 0x270   :  { %6103 = vmatpush2.bf16.msra.mxu1 %v8925_v31  ;;  %6061 = vmatprep.subr.bf16.mxu0 %v8930_v32  ;;  %v9009_v31 = vld [vmem:[%s12315_s1 + $0x13c8] ss:$16 sps:$4 sm:$0xff]   ;;  %v11735_v32 = vpop.f32.mrf.mxu0 }
 0x271   :  { %6104 = vmatprep.subr.bf16.mxu1 %v8933_v6  ;;  %v9014_v6 = vld [vmem:[%s12315_s1 + $0x11ac] ss:$16 sps:$4 sm:$0xff]  }
 0x273   :  { %6062 = vmatpush2.bf16.msra.mxu0 %v8928_v7  ;;  %v9017_v7 = vld [vmem:[%s12315_s1 + $0x13ac] ss:$16 sps:$4 sm:$0xff]  }
 0x274   :  { %6105 = vmatpush2.bf16.msra.mxu1 %v8931_v38  ;;  %6063 = vmatprep.subr.bf16.mxu0 %v8936_v58  ;;  %v11743_v38 = vpop.f32.mrf.mxu1  ;;  %v9012_v58 = vld [vmem:[%s12315_s1 + $0x11a8] ss:$16 sps:$4 sm:$0xff]  }
 0x275   :  { %6106 = vmatprep.subr.bf16.mxu1 %v8939_v61  ;;  %v9015_v61 = vld [vmem:[%s12315_s1 + $0x13a8] ss:$16 sps:$4 sm:$0xff]  }
 0x277   :  { %6064 = vmatpush2.bf16.msra.mxu0 %v8934_v40  ;;  %v11751_v40 = vpop.f32.mrf.mxu0 }
 0x278   :  { %6107 = vmatpush2.bf16.msra.mxu1 %v8937_v46  ;;  %6065 = vmatprep.subr.bf16.mxu0 %v8942_v47  ;;  %v9020_v46 = vld [vmem:[%s12315_s1 + $0x118c] ss:$16 sps:$4 sm:$0xff]  }
 0x279   :  { %6108 = vmatprep.subr.bf16.mxu1 %v8945_v51  ;;  %v9023_v47 = vld [vmem:[%s12315_s1 + $0x138c] ss:$16 sps:$4 sm:$0xff]   ;;  %v11759_v51 = vpop.f32.mrf.mxu1 }
 0x27b   :  { %6066 = vmatpush2.bf16.msra.mxu0 %v8940_v53  ;;  %v9018_v53 = vld [vmem:[%s12315_s1 + $0x1188] ss:$16 sps:$4 sm:$0xff]  }
 0x27c   :  { %6109 = vmatpush2.bf16.msra.mxu1 %v8943_v18  ;;  %6067 = vmatprep.subr.bf16.mxu0 %v8948_v21  ;;  %v9021_v18 = vld [vmem:[%s12315_s1 + $0x1388] ss:$16 sps:$4 sm:$0xff]   ;;  %v11767_v21 = vpop.f32.mrf.mxu0 }
 0x27d   :  { %6110 = vmatprep.subr.bf16.mxu1 %v8951_v54  ;;  %v9026_v54 = vld [vmem:[%s12315_s1 + $0x116c] ss:$16 sps:$4 sm:$0xff]  }
 0x27f   :  { %6068 = vmatpush2.bf16.msra.mxu0 %v8946_v50  ;;  %v9029_v50 = vld [vmem:[%s12315_s1 + $0x136c] ss:$16 sps:$4 sm:$0xff]  }
 0x280   :  { %6111 = vmatpush2.bf16.msra.mxu1 %v8949_v52  ;;  %6123 = vmatprep.subr.bf16.mxu0 %v8954_v56  ;;  %v11775_v52 = vpop.f32.mrf.mxu1  ;;  %v11777_v56 = vpop.f32.mrf.mxu0 }
 0x281   :  { %6166 = vmatprep.subr.bf16.mxu1 %v8957_v57  ;;  %v9024_v57 = vld [vmem:[%s12315_s1 + $0x1168] ss:$16 sps:$4 sm:$0xff]  }
 0x282   :  { %6070 = vmatmul.mubr.bf16.vlgmr.msra.gmra.mxu0 %v10347_v13  ;;  %v8969_v13 = vld [vmem:[%s12315_s1 + $0x12ac] ss:$16 sps:$4 sm:$0xff]  }
 0x283   :  { %6113 = vmatmul.mubr.bf16.vlgmr.msra.gmra.mxu1 %v10349_v15  ;;  %6124 = vmatpush1.bf16.msra.mxu0 %v8952_v20  ;;  %v8964_v15 = vld [vmem:[%s12315_s1 + $0x10a8] ss:$16 sps:$4 sm:$0xff]  }
 0x284   :  { %6167 = vmatpush1.bf16.msra.mxu1 %v8955_v25  ;;  %6125 = vmatprep.subr.bf16.mxu0 %v8960_v60  ;;  %v9027_v20 = vld [vmem:[%s12315_s1 + $0x1368] ss:$16 sps:$4 sm:$0xff]   ;;  %v9032_v25 = vld [vmem:[%s12315_s1 + $0x114c] ss:$16 sps:$4 sm:$0xff]  }
 0x285   :  { %6168 = vmatprep.subr.bf16.mxu1 %v8963_v33  ;;  %6155 = vmatprep.mubr.bf16.mxu0 %v10363_v23  ;;  %v8975_v23 = vld [vmem:[%s12315_s1 + $0x128c] ss:$16 sps:$4 sm:$0xff]   ;;  %v11791_v33 = vpop.f32.mrf.mxu1 }
 0x286   :  { %6198 = vmatprep.mubr.bf16.mxu1 %v10365_v24  ;;  %v8970_v24 = vld [vmem:[%s12315_s1 + $0x1088] ss:$16 sps:$4 sm:$0xff]   ;;  %v9035_v60 = vld [vmem:[%s12315_s1 + $0x134c] ss:$16 sps:$4 sm:$0xff]  }
 0x287   :  { %6126 = vmatpush1.bf16.msra.mxu0 %v8958_v2  ;;  %v11793_v2 = vpop.f32.mrf.mxu0 }
 0x288   :  { %6169 = vmatpush1.bf16.msra.mxu1 %v8961_v3  ;;  %6127 = vmatprep.subr.bf16.mxu0 %v8966_v9  ;;  %v9030_v3 = vld [vmem:[%s12315_s1 + $0x1148] ss:$16 sps:$4 sm:$0xff]  }
 0x289   :  { %6170 = vmatprep.subr.bf16.mxu1 %v8969_v13  ;;  %v9033_v9 = vld [vmem:[%s12315_s1 + $0x1348] ss:$16 sps:$4 sm:$0xff]   ;;  %v11801_v13 = vpop.f32.mrf.mxu1 }
 0x28b   :  { %6128 = vmatpush1.bf16.msra.mxu0 %v8964_v15  ;;  %v9038_v15 = vld [vmem:[%s12315_s1 + $0x112c] ss:$16 sps:$4 sm:$0xff]  }
 0x28c   :  { %6171 = vmatpush1.bf16.msra.mxu1 %v8967_v10  ;;  %6129 = vmatprep.subr.bf16.mxu0 %v8972_v11  ;;  %v9041_v10 = vld [vmem:[%s12315_s1 + $0x132c] ss:$16 sps:$4 sm:$0xff]   ;;  %v11809_v11 = vpop.f32.mrf.mxu0 }
 0x28d   :  { %6172 = vmatprep.subr.bf16.mxu1 %v8975_v23  ;;  %v9036_v23 = vld [vmem:[%s12315_s1 + $0x1128] ss:$16 sps:$4 sm:$0xff]  }
 0x28f   :  { %6130 = vmatpush1.bf16.msra.mxu0 %v8970_v24  ;;  %v9039_v24 = vld [vmem:[%s12315_s1 + $0x1328] ss:$16 sps:$4 sm:$0xff]  }
 0x290   :  { %6173 = vmatpush1.bf16.msra.mxu1 %v8973_v14  ;;  %6131 = vmatprep.subr.bf16.mxu0 %v8978_v63  ;;  %v11817_v14 = vpop.f32.mrf.mxu1  ;;  %v9044_v63 = vld [vmem:[%s12315_s1 + $0x110c] ss:$16 sps:$4 sm:$0xff]  }
 0x291   :  { %6174 = vmatprep.subr.bf16.mxu1 %v8981_v4  ;;  %v9047_v4 = vld [vmem:[%s12315_s1 + $0x130c] ss:$16 sps:$4 sm:$0xff]  }
 0x293   :  { %6132 = vmatpush1.bf16.msra.mxu0 %v8976_v26  ;;  %v11825_v26 = vpop.f32.mrf.mxu0 }
 0x294   :  { %6175 = vmatpush1.bf16.msra.mxu1 %v8979_v27  ;;  %6133 = vmatprep.subr.bf16.mxu0 %v8984_v28  ;;  %v9042_v27 = vld [vmem:[%s12315_s1 + $0x1108] ss:$16 sps:$4 sm:$0xff]  }
 0x295   :  { %6176 = vmatprep.subr.bf16.mxu1 %v8987_v29  ;;  %v9045_v28 = vld [vmem:[%s12315_s1 + $0x1308] ss:$16 sps:$4 sm:$0xff]   ;;  %v11833_v29 = vpop.f32.mrf.mxu1 }
 0x297   :  { %6134 = vmatpush1.bf16.msra.mxu0 %v8982_v30  ;;  %v11835_v30 = vpop.f32.mrf.mxu0 }
 0x298   :  { %6177 = vmatpush1.bf16.msra.mxu1 %v8985_v34  ;;  %6135 = vmatprep.subr.bf16.mxu0 %v8990_v35  ;;  %v9050_v34 = vld [vmem:[%s12315_s1 + $0x14ec] ss:$16 sps:$4 sm:$0xff]  }
 0x299   :  { %6178 = vmatprep.subr.bf16.mxu1 %v8993_v55  ;;  %v9053_v35 = vld [vmem:[%s12315_s1 + $0x16ec] ss:$16 sps:$4 sm:$0xff]   ;;  %v9048_v55 = vld [vmem:[%s12315_s1 + $0x14e8] ss:$16 sps:$4 sm:$0xff]  }
 0x29b   :  { %6136 = vmatpush1.bf16.msra.mxu0 %v8988_v59  ;;  %v9051_v59 = vld [vmem:[%s12315_s1 + $0x16e8] ss:$16 sps:$4 sm:$0xff]  }
 0x29c   :  { %6179 = vmatpush1.bf16.msra.mxu1 %v8991_v36  ;;  %6137 = vmatprep.subr.bf16.mxu0 %v8996_v39  ;;  %v11849_v36 = vpop.f32.mrf.mxu1  ;;  %v11851_v39 = vpop.f32.mrf.mxu0 }
 0x29d   :  { %6180 = vmatprep.subr.bf16.mxu1 %v8999_v37  ;;  %v9056_v37 = vld [vmem:[%s12315_s1 + $0x14cc] ss:$16 sps:$4 sm:$0xff]  }
 0x29f   :  { %6138 = vmatpush1.bf16.msra.mxu0 %v8994_v43  ;;  %v9059_v43 = vld [vmem:[%s12315_s1 + $0x16cc] ss:$16 sps:$4 sm:$0xff]  }
 0x2a0   :  { %6181 = vmatpush1.bf16.msra.mxu1 %v8997_v44  ;;  %6139 = vmatprep.subr.bf16.mxu0 %v9002_v45  ;;  %v11859_v44 = vpop.f32.mrf.mxu1  ;;  %v9054_v45 = vld [vmem:[%s12315_s1 + $0x14c8] ss:$16 sps:$4 sm:$0xff]  }
 0x2a1   :  { %6182 = vmatprep.subr.bf16.mxu1 %v9005_v49  ;;  %v9057_v49 = vld [vmem:[%s12315_s1 + $0x16c8] ss:$16 sps:$4 sm:$0xff]  }
 0x2a3   :  { %6140 = vmatpush2.bf16.msra.mxu0 %v9000_v62  ;;  %v11869_v62 = vpop.f32.mrf.mxu0 }
 0x2a4   :  { %6183 = vmatpush2.bf16.msra.mxu1 %v9003_v5  ;;  %6141 = vmatprep.subr.bf16.mxu0 %v9008_v12  ;;  %v11879_v5 = vpop.f32.mrf.mxu1  ;;  %v9060_v12 = vld [vmem:[%s12315_s1 + $0x14a8] ss:$16 sps:$4 sm:$0xff]  }
 0x2a5   :  { %6184 = vmatprep.subr.bf16.mxu1 %v9011_v19  ;;  %v9063_v19 = vld [vmem:[%s12315_s1 + $0x16a8] ss:$16 sps:$4 sm:$0xff]  }
 0x2a7   :  { %6142 = vmatpush2.bf16.msra.mxu0 %v9006_v22  ;;  %v11887_v22 = vpop.f32.mrf.mxu0 }
 0x2a8   :  { %6185 = vmatpush2.bf16.msra.mxu1 %v9009_v31  ;;  %6143 = vmatprep.subr.bf16.mxu0 %v9014_v6  ;;  %v11895_v31 = vpop.f32.mrf.mxu1 }
 0x2a9   :  { %6186 = vmatprep.subr.bf16.mxu1 %v9017_v7  ;;  %v11897_v6 = vpop.f32.mrf.mxu0  ;;  %v9066_v7 = vld [vmem:[%s12315_s1 + $0x1488] ss:$16 sps:$4 sm:$0xff]  }
 0x2ab   :  { %6144 = vmatpush2.bf16.msra.mxu0 %v9012_v58  ;;  %v9069_v58 = vld [vmem:[%s12315_s1 + $0x1688] ss:$16 sps:$4 sm:$0xff]  }
 0x2ac   :  { %6187 = vmatpush2.bf16.msra.mxu1 %v9015_v61  ;;  %6145 = vmatprep.subr.bf16.mxu0 %v9020_v46  ;;  %v9074_v61 = vld [vmem:[%s12315_s1 + $0x146c] ss:$16 sps:$4 sm:$0xff]  }
 0x2ad   :  { %6188 = vmatprep.subr.bf16.mxu1 %v9023_v47  ;;  %v9077_v46 = vld [vmem:[%s12315_s1 + $0x166c] ss:$16 sps:$4 sm:$0xff]   ;;  %v11911_v47 = vpop.f32.mrf.mxu1 }
 0x2af   :  { %6146 = vmatpush2.bf16.msra.mxu0 %v9018_v53  ;;  %v11913_v53 = vpop.f32.mrf.mxu0 }
 0x2b0   :  { %6189 = vmatpush2.bf16.msra.mxu1 %v9021_v18  ;;  %6147 = vmatprep.subr.bf16.mxu0 %v9026_v54  ;;  %v9072_v18 = vld [vmem:[%s12315_s1 + $0x1468] ss:$16 sps:$4 sm:$0xff]  }
 0x2b1   :  { %6190 = vmatprep.subr.bf16.mxu1 %v9029_v50  ;;  %v9075_v54 = vld [vmem:[%s12315_s1 + $0x1668] ss:$16 sps:$4 sm:$0xff]   ;;  %v11921_v50 = vpop.f32.mrf.mxu1 }
 0x2b3   :  { %6148 = vmatpush2.bf16.msra.mxu0 %v9024_v57  ;;  %v9080_v57 = vld [vmem:[%s12315_s1 + $0x144c] ss:$16 sps:$4 sm:$0xff]  }
 0x2b4   :  { %6191 = vmatpush2.bf16.msra.mxu1 %v9027_v20  ;;  %6149 = vmatprep.subr.bf16.mxu0 %v9032_v25  ;;  %v9083_v20 = vld [vmem:[%s12315_s1 + $0x164c] ss:$16 sps:$4 sm:$0xff]   ;;  %v1409_v25 = vsub.s32 1, %v9378_v48 }
 0x2b5   :  { %6192 = vmatprep.subr.bf16.mxu1 %v9035_v60  ;;  %v11933_v60 = vld [vmem:[%s12316_s2] sm:$0xf] }
 0x2b7   :  { %6150 = vmatpush2.bf16.msra.mxu0 %v9030_v3  ;;  %v11935_v3 = vpop.f32.mrf.mxu0 }
 0x2b8   :  { %6193 = vmatpush2.bf16.msra.mxu1 %v9033_v9  ;;  %6151 = vmatprep.subr.bf16.mxu0 %v9038_v15  ;;  %v9078_v9 = vld [vmem:[%s12315_s1 + $0x1448] ss:$16 sps:$4 sm:$0xff]  }
 0x2b9   :  { %6194 = vmatprep.subr.bf16.mxu1 %v9041_v10  ;;  %v9081_v15 = vld [vmem:[%s12315_s1 + $0x1648] ss:$16 sps:$4 sm:$0xff]   ;;  %v11943_v10 = vpop.f32.mrf.mxu1 }
 0x2bb   :  { %6152 = vmatpush2.bf16.msra.mxu0 %v9036_v23  ;;  %v9086_v23 = vld [vmem:[%s12315_s1 + $0x142c] ss:$16 sps:$4 sm:$0xff]  }
 0x2bc   :  { %6195 = vmatpush2.bf16.msra.mxu1 %v9039_v24  ;;  %6153 = vmatprep.subr.bf16.mxu0 %v9044_v63  ;;  %v9089_v24 = vld [vmem:[%s12315_s1 + $0x162c] ss:$16 sps:$4 sm:$0xff]   ;;  %v1410_v63 = vrot.slane %v11933_v60, %v1409_v25 }
 0x2bd   :  { %6196 = vmatprep.subr.bf16.mxu1 %v9047_v4  ;;  %v11952_v4 = vpop.f32.mrf.mxu0 }
 0x2bf   :  { %6154 = vmatpush2.bf16.msra.mxu0 %v9042_v27  ;;  %v5304_v27 = vadd.f32 %v11767_v21, %v1410_v63  ;;  %v9092_v21 = vld [vmem:[%s12315_s1 + $0x140c] ss:$16 sps:$4 sm:$0xff]  }
 0x2c0   :  { %6197 = vmatpush2.bf16.msra.mxu1 %v9045_v28  ;;  %6209 = vmatprep.subr.bf16.mxu0 %v9050_v34  ;;  %v9084_v28 = vld [vmem:[%s12315_s1 + $0x1428] ss:$16 sps:$4 sm:$0xff]  }
 0x2c1   :  { %6252 = vmatprep.subr.bf16.mxu1 %v9053_v35  ;;  %v9087_v34 = vld [vmem:[%s12315_s1 + $0x1628] ss:$16 sps:$4 sm:$0xff]   ;;  %v11961_v35 = vpop.f32.mrf.mxu1 }
 0x2c2   :  { %6156 = vmatmul.mubr.bf16.vlgmr.msra.gmra.mxu0 %v10615_v0  ;;  %v9062_v0 = vld [vmem:[%s12315_s1 + $0x14ac] ss:$16 sps:$4 sm:$0xff]  }
 0x2c3   :  { %6199 = vmatmul.mubr.bf16.vlgmr.msra.gmra.mxu1 %v10617_v1  ;;  %6210 = vmatpush1.bf16.msra.mxu0 %v9048_v55  ;;  %v9065_v1 = vld [vmem:[%s12315_s1 + $0x16ac] ss:$16 sps:$4 sm:$0xff]   ;;  %v11963_v55 = vpop.f32.mrf.mxu0 }
 0x2c4   :  { %6253 = vmatpush1.bf16.msra.mxu1 %v9051_v59  ;;  %6211 = vmatprep.subr.bf16.mxu0 %v9056_v37  ;;  %v9095_v59 = vld [vmem:[%s12315_s1 + $0x160c] ss:$16 sps:$4 sm:$0xff]   ;;  %v5300_v37 = vadd.f32 %v11735_v32, %v1410_v63  ;;  %v9111_v63 = vld [vmem:[%s12315_s1 + $0x17a8] ss:$16 sps:$4 sm:$0xff]  }
 0x2c5   :  { %6254 = vmatprep.subr.bf16.mxu1 %v9059_v43  ;;  %6241 = vmatprep.mubr.bf16.mxu0 %v10631_v41  ;;  %v9068_v41 = vld [vmem:[%s12315_s1 + $0x148c] ss:$16 sps:$4 sm:$0xff]   ;;  %v5347_v43 = vadd.f32 %v11791_v33, %v5304_v27 }
 0x2c6   :  { %6284 = vmatprep.mubr.bf16.mxu1 %v10633_v42  ;;  %v9071_v42 = vld [vmem:[%s12315_s1 + $0x168c] ss:$16 sps:$4 sm:$0xff]  }
 0x2c7   :  { %6212 = vmatpush1.bf16.msra.mxu0 %v9054_v45  ;;  %v9090_v45 = vld [vmem:[%s12315_s1 + $0x1408] ss:$16 sps:$4 sm:$0xff]   ;;  %v9098_v32 = vld [vmem:[%s12315_s1 + $0x15ec] ss:$16 sps:$4 sm:$0xff]  }
 0x2c8   :  { %6255 = vmatpush1.bf16.msra.mxu1 %v9057_v49  ;;  %6213 = vmatprep.subr.bf16.mxu0 %v9062_v0  ;;  %v9093_v49 = vld [vmem:[%s12315_s1 + $0x1608] ss:$16 sps:$4 sm:$0xff]   ;;  %v5604_v0 = vpop.f32.mrf.mxu1  ;;  %v9101_v33 = vld [vmem:[%s12315_s1 + $0x17ec] ss:$16 sps:$4 sm:$0xff]  }
 0x2c9   :  { %6256 = vmatprep.subr.bf16.mxu1 %v9065_v1  ;;  %v11979_v1 = vpop.f32.mrf.mxu0 }
 0x2cb   :  { %6214 = vmatpush1.bf16.msra.mxu0 %v9060_v12  ;;  %v5343_v12 = vadd.f32 %v11759_v51, %v5300_v37  ;;  %v9104_v51 = vld [vmem:[%s12315_s1 + $0x15cc] ss:$16 sps:$4 sm:$0xff]   ;;  %v9114_v37 = vld [vmem:[%s12315_s1 + $0x1588] ss:$16 sps:$4 sm:$0xff]  }
 0x2cc   :  { %6257 = vmatpush1.bf16.msra.mxu1 %v9063_v19  ;;  %6215 = vmatprep.subr.bf16.mxu0 %v9068_v41  ;;  %v5390_v19 = vadd.f32 %v11825_v26, %v5347_v43  ;;  %v11989_v41 = vpop.f32.mrf.mxu1  ;;  %v9117_v43 = vld [vmem:[%s12315_s1 + $0x1788] ss:$16 sps:$4 sm:$0xff]  }
 0x2cd   :  { %6258 = vmatprep.subr.bf16.mxu1 %v9071_v42  ;;  %v5386_v42 = vadd.f32 %v11793_v2, %v5343_v12  ;;  %v9107_v2 = vld [vmem:[%s12315_s1 + $0x17cc] ss:$16 sps:$4 sm:$0xff]   ;;  %v9120_v12 = vld [vmem:[%s12315_s1 + $0x1568] ss:$16 sps:$4 sm:$0xff]  }
 0x2ce   :  { %v5433_v26 = vadd.f32 %v11849_v36, %v5390_v19  ;;  %v9110_v36 = vld [vmem:[%s12315_s1 + $0x15ac] ss:$16 sps:$4 sm:$0xff]   ;;  %v9123_v19 = vld [vmem:[%s12315_s1 + $0x1768] ss:$16 sps:$4 sm:$0xff]  }
 0x2cf   :  { %6216 = vmatpush1.bf16.msra.mxu0 %v9066_v7  ;;  %v9096_v7 = vld [vmem:[%s12315_s1 + $0x15e8] ss:$16 sps:$4 sm:$0xff]  }
 0x2d0   :  { %6259 = vmatpush1.bf16.msra.mxu1 %v9069_v58  ;;  %6217 = vmatprep.subr.bf16.mxu0 %v9074_v61  ;;  %v9099_v58 = vld [vmem:[%s12315_s1 + $0x17e8] ss:$16 sps:$4 sm:$0xff]   ;;  %v11998_v61 = vpop.f32.mrf.mxu0 }
 0x2d1   :  { %6260 = vmatprep.subr.bf16.mxu1 %v9077_v46  ;;  %v12007_v46 = vpop.f32.mrf.mxu1 }
 0x2d2   :  { %v5647_v25 = vpop.f32.mrf.mxu0 }
 0x2d3   :  { %6218 = vmatpush1.bf16.msra.mxu0 %v9072_v18  ;;  %v5429_v18 = vadd.f32 %v11817_v14, %v5386_v42  ;;  %v9113_v14 = vld [vmem:[%s12315_s1 + $0x17ac] ss:$16 sps:$4 sm:$0xff]   ;;  %v1405_v42 = vsub.s32 0, %v9378_v48 }
 0x2d4   :  { %6261 = vmatpush1.bf16.msra.mxu1 %v9075_v54  ;;  %6219 = vmatprep.subr.bf16.mxu0 %v9080_v57  ;;  %v5476_v54 = vadd.f32 %v11887_v22, %v5433_v26  ;;  %v9102_v57 = vld [vmem:[%s12315_s1 + $0x15c8] ss:$16 sps:$4 sm:$0xff]  }
 0x2d5   :  { %6262 = vmatprep.subr.bf16.mxu1 %v9083_v20  ;;  %v9105_v20 = vld [vmem:[%s12315_s1 + $0x17c8] ss:$16 sps:$4 sm:$0xff]   ;;  %v5472_v22 = vadd.f32 %v11851_v39, %v5429_v18  ;;  %v9116_v39 = vld [vmem:[%s12315_s1 + $0x158c] ss:$16 sps:$4 sm:$0xff]  }
 0x2d6   :  { %v9126_v26 = vld [vmem:[%s12315_s1 + $0x1548] ss:$16 sps:$4 sm:$0xff]  }
 0x2d7   :  { %6220 = vmatpush1.bf16.msra.mxu0 %v9078_v9  ;;  %v12024_v9 = vpop.f32.mrf.mxu1  ;;  %v5515_v27 = vadd.f32 %v11879_v5, %v5472_v22  ;;  %v9122_v5 = vld [vmem:[%s12315_s1 + $0x156c] ss:$16 sps:$4 sm:$0xff]   ;;  %v9129_v18 = vld [vmem:[%s12315_s1 + $0x1748] ss:$16 sps:$4 sm:$0xff]  }
 0x2d8   :  { %6263 = vmatpush1.bf16.msra.mxu1 %v9081_v15  ;;  %6221 = vmatprep.subr.bf16.mxu0 %v9086_v23  ;;  %v12026_v15 = vpop.f32.mrf.mxu0  ;;  %v5519_v23 = vadd.f32 %v11911_v47, %v5476_v54  ;;  %v9119_v47 = vld [vmem:[%s12315_s1 + $0x178c] ss:$16 sps:$4 sm:$0xff]   ;;  %v1406_v54 = vrot.slane %v11933_v60, %v1405_v42 }
 0x2d9   :  { %6264 = vmatprep.subr.bf16.mxu1 %v9089_v24  ;;  %v9108_v24 = vld [vmem:[%s12315_s1 + $0x15a8] ss:$16 sps:$4 sm:$0xff]  }
 0x2da   :  { %v9160_v42 = vld [vmem:[%s12317_s3 + $0xf8] sm:$0xff]  }
 0x2db   :  { %6222 = vmatpush1.bf16.msra.mxu0 %v9084_v28  ;;  %v5562_v28 = vadd.f32 %v11952_v4, %v5519_v23  ;;  %v9132_v23 = vld [vmem:[%s12315_s1 + $0x1528] ss:$16 sps:$4 sm:$0xff]  }
 0x2dc   :  { %6265 = vmatpush1.bf16.msra.mxu1 %v9087_v34  ;;  %6223 = vmatprep.subr.bf16.mxu0 %v9092_v21  ;;  %v5690_v34 = vpop.f32.mrf.mxu1  ;;  %v5729_v21 = vpop.f32.mrf.mxu0 }
 0x2dd   :  { %6266 = vmatprep.subr.bf16.mxu1 %v9095_v59  ;;  %v5558_v59 = vadd.f32 %v11913_v53, %v5515_v27  ;;  %v9125_v53 = vld [vmem:[%s12315_s1 + $0x176c] ss:$16 sps:$4 sm:$0xff]   ;;  %v5605_v4 = vadd.f32 %v5604_v0, %v5562_v28 }
 0x2de   :  { %v9131_v0 = vld [vmem:[%s12315_s1 + $0x174c] ss:$16 sps:$4 sm:$0xff]  }
 0x2df   :  { %6224 = vmatpush1.bf16.msra.mxu0 %v9090_v45  ;;  %v12050_v45 = vpop.f32.mrf.mxu1 }
 0x2e0   :  { %6267 = vmatpush1.bf16.msra.mxu1 %v9093_v49  ;;  %6225 = vmatprep.subr.bf16.mxu0 %v9098_v32  ;;  %v12058_v49 = vpop.f32.mrf.mxu0  ;;  %v5601_v32 = vadd.f32 %v11943_v10, %v5558_v59  ;;  %v9128_v10 = vld [vmem:[%s12315_s1 + $0x154c] ss:$16 sps:$4 sm:$0xff]  }
 0x2e1   :  { %6268 = vmatprep.subr.bf16.mxu1 %v9101_v33  ;;  %v5648_v33 = vadd.f32 %v5647_v25, %v5605_v4 }
 0x2e3   :  { %6226 = vmatpush2.bf16.msra.mxu0 %v9096_v7  ;;  %v5772_v7 = vpop.f32.mrf.mxu1 }
 0x2e4   :  { %6269 = vmatpush2.bf16.msra.mxu1 %v9099_v58  ;;  %6227 = vmatprep.subr.bf16.mxu0 %v9104_v51  ;;  %v5644_v58 = vadd.f32 %v11979_v1, %v5601_v32  ;;  %v5733_v51 = vpop.f32.mrf.mxu0  ;;  %v9134_v1 = vld [vmem:[%s12315_s1 + $0x152c] ss:$16 sps:$4 sm:$0xff]  }
 0x2e5   :  { %6270 = vmatprep.subr.bf16.mxu1 %v9107_v2  ;;  %v5691_v2 = vadd.f32 %v5690_v34, %v5648_v33  ;;  %v9141_v34 = vld [vmem:[%s12315_s1 + $0x1708] ss:$16 sps:$4 sm:$0xff]  }
 0x2e6   :  { %v5687_v25 = vadd.f32 %v12007_v46, %v5644_v58  ;;  %v9143_v46 = vld [vmem:[%s12315_s1 + $0x170c] ss:$16 sps:$4 sm:$0xff]   ;;  %v9163_v58 = vld [vmem:[%s12317_s3 + $0xb0] sm:$0xff]  }
 0x2e7   :  { %6228 = vmatpush2.bf16.msra.mxu0 %v9102_v57  ;;  %v12082_v57 = vpop.f32.mrf.mxu1 }
 0x2e8   :  { %6271 = vmatpush2.bf16.msra.mxu1 %v9105_v20  ;;  %6229 = vmatprep.subr.bf16.mxu0 %v9110_v36  ;;  %v9137_v20 = vld [vmem:[%s12315_s1 + $0x172c] ss:$16 sps:$4 sm:$0xff]   ;;  %v5734_v36 = vadd.f32 %v5733_v51, %v5691_v2  ;;  %v5730_v22 = vadd.f32 %v5729_v21, %v5687_v25  ;;  %v9167_v25 = vld [vmem:[%s12317_s3 + $0xa0] sm:$0xff]  }
 0x2e9   :  { %6272 = vmatprep.subr.bf16.mxu1 %v9113_v14  ;;  %v5302_v14 = vadd.f32 %v11751_v40, %v1406_v54  ;;  %v9140_v40 = vld [vmem:[%s12315_s1 + $0x150c] ss:$16 sps:$4 sm:$0xff]  }
 0x2ea   :  { %v5773_v28 = vadd.f32 %v5772_v7, %v5730_v22  ;;  %v9164_v51 = vld [vmem:[%s12317_s3 + $0xe8] sm:$0xff]  }
 0x2eb   :  { %6230 = vmatpush2.bf16.msra.mxu0 %v9108_v24  ;;  %v9135_v24 = vld [vmem:[%s12315_s1 + $0x1728] ss:$16 sps:$4 sm:$0xff]   ;;  %v5345_v27 = vadd.f32 %v11775_v52, %v5302_v14  ;;  %v9159_v14 = vld [vmem:[%s12317_s3] sm:$0xff]  }
 0x2ec   :  { %6273 = vmatpush2.bf16.msra.mxu1 %v9111_v63  ;;  %6231 = vmatprep.subr.bf16.mxu0 %v9116_v39  ;;  %v5298_v63 = vadd.f32 %v11721_v8, %v1406_v54  ;;  %v5776_v39 = vpop.f32.mrf.mxu1  ;;  %v9138_v8 = vld [vmem:[%s12315_s1 + $0x1508] ss:$16 sps:$4 sm:$0xff]  }
 0x2ed   :  { %6274 = vmatprep.subr.bf16.mxu1 %v9119_v47  ;;  %v5777_v47 = vadd.f32 %v5776_v39, %v5734_v36  ;;  %v5388_v59 = vadd.f32 %v11809_v11, %v5345_v27  ;;  %v9144_v52 = vld [vmem:[%s12317_s3 + $0x78] sm:$0xff]   ;;  %v9146_v11 = vld [vmem:[%s12317_s3 + $0x70] sm:$0xff]   ;;  %v9157_v36 = vld [vmem:[%s12317_s3 + $0x8] sm:$0xff]  }
 0x2ee   :  { %v5341_v21 = vadd.f32 %v11743_v38, %v5298_v63  ;;  %v9170_v63 = vld [vmem:[%s12317_s3 + $0xd0] sm:$0xff]   ;;  %v9175_v27 = vld [vmem:[%s12317_s3 + $0x80] sm:$0xff]  }
 0x2ef   :  { %6232 = vmatpush2.bf16.msra.mxu0 %v9114_v37  ;;  %v6300_v37 = vmax.f32 %v5777_v47, 0.0  ;;  %v5431_v38 = vadd.f32 %v11833_v29, %v5388_v59  ;;  %v9171_v39 = vld [vmem:[%s12317_s3 + $0x90] sm:$0xff]   ;;  %v9174_v47 = vld [vmem:[%s12317_s3 + $0xc0] sm:$0xff]  }
 0x2f0   :  { %6275 = vmatpush2.bf16.msra.mxu1 %v9117_v43  ;;  %6233 = vmatprep.subr.bf16.mxu0 %v9122_v5  ;;  %v5384_v43 = vadd.f32 %v11777_v56, %v5341_v21  ;;  %v6296_v5 = vmax.f32 %v5773_v28, 0.0  ;;  %v9147_v56 = vld [vmem:[%s12317_s3 + $0x30] sm:$0xff]   ;;  %v9176_v28 = vld [vmem:[%s12319_s5 + $0x38] sm:$0xff]   ;;  %v9178_v21 = vld [vmem:[%s12319_s5 + $0x28] sm:$0xff]  }
 0x2f1   :  { %6276 = vmatprep.subr.bf16.mxu1 %v9125_v53  ;;  %v9145_v53 = vld [vmem:[%s12317_s3 + $0x38] sm:$0xff]   ;;  %v5474_v33 = vadd.f32 %v11869_v62, %v5431_v38  ;;  %v9179_v59 = vld [vmem:[%s12319_s5 + $0x20] sm:$0xff]  }
 0x2f2   :  { %v6304_v4 = vpack.c.bf16 %v6300_v37, %v6296_v5  ;;  %v5427_v32 = vadd.f32 %v11801_v13, %v5384_v43  ;;  %v5856_v37 = vpop.f32.mrf.mxu1 }
 0x2f3   :  { %6234 = vmatpush2.bf16.msra.mxu0 %v9120_v12  ;;  %v9148_v12 = vld [vmem:[%s12317_s3 + $0x68] sm:$0xff]   ;;  %v5517_v13 = vadd.f32 %v11895_v31, %v5474_v33  ;;  %v9151_v31 = vld [vmem:[%s12317_s3 + $0x20] sm:$0xff]  }
 0x2f4   :  { %6277 = vmatpush2.bf16.msra.mxu1 %v9123_v19  ;;  %6235 = vmatprep.subr.bf16.mxu0 %v9128_v10  ;;  %v5470_v29 = vadd.f32 %v11835_v30, %v5427_v32  ;;  %v9150_v30 = vld [vmem:[%s12317_s3 + $0x60] sm:$0xff]   ;;  %v5858_v5 = vpop.f32.mrf.mxu1 }
 0x2f5   :  { %6278 = vmatprep.subr.bf16.mxu1 %v9131_v0  ;;  %v5560_v62 = vadd.f32 %v11935_v3, %v5517_v13  ;;  %v9162_v3 = vld [vmem:[%s12317_s3 + $0xf0] sm:$0xff]  }
 0x2f6   :  { %v5860_v38 = vpop.f32.mrf.mxu1 }
 0x2f7   :  { %6236 = vmatpush2.bf16.msra.mxu0 %v9126_v26  ;;  %v5603_v7 = vadd.f32 %v11961_v35, %v5560_v62  ;;  %v9153_v35 = vld [vmem:[%s12317_s3 + $0x18] sm:$0xff]   ;;  %v9165_v26 = vld [vmem:[%s12317_s3 + $0xa8] sm:$0xff]  }
 0x2f8   :  { %6279 = vmatpush2.bf16.msra.mxu1 %v9129_v18  ;;  %6237 = vmatprep.subr.bf16.mxu0 %v9134_v1  ;;  %v9155_v18 = vld [vmem:[%s12317_s3 + $0x10] sm:$0xff]  }
 0x2f9   :  { %6280 = vmatprep.subr.bf16.mxu1 %v9137_v20  ;;  %v5646_v0 = vadd.f32 %v11998_v61, %v5603_v7 }
 0x2fb   :  { %6238 = vmatpush2.bf16.msra.mxu0 %v9132_v23  ;;  %v5689_v61 = vadd.f32 %v12024_v9, %v5646_v0  ;;  %v9156_v9 = vld [vmem:[%s12317_s3 + $0x48] sm:$0xff]  }
 0x2fc   :  { %6281 = vmatpush2.bf16.msra.mxu1 %v9135_v24  ;;  %6239 = vmatprep.subr.bf16.mxu0 %v9140_v40  ;;  %v9172_v40 = vld [vmem:[%s12317_s3 + $0xc8] sm:$0xff]  }
 0x2fd   :  { %6282 = vmatprep.subr.bf16.mxu1 %v9143_v46  ;;  %v5732_v1 = vadd.f32 %v12058_v49, %v5689_v61  ;;  %v9158_v49 = vld [vmem:[%s12317_s3 + $0x40] sm:$0xff]   ;;  %v9173_v46 = vld [vmem:[%s12317_s3 + $0x88] sm:$0xff]  }
 0x2ff   :  { %6240 = vmatpush2.bf16.msra.mxu0 %v9138_v8  ;;  %v9193_v8 = vmov 0.0  }
 0x300   :  { %6283 = vmatpush2.bf16.msra.mxu1 %v9141_v34  ;;  %7814 = vmatprep.subr.bf16.mxu0 %v9144_v52  ;;  %v9177_v34 = vld [vmem:[%s12319_s5 + $0x30] sm:$0xff]   ;;  %v5813_v52 = vpop.f32.mrf.mxu0 }
 0x301   :  { %7836 = vmatprep.subr.bf16.mxu1 %v9160_v42  ;;  %v1417_v42 = vsub.s32 3, %v9378_v48 }
 0x302   :  { %6242 = vmatmul.mubr.bf16.vlgmr.msra.gmra.mxu0 %v10833_v16  ;;  %v9149_v16 = vld [vmem:[%s12317_s3 + $0x28] sm:$0xff]   ;;  %v5815_v43 = vpop.f32.mrf.mxu0 }
 0x303   :  { %6285 = vmatmul.mubr.bf16.vlgmr.msra.gmra.mxu1 %v10835_v17  ;;  %7815 = vmatpush3.bf16.msra.mxu0 %v9145_v53  ;;  %v5513_v17 = vadd.f32 %v11859_v44, %v5470_v29  ;;  %v9161_v44 = vld [vmem:[%s12317_s3 + $0xb8] sm:$0xff]  }
 0x304   :  { %6602 = vmatprep.mubr.bf16.mxu0 %v6304_v4  ;;  %7816 = vmatprep.subr.bf16.mxu0 %v9146_v11  ;;  %v5817_v53 = vpop.f32.mrf.mxu0  ;;  %v5862_v4 = vpop.f32.mrf.mxu1 }
 0x305   :  { %v5556_v19 = vadd.f32 %v11897_v6, %v5513_v17  ;;  %v9152_v6 = vld [vmem:[%s12317_s3 + $0x58] sm:$0xff]   ;;  %7837 = vmatpush3.bf16.msra.mxu1 %v9161_v44  ;;  %v1413_v44 = vsub.s32 2, %v9378_v48 }
 0x306   :  { %7838 = vmatprep.subr.bf16.mxu1 %v9162_v3  ;;  %v5819_v11 = vpop.f32.mrf.mxu0  ;;  %v5942_v33 = vpop.f32.mrf.mxu1 }
 0x307   :  { %7817 = vmatpush3.bf16.msra.mxu0 %v9147_v56  ;;  %v5599_v10 = vadd.f32 %v11921_v50, %v5556_v19  ;;  %v9154_v50 = vld [vmem:[%s12317_s3 + $0x50] sm:$0xff]  }
 0x308   :  { %7818 = vmatprep.subr.bf16.mxu0 %v9148_v12  ;;  %v5899_v32 = vpop.f32.mrf.mxu0  ;;  %v5944_v29 = vpop.f32.mrf.mxu1 }
 0x309   :  { %v5642_v2 = vadd.f32 %v11963_v55, %v5599_v10  ;;  %7839 = vmatpush3.bf16.msra.mxu1 %v9163_v58  ;;  %v9166_v55 = vld [vmem:[%s12317_s3 + $0xe0] sm:$0xff]   ;;  %v1414_v10 = vrot.slane %v11933_v60, %v1413_v44 }
 0x30a   :  { %7840 = vmatprep.subr.bf16.mxu1 %v9164_v51  ;;  %v5901_v56 = vpop.f32.mrf.mxu0  ;;  %v5946_v13 = vpop.f32.mrf.mxu1 }
 0x30b   :  { %7819 = vmatpush3.bf16.msra.mxu0 %v9149_v16  ;;  %v5685_v54 = vadd.f32 %v11989_v41, %v5642_v2  ;;  %v5775_v41 = vadd.f32 %v12082_v57, %v5732_v1  ;;  %v9168_v57 = vld [vmem:[%s12317_s3 + $0xd8] sm:$0xff]   ;;  %v5818_v61 = vadd.f32 %v5817_v53, %v1414_v10 }
 0x30c   :  { %7820 = vmatprep.subr.bf16.mxu0 %v9150_v30  ;;  %v5903_v12 = vpop.f32.mrf.mxu0  ;;  %v5948_v17 = vpop.f32.mrf.mxu1 }
 0x30d   :  { %v5728_v20 = vadd.f32 %v12026_v15, %v5685_v54  ;;  %7841 = vmatpush3.bf16.msra.mxu1 %v9165_v26  ;;  %v6299_v22 = vmax.f32 %v5775_v41, 0.0 }
 0x30e   :  { %7842 = vmatprep.subr.bf16.mxu1 %v9166_v55  ;;  %v5905_v16 = vpop.f32.mrf.mxu0  ;;  %v6028_v30 = vpop.f32.mrf.mxu1 }
 0x30f   :  { %7821 = vmatpush3.bf16.msra.mxu0 %v9151_v31  ;;  %v5771_v15 = vadd.f32 %v12050_v45, %v5728_v20  ;;  %v9169_v45 = vld [vmem:[%s12317_s3 + $0x98] sm:$0xff]  }
 0x310   :  { %7822 = vmatprep.subr.bf16.mxu0 %v9152_v6  ;;  %v5985_v62 = vpop.f32.mrf.mxu0  ;;  %v6030_v31 = vpop.f32.mrf.mxu1  ;;  %v1418_v6 = vrot.slane %v11933_v60, %v1417_v42 }
 0x311   :  { %7843 = vmatpush3.bf16.msra.mxu1 %v9167_v25  ;;  %v6295_v23 = vmax.f32 %v5771_v15, 0.0 }
 0x312   :  { %7844 = vmatprep.subr.bf16.mxu1 %v9168_v57  ;;  %v5987_v19 = vpop.f32.mrf.mxu0  ;;  %v6032_v7 = vpop.f32.mrf.mxu1  ;;  %v5816_v2 = vadd.f32 %v5815_v43, %v1418_v6  ;;  %v5820_v54 = vadd.f32 %v5819_v11, %v1418_v6 }
 0x313   :  { %7823 = vmatpush3.bf16.msra.mxu0 %v9153_v35  ;;  %v6303_v24 = vpack.c.bf16 %v6299_v22, %v6295_v23 }
 0x314   :  { %7824 = vmatprep.subr.bf16.mxu0 %v9154_v50  ;;  %v5989_v3 = vpop.f32.mrf.mxu0  ;;  %v6034_v58 = vpop.f32.mrf.mxu1  ;;  %v5814_v50 = vadd.f32 %v5813_v52, %v1414_v10  ;;  %v5859_v55 = vadd.f32 %v5858_v5, %v5816_v2 }
 0x315   :  { %7845 = vmatpush3.bf16.msra.mxu1 %v9169_v45 }
 0x316   :  { %7846 = vmatprep.subr.bf16.mxu1 %v9170_v63  ;;  %v5991_v0 = vpop.f32.mrf.mxu0  ;;  %v5857_v1 = vadd.f32 %v5856_v37, %v5814_v50  ;;  %v5902_v20 = vadd.f32 %v5901_v56, %v5859_v55 }
 0x317   :  { %7825 = vmatpush3.bf16.msra.mxu0 %v9155_v18 }
 0x318   :  { %7826 = vmatprep.subr.bf16.mxu0 %v9156_v9  ;;  %v5861_v9 = vadd.f32 %v5860_v38, %v5818_v61  ;;  %v5900_v25 = vadd.f32 %v5899_v32, %v5857_v1  ;;  %v5945_v60 = vadd.f32 %v5944_v29, %v5902_v20 }
 0x319   :  { %7847 = vmatpush3.bf16.msra.mxu1 %v9171_v39 }
 0x31a   :  { %7848 = vmatprep.subr.bf16.mxu1 %v9172_v40  ;;  %v5904_v15 = vadd.f32 %v5903_v12, %v5861_v9  ;;  %v5943_v22 = vadd.f32 %v5942_v33, %v5900_v25  ;;  %v5988_v45 = vadd.f32 %v5987_v19, %v5945_v60  ;;  %v9181_v60 = vld [vmem:[%s12319_s5 + $0x10] sm:$0xff]  }
 0x31b   :  { %7827 = vmatpush3.bf16.msra.mxu0 %v9157_v36 }
 0x31c   :  { %7828 = vmatprep.subr.bf16.mxu0 %v9158_v49  ;;  %v5863_v49 = vadd.f32 %v5862_v4, %v5820_v54  ;;  %v5947_v57 = vadd.f32 %v5946_v13, %v5904_v15  ;;  %v5986_v63 = vadd.f32 %v5985_v62, %v5943_v22  ;;  %v9180_v15 = vld [vmem:[%s12319_s5 + $0x18] sm:$0xff]   ;;  %v9183_v22 = vld [vmem:[%s12319_s5] sm:$0xff]  }
 0x31d   :  { %7849 = vmatpush3.bf16.msra.mxu1 %v9173_v46 }
 0x31e   :  { %7850 = vmatprep.subr.bf16.mxu1 %v9174_v47  ;;  %v5990_v47 = vadd.f32 %v5989_v3, %v5947_v57  ;;  %v9186_v57 = vld [vmem:[%s12321_s7 + $0x28] sm:$0xff]  }
 0x31f   :  { %7829 = vmatpush3.bf16.msra.mxu0 %v9159_v14  ;;  %v5906_v14 = vadd.f32 %v5905_v16, %v5863_v49 }
 0x320   :  { %7876 = vmatprep.subr.bf16.mxu0 %v9193_v8  ;;  %v6033_v52 = vadd.f32 %v6032_v7, %v5990_v47 }
 0x321   :  { %7851 = vmatpush3.bf16.msra.mxu1 %v9175_v27  ;;  %v5949_v46 = vadd.f32 %v5948_v17, %v5906_v14  ;;  %v6031_v27 = vadd.f32 %v6030_v31, %v5988_v45  ;;  %v9182_v14 = vld [vmem:[%s12319_s5 + $0x8] sm:$0xff]   ;;  %v9187_v45 = vld [vmem:[%s12321_s7 + $0x20] sm:$0xff]  }
 0x322   :  { %6603 = vmatmul.mubr.bf16.vlgmr.msra.gmra.mxu0 %v6303_v24  ;;  %7896 = vmatprep.subr.bf16.mxu1 %v9193_v8 }
 0x323   :  { %7877 = vmatpush3.bf16.msra.mxu0 %v9176_v28  ;;  %v5992_v28 = vadd.f32 %v5991_v0, %v5949_v46  ;;  %7892 = vmatprep.mubr.msk.bf16.mxu0 %vm9194_vm0, %v9193_v8 }
 0x324   :  { %7878 = vmatprep.subr.bf16.mxu0 %v9193_v8 }
 0x325   :  { %v6035_v5 = vadd.f32 %v6034_v58, %v5992_v28 }
 0x327   :  { %7879 = vmatpush3.bf16.msra.mxu0 %v9177_v34  ;;  %v6029_v34 = vadd.f32 %v6028_v30, %v5986_v63  ;;  %v9188_v63 = vld [vmem:[%s12321_s7 + $0x18] sm:$0xff]  }
 0x328   :  { %7880 = vmatprep.subr.bf16.mxu0 %v9193_v8 }
 0x32b   :  { %7881 = vmatpush3.bf16.msra.mxu0 %v9178_v21 }
 0x32c   :  { %7882 = vmatprep.subr.bf16.mxu0 %v9193_v8 }
 0x32f   :  { %7883 = vmatpush3.bf16.msra.mxu0 %v9179_v59 }
 0x330   :  { %7884 = vmatprep.subr.bf16.mxu0 %v9193_v8 }
 0x333   :  { %7885 = vmatpush3.bf16.msra.mxu0 %v9180_v15 }
 0x334   :  { %7886 = vmatprep.subr.bf16.mxu0 %v9193_v8 }
 0x337   :  { %7887 = vmatpush3.bf16.msra.mxu0 %v9181_v60 }
 0x338   :  { %7888 = vmatprep.subr.bf16.mxu0 %v9193_v8 }
 0x33b   :  { %7889 = vmatpush3.bf16.msra.mxu0 %v9182_v14 }
 0x33c   :  { %7890 = vmatprep.subr.bf16.mxu0 %v9193_v8 }
 0x33f   :  { %7891 = vmatpush3.bf16.msra.mxu0 %v9183_v22 }
 0x342   :  { %v6071_v35 = vpop.f32.mrf.mxu0 }
 0x343   :  { %v6114_v51 = vpop.f32.mrf.mxu1  ;;  %v6072_v43 = vadd.f32 %v6071_v35, %v6029_v34  ;;  %v7758_v34 = vld [vmem:[%s12318_s4] ss:$0 sm:$0xff] }
 0x344   :  { %v6073_v26 = vpop.f32.mrf.mxu0 }
 0x345   :  { %v6116_v18 = vpop.f32.mrf.mxu1  ;;  %v6074_v37 = vadd.f32 %v6073_v26, %v6031_v27  ;;  %v6115_v33 = vadd.f32 %v6114_v51, %v6072_v43 }
 0x346   :  { %v6075_v36 = vpop.f32.mrf.mxu0 }
 0x347   :  { %v6118_v41 = vpop.f32.mrf.mxu1  ;;  %v6076_v53 = vadd.f32 %v6075_v36, %v6033_v52  ;;  %v6117_v4 = vadd.f32 %v6116_v18, %v6074_v37 }
 0x348   :  { %v6077_v23 = vpop.f32.mrf.mxu0 }
 0x349   :  { %v6120_v24 = vpop.f32.mrf.mxu1  ;;  %v6078_v32 = vadd.f32 %v6077_v23, %v6035_v5  ;;  %v6119_v56 = vadd.f32 %v6118_v41, %v6076_v53  ;;  %v9184_v23 = vld [vmem:[%s12321_s7 + $0x38] sm:$0xff]  }
 0x34b   :  { %v6121_v17 = vadd.f32 %v6120_v24, %v6078_v32  ;;  %v9185_v24 = vld [vmem:[%s12321_s7 + $0x30] sm:$0xff]  }
 0x382   :  { %v6157_v39 = vpop.f32.mrf.mxu0 }
 0x383   :  { %v6200_v40 = vpop.f32.mrf.mxu1  ;;  %v6158_v12 = vadd.f32 %v6157_v39, %v6115_v33 }
 0x384   :  { %v6159_v21 = vpop.f32.mrf.mxu0 }
 0x385   :  { %v6202_v59 = vpop.f32.mrf.mxu1  ;;  %v6160_v29 = vadd.f32 %v6159_v21, %v6117_v4  ;;  %v6201_v44 = vadd.f32 %v6200_v40, %v6158_v12  ;;  %v9190_v12 = vld [vmem:[%s12321_s7 + $0x8] sm:$0xff]  }
 0x386   :  { %v6161_v38 = vpop.f32.mrf.mxu0 }
 0x387   :  { %v6204_v11 = vpop.f32.mrf.mxu1  ;;  %v6162_v62 = vadd.f32 %v6161_v38, %v6119_v56  ;;  %v6203_v31 = vadd.f32 %v6202_v59, %v6160_v29  ;;  %v9189_v29 = vld [vmem:[%s12321_s7 + $0x10] sm:$0xff]  }
 0x388   :  { %v6163_v13 = vpop.f32.mrf.mxu0 }
 0x389   :  { %v6206_v16 = vpop.f32.mrf.mxu1  ;;  %v6164_v42 = vadd.f32 %v6163_v13, %v6121_v17  ;;  %v6205_v6 = vadd.f32 %v6204_v11, %v6162_v62  ;;  %v9191_v13 = vld [vmem:[%s12321_s7] sm:$0xff]  }
 0x38b   :  { %v6207_v51 = vadd.f32 %v6206_v16, %v6164_v42  ;;  %v7791_v16 = vld [vmem:[%s12320_s6] ss:$0 sm:$0xff] }
 0x3c2   :  { %v6243_v30 = vpop.f32.mrf.mxu0 }
 0x3c3   :  { %v6286_v19 = vpop.f32.mrf.mxu1  ;;  %v6244_v0 = vadd.f32 %v6243_v30, %v6201_v44 }
 0x3c4   :  { %v6245_v3 = vpop.f32.mrf.mxu0 }
 0x3c5   :  { %v6288_v7 = vpop.f32.mrf.mxu1  ;;  %v6246_v10 = vadd.f32 %v6245_v3, %v6203_v31  ;;  %v6287_v55 = vadd.f32 %v6286_v19, %v6244_v0 }
 0x3c6   :  { %v6247_v58 = vpop.f32.mrf.mxu0 }
 0x3c7   :  { %v6290_v35 = vpop.f32.mrf.mxu1  ;;  %v6248_v2 = vadd.f32 %v6247_v58, %v6205_v6  ;;  %v6289_v61 = vadd.f32 %v6288_v7, %v6246_v10  ;;  %v6297_v36 = vmax.f32 %v6287_v55, 0.0  ;;  %v7800_v58 = vld [vmem:[%s12322_s8] ss:$0 sm:$0xff] }
 0x3c8   :  { %v6249_v50 = vpop.f32.mrf.mxu0 }
 0x3c9   :  { %v6291_v26 = vadd.f32 %v6290_v35, %v6248_v2  ;;  %v6250_v18 = vadd.f32 %v6249_v50, %v6207_v51  ;;  %v6292_v54 = vpop.f32.mrf.mxu1  ;;  %v6298_v20 = vmax.f32 %v6289_v61, 0.0 }
 0x3cb   :  { %v6293_v1 = vadd.f32 %v6292_v54, %v6250_v18  ;;  %v6301_v9 = vmax.f32 %v6291_v26, 0.0 }
 0x3cd   :  { %v6302_v25 = vmax.f32 %v6293_v1, 0.0  ;;  %v6305_v49 = vpack.c.bf16 %v6301_v9, %v6297_v36 }
 0x3cf   :  { %v6306_v41 = vpack.c.bf16 %v6302_v25, %v6298_v20 }
 0x3d1   :  { %6643 = vmatprep.mubr.bf16.mxu1 %v6306_v41 }
 0x3d2   :  { %6644 = vmatmul.mubr.bf16.vlgmr.msra.gmra.mxu1 %v6305_v49 }
 0x3d3   :  { %7912 = vmatprep.mubr.msk.bf16.mxu1 %vm9194_vm0, %v9193_v8  ;;  %7897 = vmatpush3.bf16.msra.mxu1 %v9184_v23 }
 0x3d4   :  { %7898 = vmatprep.subr.bf16.mxu1 %v9193_v8 }
 0x3d7   :  { %7899 = vmatpush3.bf16.msra.mxu1 %v9185_v24 }
 0x3d8   :  { %7900 = vmatprep.subr.bf16.mxu1 %v9193_v8 }
 0x3db   :  { %7901 = vmatpush3.bf16.msra.mxu1 %v9186_v57 }
 0x3dc   :  { %7902 = vmatprep.subr.bf16.mxu1 %v9193_v8 }
 0x3df   :  { %7903 = vmatpush3.bf16.msra.mxu1 %v9187_v45 }
 0x3e0   :  { %7904 = vmatprep.subr.bf16.mxu1 %v9193_v8 }
 0x3e2   :  { %v7830_v39 = vpop.f32.mrf.mxu0 }
 0x3e3   :  { %7905 = vmatpush3.bf16.msra.mxu1 %v9188_v63 }
 0x3e4   :  { %7906 = vmatprep.subr.bf16.mxu1 %v9193_v8  ;;  %v7831_v40 = vpop.f32.mrf.mxu0 }
 0x3e5   :  { %v7832_v28 = vadd.f32 %v7831_v40, %v7830_v39 }
 0x3e6   :  { %v7833_v46 = vpop.f32.mrf.mxu0 }
 0x3e7   :  { %v6605_v43 = vadd.f32 %v7832_v28, %v7758_v34  ;;  %7907 = vmatpush3.bf16.msra.mxu1 %v9189_v29 }
 0x3e8   :  { %v7834_v47 = vpop.f32.mrf.mxu0  ;;  %7908 = vmatprep.subr.bf16.mxu1 %v9193_v8 }
 0x3e9   :  { %v7835_v59 = vadd.f32 %v7834_v47, %v7833_v46 }
 0x3eb   :  { %v6608_v53 = vadd.f32 %v7835_v59, %v7758_v34  ;;  %7909 = vmatpush3.bf16.msra.mxu1 %v9190_v12 }
 0x3ec   :  { %7910 = vmatprep.subr.bf16.mxu1 %v9193_v8  ;;  %v9195_v8 = vmov 1966171168  }
 0x3ed   :  { %v6886_v6 = vunpack.c.l.s4 %v9195_v8 }
 0x3ef   :  { %7911 = vmatpush3.bf16.msra.mxu1 %v9191_v13  ;;  %v6887_v0 = vunpack.c.0.s8 %v6886_v6 }
 0x3f1   :  { %v6890_v61 = vsub.s32 %v6887_v0, %v9378_v48 }
 0x492   :  { %v7852_v27 = vpop.f32.mrf.mxu1 }
 0x494   :  { %v7853_v21 = vpop.f32.mrf.mxu1 }
 0x495   :  { %v7854_v52 = vadd.f32 %v7853_v21, %v7852_v27 }
 0x496   :  { %v7855_v37 = vpop.f32.mrf.mxu1 }
 0x497   :  { %v6646_v38 = vadd.f32 %v7854_v52, %v6605_v43 }
 0x498   :  { %v7856_v5 = vpop.f32.mrf.mxu1 }
 0x499   :  { %v7857_v11 = vadd.f32 %v7856_v5, %v7855_v37  ;;  %v6652_v32 = vmax.f32 %v6646_v38, 0.0 }
 0x49b   :  { %v6649_v4 = vadd.f32 %v7857_v11, %v6608_v53 }
 0x49d   :  { %v6653_v33 = vmax.f32 %v6649_v4, 0.0 }
 0x49f   :  { %v6654_v56 = vpack.c.bf16 %v6653_v33, %v6652_v32 }
 0x4a1   :  { %7893 = vmatmul.mubr.bf16.vlgmr.msra.gmra.mxu0 %v6654_v56 }
 0x561   :  { %v6760_v17 = vpop.f32.mrf.mxu0 }
 0x562   :  { %v6761_v30 = vadd.f32 %v7791_v16, %v6760_v17 }
 0x563   :  { %v7894_v62 = vpop.f32.mrf.mxu0 }
 0x564   :  { %v6767_v44 = vmax.f32 %v6761_v30, 0.0 }
 0x565   :  { %v6763_v19 = vpop.f32.mrf.mxu0 }
 0x566   :  { %v6764_v31 = vadd.f32 %v7791_v16, %v6763_v19 }
 0x567   :  { %v7895_v42 = vpop.f32.mrf.mxu0 }
 0x568   :  { %v6768_v3 = vmax.f32 %v6764_v31, 0.0 }
 0x56a   :  { %v6769_v7 = vpack.c.bf16 %v6768_v3, %v6767_v44 }
 0x56c   :  { %7913 = vmatmul.mubr.bf16.vlgmr.msra.gmra.mxu1 %v6769_v7 }
 0x62c   :  { %v6875_v10 = vpop.f32.mrf.mxu1 }
 0x62d   :  { %v6876_v2 = vadd.f32 %v7800_v58, %v6875_v10 }
 0x62e   :  { %v7914_v35 = vpop.f32.mrf.mxu1 }
 0x630   :  { %v6878_v51 = vpop.f32.mrf.mxu1 }
 0x631   :  { %v6879_v50 = vadd.f32 %v7800_v58, %v6878_v51 }
 0x632   :  { %v7915_v26 = vpop.f32.mrf.mxu1 }
 0x633   :  { %v6882_v18 = vpack.c.bf16 %v6879_v50, %v6876_v2 }
 0x635   :  { %v6891_v55 = vrot.slane %v6882_v18, %v6890_v61 }
 0x637   :  { %7810 = vst.sshfl [vmem:[#allocation2] sm:$0x1 pattern:$0x73625140] %v6891_v55 }
 0x63e   :  { %v6967_v54 = vld [vmem:[#allocation2] sm:$0x1] }
 0x63f   :  { %6968 = vst [vmem:[%s12323_s9] sm:$0x1] %v6967_v54 }

</bundles_post_ra>
